<compile_context>
chip_gen: v6e
topology: v6e:2x2x1
jax: 0.10.0
libtpu: 0.0.40
codegen_flags: <defaults>
</compile_context>

<pallas_src>
import functools

import jax
import jax.numpy as jnp
import numpy as np
from jax import lax
from jax.experimental import pallas as pl
from jax.experimental.pallas import tpu as pltpu


def _attention_kernel(x_ref, wqkv_ref, wout_ref, bout_ref, o_ref,
                      *, heads, dim_head):
    # x_ref:    (1, C, N)   one batch element, channels-major (N on lanes)
    # wqkv_ref: (3H, C)     to_qkv weight with RMSNorm gain*sqrt(C) folded in
    # wout_ref: (C, H)      to_out weight
    # bout_ref: (C, 1)      to_out bias
    # o_ref:    (1, C, N)
    C = x_ref.shape[1]
    N = x_ref.shape[2]
    H = heads * dim_head
    scale = dim_head ** -0.5

    x = x_ref[0].astype(jnp.float32)                         # (C, N)

    # RMSNorm: F.normalize over channels (gain * sqrt(C) folded into wqkv).
    l2 = jnp.sqrt(jnp.sum(x * x, axis=0, keepdims=True))     # (1, N)
    xn = x / jnp.maximum(l2, 1e-12)                          # (C, N)

    # to_qkv 1x1 conv (no bias) == (3H, C) @ (C, N)
    qkv = jnp.dot(wqkv_ref[...].astype(jnp.float32), xn,
                  preferred_element_type=jnp.float32)        # (3H, N)

    w_out = wout_ref[...].astype(jnp.float32)                # (C, H)

    acc = jnp.zeros((C, N), jnp.float32)
    for h in range(heads):                                   # static unroll (heads=4)
        lo = h * dim_head
        qh = qkv[lo:lo + dim_head, :]                        # (d, N)
        kh = qkv[H + lo:H + lo + dim_head, :]                # (d, N)
        vh = qkv[2 * H + lo:2 * H + lo + dim_head, :]        # (d, N)

        # sim[i, j] = scale * sum_d q[d, i] * k[d, j]  (scale folded into q)
        sim = jnp.dot((qh * scale).T, kh,
                      preferred_element_type=jnp.float32)    # (N, N)
        m = jnp.max(sim, axis=-1, keepdims=True)
        p = jnp.exp(sim - m)
        denom = jnp.sum(p, axis=-1, keepdims=True)
        attn = p * pl.reciprocal(denom, approx=True)         # softmax rows

        # out_h[d, i] = sum_j v[d, j] * attn[i, j]   (trans-B dot, stays (d, N))
        out_h = lax.dot_general(vh, attn, (((1,), (1,)), ((), ())),
                                preferred_element_type=jnp.float32)

        # Per-head output projection, accumulated (no head concat).
        acc = acc + jnp.dot(w_out[:, lo:lo + dim_head], out_h,
                            preferred_element_type=jnp.float32)      # (C, N)

    y = acc + bout_ref[...].astype(jnp.float32)              # (C, 1) bcast over N
    o_ref[0] = y.astype(o_ref.dtype)                         # lane-dense store


def attention_forward(x_nchw, g, w_qkv, w_out, b_out, *, heads=4, dim_head=32):
    B, C, Himg, Wimg = x_nchw.shape
    N = Himg * Wimg
    hidden = heads * dim_head

    # NCHW -> (B, C, N): pure reshape, no transpose pass.
    x_seq = x_nchw.reshape(B, C, N)

    # Fold RMSNorm gain * sqrt(C) into the qkv weight (one-time, exact).
    wqkv_folded = w_qkv.reshape(3 * hidden, C) * (g.reshape(1, C) * (C ** 0.5))
    wout = w_out.reshape(C, hidden)
    bout = b_out.reshape(C, 1)

    kernel = functools.partial(_attention_kernel, heads=heads, dim_head=dim_head)

    out_seq = pl.pallas_call(
        kernel,
        out_shape=jax.ShapeDtypeStruct((B, C, N), x_nchw.dtype),
        grid=(B,),
        in_specs=[
            pl.BlockSpec((1, C, N), lambda b: (b, 0, 0)),
            pl.BlockSpec((3 * hidden, C), lambda b: (0, 0)),
            pl.BlockSpec((C, hidden), lambda b: (0, 0)),
            pl.BlockSpec((C, 1), lambda b: (0, 0)),
        ],
        out_specs=pl.BlockSpec((1, C, N), lambda b: (b, 0, 0)),
        compiler_params=pltpu.CompilerParams(
            # Batch elements are independent -> megacore parallel on v7x.
            dimension_semantics=("parallel",)),
    )(x_seq, wqkv_folded, wout, bout)

    # (B, C, N) -> NCHW: pure reshape.
    return out_seq.reshape(B, C, Himg, Wimg)


def attention_reference(x, g, w_qkv, w_out, b_out, *, heads=4, dim_head=32):
    """Pure-JAX reference matching the PyTorch module semantics."""
    B, C, Hh, Ww = x.shape
    hidden = heads * dim_head
    N = Hh * Ww
    l2 = jnp.sqrt(jnp.sum(x * x, axis=1, keepdims=True))
    xn = x / jnp.maximum(l2, 1e-12) * g.reshape(1, C, 1, 1) * (C ** 0.5)
    qkv = jnp.einsum('bchw,oc->bohw', xn, w_qkv.reshape(3 * hidden, C))
    q, k, v = jnp.split(qkv, 3, axis=1)

    def to_heads(t):  # b (h c) x y -> b h (x y) c
        return jnp.transpose(t.reshape(B, heads, dim_head, N), (0, 1, 3, 2))

    q, k, v = map(to_heads, (q, k, v))
    sim = jnp.einsum('bhid,bhjd->bhij', q, k) * (dim_head ** -0.5)
    attn = jax.nn.softmax(sim, axis=-1)
    out = jnp.einsum('bhij,bhjd->bhid', attn, v)             # (B, h, N, d)
    out = jnp.transpose(out, (0, 1, 3, 2)).reshape(B, hidden, Hh, Ww)
    y = jnp.einsum('bchw,oc->bohw', out, w_out.reshape(C, hidden))
    return y + b_out.reshape(1, C, 1, 1)


if __name__ == "__main__":
    dim, heads, dim_head = 4, 4, 32
    hidden = heads * dim_head
    B, Himg, Wimg = 2, 16, 16

    key = jax.random.PRNGKey(0)
    kx, kg, kqkv, kout, kb = jax.random.split(key, 5)

    x = jax.random.normal(kx, (B, dim, Himg, Wimg), dtype=jnp.float32)
    g = 1.0 + 0.1 * jax.random.normal(kg, (1, dim, 1, 1), jnp.float32)   # RMSNorm.g
    w_qkv = 0.05 * jax.random.normal(kqkv, (3 * hidden, dim, 1, 1), jnp.float32)
    w_out = 0.05 * jax.random.normal(kout, (dim, hidden, 1, 1), jnp.float32)
    b_out = 0.05 * jax.random.normal(kb, (dim,), jnp.float32)

    y = attention_forward(x, g, w_qkv, w_out, b_out,
                          heads=heads, dim_head=dim_head)
    y = jax.block_until_ready(y)

    y_ref = attention_reference(x, g, w_qkv, w_out, b_out,
                                heads=heads, dim_head=dim_head)
    np.testing.assert_allclose(np.asarray(y), np.asarray(y_ref),
                               rtol=2e-2, atol=2e-2)

    print("KERNEL_OK")
</pallas_src>

<mosaic_0001>
module attributes {stable_mosaic.version = 11 : i64} {
  func.func @_attention_kernel(%arg0: i32, %arg1: memref<1x4x256xf32, #tpu.memory_space<vmem>>, %arg2: memref<384x4xf32, #tpu.memory_space<vmem>>, %arg3: memref<4x128xf32, #tpu.memory_space<vmem>>, %arg4: memref<4x1xf32, #tpu.memory_space<vmem>>, %arg5: memref<1x4x256xf32, #tpu.memory_space<vmem>>) attributes {dimension_semantics = [#tpu.dimension_semantics<parallel>], iteration_bounds = array<i64: 2>, scalar_prefetch = 0 : i64, scratch_operands = 0 : i64, tpu.core_type = #tpu.core_type<tc>, window_params = [{transform_indices = @transform_0, window_bounds = array<i64: 1, 4, 256>}, {pipeline_mode = #tpu.pipeline_mode<synchronous>, transform_indices = @transform_1, window_bounds = array<i64: 384, 4>}, {pipeline_mode = #tpu.pipeline_mode<synchronous>, transform_indices = @transform_2, window_bounds = array<i64: 4, 128>}, {pipeline_mode = #tpu.pipeline_mode<synchronous>, transform_indices = @transform_3, window_bounds = array<i64: 4, 1>}, {transform_indices = @transform_4, window_bounds = array<i64: 1, 4, 256>}]} {
    %c0 = arith.constant 0 : index
    %c0_0 = arith.constant 0 : index
    %c0_1 = arith.constant 0 : index
    %0 = vector.load %arg1[%c0, %c0_0, %c0_1] : memref<1x4x256xf32, #tpu.memory_space<vmem>>, vector<1x4x256xf32>
    %1 = vector.shape_cast %0 : vector<1x4x256xf32> to vector<4x256xf32>
    %2 = arith.mulf %1, %1 : vector<4x256xf32>
    %cst = arith.constant dense<0.000000e+00> : vector<256xf32>
    %3 = vector.multi_reduction <add>, %2, %cst [0] : vector<4x256xf32> to vector<256xf32>
    %4 = vector.shape_cast %3 : vector<256xf32> to vector<1x256xf32>
    %5 = math.sqrt %4 : vector<1x256xf32>
    %cst_2 = arith.constant 9.99999996E-13 : f32
    %6 = vector.broadcast %cst_2 : f32 to vector<1x256xf32>
    %7 = arith.maximumf %5, %6 : vector<1x256xf32>
    %8 = vector.broadcast %7 : vector<1x256xf32> to vector<4x256xf32>
    %9 = arith.divf %1, %8 : vector<4x256xf32>
    %c0_3 = arith.constant 0 : index
    %c0_4 = arith.constant 0 : index
    %10 = vector.load %arg2[%c0_3, %c0_4] : memref<384x4xf32, #tpu.memory_space<vmem>>, vector<384x4xf32>
    %cst_5 = arith.constant dense<0.000000e+00> : vector<384x256xf32>
    %11 = tpu.matmul %10, %9, %cst_5 {dimension_numbers = #tpu.dot_dimension_numbers<[1], [0], [0], [1], [0, 0, 1, 1], [], []>} : vector<384x4xf32>, vector<4x256xf32>, vector<384x256xf32> -> vector<384x256xf32>
    %c0_6 = arith.constant 0 : index
    %c0_7 = arith.constant 0 : index
    %12 = vector.load %arg3[%c0_6, %c0_7] : memref<4x128xf32, #tpu.memory_space<vmem>>, vector<4x128xf32>
    %cst_8 = arith.constant 0.000000e+00 : f32
    %13 = vector.broadcast %cst_8 : f32 to vector<4x256xf32>
    %14 = vector.extract_strided_slice %11 {offsets = [0, 0], sizes = [32, 256], strides = [1, 1]} : vector<384x256xf32> to vector<32x256xf32>
    %15 = vector.extract_strided_slice %11 {offsets = [128, 0], sizes = [32, 256], strides = [1, 1]} : vector<384x256xf32> to vector<32x256xf32>
    %16 = vector.extract_strided_slice %11 {offsets = [256, 0], sizes = [32, 256], strides = [1, 1]} : vector<384x256xf32> to vector<32x256xf32>
    %cst_9 = arith.constant 0.176776692 : f32
    %17 = vector.broadcast %cst_9 : f32 to vector<32x256xf32>
    %18 = arith.mulf %14, %17 : vector<32x256xf32>
    %19 = tpu.transpose %18, [1, 0] : vector<32x256xf32> -> vector<256x32xf32>
    %cst_10 = arith.constant dense<0.000000e+00> : vector<256x256xf32>
    %20 = tpu.matmul %19, %15, %cst_10 {dimension_numbers = #tpu.dot_dimension_numbers<[1], [0], [0], [1], [0, 0, 1, 1], [], []>} : vector<256x32xf32>, vector<32x256xf32>, vector<256x256xf32> -> vector<256x256xf32>
    %cst_11 = arith.constant dense<0xFF800000> : vector<256xf32>
    %21 = vector.multi_reduction <maximumf>, %20, %cst_11 [1] : vector<256x256xf32> to vector<256xf32>
    %22 = vector.shape_cast %21 : vector<256xf32> to vector<256x1xf32>
    %23 = vector.broadcast %22 : vector<256x1xf32> to vector<256x256xf32>
    %24 = arith.subf %20, %23 : vector<256x256xf32>
    %25 = math.exp %24 : vector<256x256xf32>
    %cst_12 = arith.constant dense<0.000000e+00> : vector<256xf32>
    %26 = vector.multi_reduction <add>, %25, %cst_12 [1] : vector<256x256xf32> to vector<256xf32>
    %27 = vector.shape_cast %26 : vector<256xf32> to vector<256x1xf32>
    %28 = tpu.reciprocal %27 {approx = true} : vector<256x1xf32> -> vector<256x1xf32>
    %29 = vector.broadcast %28 : vector<256x1xf32> to vector<256x256xf32>
    %30 = arith.mulf %25, %29 : vector<256x256xf32>
    %cst_13 = arith.constant dense<0.000000e+00> : vector<32x256xf32>
    %31 = tpu.matmul %16, %30, %cst_13 {dimension_numbers = #tpu.dot_dimension_numbers<[1], [1], [0], [0], [0, 0, 1, 0], [], []>} : vector<32x256xf32>, vector<256x256xf32>, vector<32x256xf32> -> vector<32x256xf32>
    %32 = vector.extract_strided_slice %12 {offsets = [0, 0], sizes = [4, 32], strides = [1, 1]} : vector<4x128xf32> to vector<4x32xf32>
    %cst_14 = arith.constant dense<0.000000e+00> : vector<4x256xf32>
    %33 = tpu.matmul %32, %31, %cst_14 {dimension_numbers = #tpu.dot_dimension_numbers<[1], [0], [0], [1], [0, 0, 1, 1], [], []>} : vector<4x32xf32>, vector<32x256xf32>, vector<4x256xf32> -> vector<4x256xf32>
    %34 = arith.addf %13, %33 : vector<4x256xf32>
    %35 = vector.extract_strided_slice %11 {offsets = [32, 0], sizes = [32, 256], strides = [1, 1]} : vector<384x256xf32> to vector<32x256xf32>
    %36 = vector.extract_strided_slice %11 {offsets = [160, 0], sizes = [32, 256], strides = [1, 1]} : vector<384x256xf32> to vector<32x256xf32>
    %37 = vector.extract_strided_slice %11 {offsets = [288, 0], sizes = [32, 256], strides = [1, 1]} : vector<384x256xf32> to vector<32x256xf32>
    %cst_15 = arith.constant 0.176776692 : f32
    %38 = vector.broadcast %cst_15 : f32 to vector<32x256xf32>
    %39 = arith.mulf %35, %38 : vector<32x256xf32>
    %40 = tpu.transpose %39, [1, 0] : vector<32x256xf32> -> vector<256x32xf32>
    %cst_16 = arith.constant dense<0.000000e+00> : vector<256x256xf32>
    %41 = tpu.matmul %40, %36, %cst_16 {dimension_numbers = #tpu.dot_dimension_numbers<[1], [0], [0], [1], [0, 0, 1, 1], [], []>} : vector<256x32xf32>, vector<32x256xf32>, vector<256x256xf32> -> vector<256x256xf32>
    %cst_17 = arith.constant dense<0xFF800000> : vector<256xf32>
    %42 = vector.multi_reduction <maximumf>, %41, %cst_17 [1] : vector<256x256xf32> to vector<256xf32>
    %43 = vector.shape_cast %42 : vector<256xf32> to vector<256x1xf32>
    %44 = vector.broadcast %43 : vector<256x1xf32> to vector<256x256xf32>
    %45 = arith.subf %41, %44 : vector<256x256xf32>
    %46 = math.exp %45 : vector<256x256xf32>
    %cst_18 = arith.constant dense<0.000000e+00> : vector<256xf32>
    %47 = vector.multi_reduction <add>, %46, %cst_18 [1] : vector<256x256xf32> to vector<256xf32>
    %48 = vector.shape_cast %47 : vector<256xf32> to vector<256x1xf32>
    %49 = tpu.reciprocal %48 {approx = true} : vector<256x1xf32> -> vector<256x1xf32>
    %50 = vector.broadcast %49 : vector<256x1xf32> to vector<256x256xf32>
    %51 = arith.mulf %46, %50 : vector<256x256xf32>
    %cst_19 = arith.constant dense<0.000000e+00> : vector<32x256xf32>
    %52 = tpu.matmul %37, %51, %cst_19 {dimension_numbers = #tpu.dot_dimension_numbers<[1], [1], [0], [0], [0, 0, 1, 0], [], []>} : vector<32x256xf32>, vector<256x256xf32>, vector<32x256xf32> -> vector<32x256xf32>
    %53 = vector.extract_strided_slice %12 {offsets = [0, 32], sizes = [4, 32], strides = [1, 1]} : vector<4x128xf32> to vector<4x32xf32>
    %cst_20 = arith.constant dense<0.000000e+00> : vector<4x256xf32>
    %54 = tpu.matmul %53, %52, %cst_20 {dimension_numbers = #tpu.dot_dimension_numbers<[1], [0], [0], [1], [0, 0, 1, 1], [], []>} : vector<4x32xf32>, vector<32x256xf32>, vector<4x256xf32> -> vector<4x256xf32>
    %55 = arith.addf %34, %54 : vector<4x256xf32>
    %56 = vector.extract_strided_slice %11 {offsets = [64, 0], sizes = [32, 256], strides = [1, 1]} : vector<384x256xf32> to vector<32x256xf32>
    %57 = vector.extract_strided_slice %11 {offsets = [192, 0], sizes = [32, 256], strides = [1, 1]} : vector<384x256xf32> to vector<32x256xf32>
    %58 = vector.extract_strided_slice %11 {offsets = [320, 0], sizes = [32, 256], strides = [1, 1]} : vector<384x256xf32> to vector<32x256xf32>
    %cst_21 = arith.constant 0.176776692 : f32
    %59 = vector.broadcast %cst_21 : f32 to vector<32x256xf32>
    %60 = arith.mulf %56, %59 : vector<32x256xf32>
    %61 = tpu.transpose %60, [1, 0] : vector<32x256xf32> -> vector<256x32xf32>
    %cst_22 = arith.constant dense<0.000000e+00> : vector<256x256xf32>
    %62 = tpu.matmul %61, %57, %cst_22 {dimension_numbers = #tpu.dot_dimension_numbers<[1], [0], [0], [1], [0, 0, 1, 1], [], []>} : vector<256x32xf32>, vector<32x256xf32>, vector<256x256xf32> -> vector<256x256xf32>
    %cst_23 = arith.constant dense<0xFF800000> : vector<256xf32>
    %63 = vector.multi_reduction <maximumf>, %62, %cst_23 [1] : vector<256x256xf32> to vector<256xf32>
    %64 = vector.shape_cast %63 : vector<256xf32> to vector<256x1xf32>
    %65 = vector.broadcast %64 : vector<256x1xf32> to vector<256x256xf32>
    %66 = arith.subf %62, %65 : vector<256x256xf32>
    %67 = math.exp %66 : vector<256x256xf32>
    %cst_24 = arith.constant dense<0.000000e+00> : vector<256xf32>
    %68 = vector.multi_reduction <add>, %67, %cst_24 [1] : vector<256x256xf32> to vector<256xf32>
    %69 = vector.shape_cast %68 : vector<256xf32> to vector<256x1xf32>
    %70 = tpu.reciprocal %69 {approx = true} : vector<256x1xf32> -> vector<256x1xf32>
    %71 = vector.broadcast %70 : vector<256x1xf32> to vector<256x256xf32>
    %72 = arith.mulf %67, %71 : vector<256x256xf32>
    %cst_25 = arith.constant dense<0.000000e+00> : vector<32x256xf32>
    %73 = tpu.matmul %58, %72, %cst_25 {dimension_numbers = #tpu.dot_dimension_numbers<[1], [1], [0], [0], [0, 0, 1, 0], [], []>} : vector<32x256xf32>, vector<256x256xf32>, vector<32x256xf32> -> vector<32x256xf32>
    %74 = vector.extract_strided_slice %12 {offsets = [0, 64], sizes = [4, 32], strides = [1, 1]} : vector<4x128xf32> to vector<4x32xf32>
    %cst_26 = arith.constant dense<0.000000e+00> : vector<4x256xf32>
    %75 = tpu.matmul %74, %73, %cst_26 {dimension_numbers = #tpu.dot_dimension_numbers<[1], [0], [0], [1], [0, 0, 1, 1], [], []>} : vector<4x32xf32>, vector<32x256xf32>, vector<4x256xf32> -> vector<4x256xf32>
    %76 = arith.addf %55, %75 : vector<4x256xf32>
    %77 = vector.extract_strided_slice %11 {offsets = [96, 0], sizes = [32, 256], strides = [1, 1]} : vector<384x256xf32> to vector<32x256xf32>
    %78 = vector.extract_strided_slice %11 {offsets = [224, 0], sizes = [32, 256], strides = [1, 1]} : vector<384x256xf32> to vector<32x256xf32>
    %79 = vector.extract_strided_slice %11 {offsets = [352, 0], sizes = [32, 256], strides = [1, 1]} : vector<384x256xf32> to vector<32x256xf32>
    %cst_27 = arith.constant 0.176776692 : f32
    %80 = vector.broadcast %cst_27 : f32 to vector<32x256xf32>
    %81 = arith.mulf %77, %80 : vector<32x256xf32>
    %82 = tpu.transpose %81, [1, 0] : vector<32x256xf32> -> vector<256x32xf32>
    %cst_28 = arith.constant dense<0.000000e+00> : vector<256x256xf32>
    %83 = tpu.matmul %82, %78, %cst_28 {dimension_numbers = #tpu.dot_dimension_numbers<[1], [0], [0], [1], [0, 0, 1, 1], [], []>} : vector<256x32xf32>, vector<32x256xf32>, vector<256x256xf32> -> vector<256x256xf32>
    %cst_29 = arith.constant dense<0xFF800000> : vector<256xf32>
    %84 = vector.multi_reduction <maximumf>, %83, %cst_29 [1] : vector<256x256xf32> to vector<256xf32>
    %85 = vector.shape_cast %84 : vector<256xf32> to vector<256x1xf32>
    %86 = vector.broadcast %85 : vector<256x1xf32> to vector<256x256xf32>
    %87 = arith.subf %83, %86 : vector<256x256xf32>
    %88 = math.exp %87 : vector<256x256xf32>
    %cst_30 = arith.constant dense<0.000000e+00> : vector<256xf32>
    %89 = vector.multi_reduction <add>, %88, %cst_30 [1] : vector<256x256xf32> to vector<256xf32>
    %90 = vector.shape_cast %89 : vector<256xf32> to vector<256x1xf32>
    %91 = tpu.reciprocal %90 {approx = true} : vector<256x1xf32> -> vector<256x1xf32>
    %92 = vector.broadcast %91 : vector<256x1xf32> to vector<256x256xf32>
    %93 = arith.mulf %88, %92 : vector<256x256xf32>
    %cst_31 = arith.constant dense<0.000000e+00> : vector<32x256xf32>
    %94 = tpu.matmul %79, %93, %cst_31 {dimension_numbers = #tpu.dot_dimension_numbers<[1], [1], [0], [0], [0, 0, 1, 0], [], []>} : vector<32x256xf32>, vector<256x256xf32>, vector<32x256xf32> -> vector<32x256xf32>
    %95 = vector.extract_strided_slice %12 {offsets = [0, 96], sizes = [4, 32], strides = [1, 1]} : vector<4x128xf32> to vector<4x32xf32>
    %cst_32 = arith.constant dense<0.000000e+00> : vector<4x256xf32>
    %96 = tpu.matmul %95, %94, %cst_32 {dimension_numbers = #tpu.dot_dimension_numbers<[1], [0], [0], [1], [0, 0, 1, 1], [], []>} : vector<4x32xf32>, vector<32x256xf32>, vector<4x256xf32> -> vector<4x256xf32>
    %97 = arith.addf %76, %96 : vector<4x256xf32>
    %c0_33 = arith.constant 0 : index
    %c0_34 = arith.constant 0 : index
    %98 = vector.load %arg4[%c0_33, %c0_34] : memref<4x1xf32, #tpu.memory_space<vmem>>, vector<4x1xf32>
    %99 = vector.broadcast %98 : vector<4x1xf32> to vector<4x256xf32>
    %100 = arith.addf %97, %99 : vector<4x256xf32>
    %c0_35 = arith.constant 0 : index
    %c0_36 = arith.constant 0 : index
    %c0_37 = arith.constant 0 : index
    %101 = vector.load %arg5[%c0_35, %c0_36, %c0_37] : memref<1x4x256xf32, #tpu.memory_space<vmem>>, vector<1x4x256xf32>
    %102 = vector.shape_cast %101 : vector<1x4x256xf32> to vector<4x256xf32>
    %103 = vector.shape_cast %100 : vector<4x256xf32> to vector<1x4x256xf32>
    tpu.vector_store %arg5[%c0_35, %c0_36, %c0_37], %103 {strides = array<i32>} : memref<1x4x256xf32, #tpu.memory_space<vmem>>, vector<1x4x256xf32>,
    return
  }
  func.func @transform_0(%arg0: i32) -> (i32, i32, i32) {
    %c0_i32 = arith.constant 0 : i32
    %c0_i32_0 = arith.constant 0 : i32
    %c0_i32_1 = arith.constant 0 : i32
    return %arg0, %c0_i32, %c0_i32_0 : i32, i32, i32
  }
  func.func @transform_1(%arg0: i32) -> (i32, i32) {
    %c0_i32 = arith.constant 0 : i32
    %c0_i32_0 = arith.constant 0 : i32
    %c0_i32_1 = arith.constant 0 : i32
    return %c0_i32, %c0_i32_0 : i32, i32
  }
  func.func @transform_2(%arg0: i32) -> (i32, i32) {
    %c0_i32 = arith.constant 0 : i32
    %c0_i32_0 = arith.constant 0 : i32
    %c0_i32_1 = arith.constant 0 : i32
    return %c0_i32, %c0_i32_0 : i32, i32
  }
  func.func @transform_3(%arg0: i32) -> (i32, i32) {
    %c0_i32 = arith.constant 0 : i32
    %c0_i32_0 = arith.constant 0 : i32
    %c0_i32_1 = arith.constant 0 : i32
    return %c0_i32, %c0_i32_0 : i32, i32
  }
  func.func @transform_4(%arg0: i32) -> (i32, i32, i32) {
    %c0_i32 = arith.constant 0 : i32
    %c0_i32_0 = arith.constant 0 : i32
    %c0_i32_1 = arith.constant 0 : i32
    return %arg0, %c0_i32, %c0_i32_0 : i32, i32, i32
  }
}

</mosaic_0001>

<bundles_post_ra>
// kernel: tpu_custom_call.1
= control target key start
LH: loop header
LB: loop body
LE: loop exit
PB: predicated region body
PF: predicated region fallthrough
CT: control target
= control target key end

     0   :  { %9 = vsyncpa [#allocation3], 0  ;;  %s9174_s0 = inlined_call_operand.vmem [shape: f32[2,4,256], index: 0, kind: input, shape index: {}]   ;;  %s9175_s1 = inlined_call_operand.vmem [shape: f32[384,4], index: 1, kind: input, shape index: {}]   ;;  %s9176_s2 = inlined_call_operand.vmem [shape: f32[4,128], index: 2, kind: input, shape index: {}]   ;;  %s9177_s3 = inlined_call_operand.vmem [shape: f32[4,1], index: 3, kind: input, shape index: {}]   ;;  %s9178_s4 = inlined_call_operand.hbm [shape: f32[2,4,256], index: 4, kind: output, shape index: {}]  }
   0x1   :  { %11 = vsyncpa [#allocation3 + $0x1], 0  ;;  %s6268_s15 = smov 0   ;;  %s6270_s16 = smov 0  }
   0x2   :  { %s6272_s17 = smov 0   ;;  %s6274_s18 = smov 0  }
   0x3 LB: > { %s6289_s19 = sadd.s32 4294967295, %s6235_s18   ;;  %s5158_s20 = sadd.s32 4294967294, %s6235_s18   ;;  %s6235_s18 = sphi %s6274_s18, %s9691_s18   ;;  %s6231_s17 = sphi %s6272_s17, %s9690_s17   ;;  %s6227_s16 = sphi %s6270_s16, %s9689_s16   ;;  %s6223_s15 = sphi %s6268_s15, %s9688_s15  }
   0x4   : > { %s6293_s21 = sadd.s32 1, %s6235_s18   ;;  %s113_s22 = sadd.s32 1, %s6231_s17 }
   0x5   : > { %s110_s23 = ssub.s32 %s6235_s18, %s6293_s21  ;;  %p123_p0 = scmp.ne.s32.totalorder %s6231_s17, %s6227_s16 }
   0x6   : > { %p111_p1 = scmp.eq.s32.totalorder %s110_s23, 0  ;;  %p124_p2 = scmp.eq.s32.totalorder %s6289_s19, 1 }
   0x7   : > { %p129_p3 = scmp.ne.s32.totalorder %s6227_s16, %s6223_s15  ;;  %p130_p4 = scmp.eq.s32.totalorder %s5158_s20, 1 }
   0x8   : > { %s6304_s24 = scalar_select %p111_p1, %s6231_s17, %s113_s22  }
   0x9   : > { %p6306_p5 = por %p124_p2, %p123_p0  ;;  %p6310_p6 = por %p130_p4, %p129_p3 }
   0xa   : > { %p5161_p7 = scmp.ge.s32.totalorder %s6235_s18, 1  ;;  %p165_p8 = scmp.lt.s32.totalorder %s6235_s18, 3 }
   0xc   : > { %p166_p9 = pnand %p5161_p7, %p165_p8 }
   0xe   : > { %169 = sbr.rel (%p166_p9) target bundleno = 4102 (0x1006), region = 36 }
  0x13   : > { %p191_p10 = scmp.lt.s32.totalorder %s6289_s19, 1  ;;  %v9179_v0 = vmov 0.0   ;;  %vm201_vm0 = vcmask 1043456   ;;  %v238_v34 = vld [vmem:[%s9175_s1] sm:$0xff]  ;;  %vm288_vm5 = vcmask 31744   ;;  %v239_v35 = vld [vmem:[%s9175_s1 + $0x8] sm:$0xff] }
  0x14   : > { %501 = vmatprep.mubr.f32.mxu0 %v9179_v0  ;;  %1024 = vmatprep.mubr.f32.mxu1 %v9179_v0  ;;  %v240_v36 = vld [vmem:[%s9175_s1 + $0x10] sm:$0xff]  ;;  %v241_v37 = vld [vmem:[%s9175_s1 + $0x18] sm:$0xff]  ;;  %v242_v38 = vld [vmem:[%s9175_s1 + $0x20] sm:$0xff]  ;;  %vm863_vm6 = vcmask 261120   ;;  %s6238_s7 = smov 96   ;;  %s6240_s8 = smov 32  }
  0x15   : > { %s192_s27 = scalar_select %p191_p10, %s6289_s19, 1  ;;  %v243_v39 = vld [vmem:[%s9175_s1 + $0x28] sm:$0xff]  ;;  %v244_v40 = vld [vmem:[%s9175_s1 + $0x30] sm:$0xff]  ;;  %v245_v41 = vld [vmem:[%s9175_s1 + $0x38] sm:$0xff] }
  0x16   : > { %v246_v42 = vld [vmem:[%s9175_s1 + $0x40] sm:$0xff]  ;;  %v247_v43 = vld [vmem:[%s9175_s1 + $0x48] sm:$0xff]  ;;  %v248_v44 = vld [vmem:[%s9175_s1 + $0x50] sm:$0xff]  ;;  %s188_s11 = sand.u32 1, %s6227_s16   ;;  %s5353_s13 = sshll.u32 %s6289_s19, 7 }
  0x17   : > { %s5352_s28 = sshll.u32 %s192_s27, 3  ;;  %v249_v45 = vld [vmem:[%s9175_s1 + $0x58] sm:$0xff]  ;;  %v250_v46 = vld [vmem:[%s9175_s1 + $0x60] sm:$0xff]  ;;  %v251_v47 = vld [vmem:[%s9175_s1 + $0x68] sm:$0xff]  ;;  %s5162_s12 = sshll.u32 %s188_s11, 3 }
  0x18   : > { %s195_s5 = scalar_lea.vmem %s9174_s0, %s5352_s28  ;;  %v252_v48 = vld [vmem:[%s9175_s1 + $0x70] sm:$0xff]  ;;  %v253_v49 = vld [vmem:[%s9175_s1 + $0x78] sm:$0xff]  ;;  %v254_v50 = vld [vmem:[%s9175_s1 + $0x80] sm:$0xff]  ;;  %s190_s14 = scalar_lea.vmem [#allocation2], %s5162_s12 }
  0x19   : > { %v196_v1 = vld [vmem:[%s195_s5] sm:$0xff]  ;;  %v255_v51 = vld [vmem:[%s9175_s1 + $0x88] sm:$0xff]  ;;  %v256_v52 = vld [vmem:[%s9175_s1 + $0x90] sm:$0xff]  ;;  %s6239_s5 = smov 64   ;;  %s5099_s20 = sshll.u32 %s190_s14, 4  ;;  %s5100_s20 = int_to_ptr.vmem [resolvable:$true] %s5099_s20 }
  0x1a   : > { %v197_v2 = vmul.f32 %v196_v1, %v196_v1  ;;  %v257_v53 = vld [vmem:[%s9175_s1 + $0x98] sm:$0xff]  ;;  %s5097_s27 = scalar_lea.hbm %s9178_s4, %s5353_s13  ;;  %s5085_s28 = scalar_lea.sflag [#allocation3], %s188_s11 }
  0x1b   : > { %s6175_s29 = scalar_lea.vmem %s5100_s20, 128  ;;  %s6242_s30 = smov [#allocation2]  }
  0x1c   : > { %v199_v3 = vcombine.high %v197_v2, %v197_v2  ;;  %v202_v4 = vsel %vm201_vm0, %v197_v2, 0.0  ;;  %p6176_p11 = scmp.ne.s32.totalorder %s5100_s20, %s6175_s29 }
  0x1d   : > { %v203_v5 = vrot.slane %v202_v4, 4 }
  0x1e   : > { %v209_v6 = vsel %vm201_vm0, %v199_v3, 0.0  ;;  %p6177_p12 = pnand %p6176_p11, %p6306_p5 }
  0x1f   : > { %v204_v7 = vadd.f32 %v203_v5, %v202_v4  ;;  %v210_v8 = vrot.slane %v209_v6, 4 }
  0x20   : > { %p6178_p13 = pneg %p6177_p12 }
  0x21   : > { %v205_v9 = vrot.slane %v204_v7, 2  ;;  %v211_v10 = vadd.f32 %v210_v8, %v209_v6 }
  0x23   : > { %v206_v11 = vadd.f32 %v205_v9, %v204_v7  ;;  %v212_v12 = vrot.slane %v211_v10, 2 }
  0x25   : > { %v207_v13 = vrot.slane %v206_v11, 1  ;;  %v213_v14 = vadd.f32 %v212_v12, %v211_v10 }
  0x27   : > { %v208_v15 = vadd.f32 %v207_v13, %v206_v11  ;;  %v214_v16 = vrot.slane %v213_v14, 1 }
  0x29   : > { %v215_v17 = vadd.f32 %v214_v16, %v213_v14  ;;  %5399 = vrsqrt.f32 %v208_v15  ;;  %vm218_vm1 = vcmp.eq.f32.partialorder %v208_v15, inf  ;;  %v221_v19 = vand.u32 2147483648, %v208_v15 }
  0x2a   : > { %vm220_vm2 = vcmp.eq.f32.partialorder %v208_v15, 0.0 }
  0x2b   : > { %5401 = vrsqrt.f32 %v215_v17  ;;  %vm225_vm3 = vcmp.eq.f32.partialorder %v215_v17, inf  ;;  %v228_v22 = vand.u32 2147483648, %v215_v17  ;;  %vm227_vm4 = vcmp.eq.f32.partialorder %v215_v17, 0.0 }
  0x36   : > { %v5400_v18 = vpop.eup %5399 }
  0x37   : > { %v217_v20 = vmul.f32 %v5400_v18, %v208_v15 }
  0x38   : > { %v5402_v21 = vpop.eup %5401 }
  0x39   : > { %v219_v23 = vsel %vm218_vm1, %v208_v15, %v217_v20  ;;  %v224_v24 = vmul.f32 %v5402_v21, %v215_v17 }
  0x3a   : > { %v222_v25 = vsel %vm220_vm2, %v221_v19, %v219_v23 }
  0x3b   : > { %v226_v26 = vsel %vm225_vm3, %v215_v17, %v224_v24  ;;  %v230_v27 = vmax.f32 %v222_v25, 1e-12 }
  0x3c   : > { %v229_v28 = vsel %vm227_vm4, %v228_v22, %v226_v26 }
  0x3d   : > { %v231_v29 = vmax.f32 %v229_v28, 1e-12 }
  0x3f   : > { %v234_v30 = vcombine.low %v230_v27, %v231_v29 }
  0x41   : > { %5403 = vrcp.f32 %v234_v30 }
  0x4e   : > { %v5404_v31 = vpop.eup %5403 }
  0x4f   : > { %v237_v32 = vmul.f32 %v5404_v31, %v196_v1 }
  0x51   : > { %v287_v33 = vcombine.high %v237_v32, %v237_v32 }
  0x53   : > { %5165 = vmatprep.subr.msk.mxu0 %vm201_vm0, %v287_v33 }
  0x54   : > { %5166 = vmatpush1.msk.msra.mxu0 %vm201_vm0, %v237_v32 }
  0x55   : > { %5167 = vmatmul.mubr.msk.f32.vlgmr.msra.gmra.mxu0 %vm288_vm5, %v238_v34 }
  0x56   : > { %507 = vmatprep.mubr.f32.mxu0 %v9179_v0 }
  0x59   : > { %5168 = vmatmul.mubr.msk.f32.gmra.mxu0 %vm288_vm5, %v239_v35 }
  0x5a   : > { %513 = vmatprep.mubr.f32.mxu0 %v9179_v0 }
  0x5d   : > { %5169 = vmatmul.mubr.msk.f32.gmra.mxu0 %vm288_vm5, %v240_v36 }
  0x5e   : > { %519 = vmatprep.mubr.f32.mxu0 %v9179_v0 }
  0x61   : > { %5170 = vmatmul.mubr.msk.f32.gmra.mxu0 %vm288_vm5, %v241_v37 }
  0x62   : > { %525 = vmatprep.mubr.f32.mxu0 %v9179_v0 }
  0x65   : > { %5171 = vmatmul.mubr.msk.f32.gmra.mxu0 %vm288_vm5, %v242_v38 }
  0x66   : > { %531 = vmatprep.mubr.f32.mxu0 %v9179_v0 }
  0x69   : > { %5172 = vmatmul.mubr.msk.f32.gmra.mxu0 %vm288_vm5, %v243_v39 }
  0x6a   : > { %537 = vmatprep.mubr.f32.mxu0 %v9179_v0 }
  0x6d   : > { %5173 = vmatmul.mubr.msk.f32.gmra.mxu0 %vm288_vm5, %v244_v40 }
  0x6e   : > { %543 = vmatprep.mubr.f32.mxu0 %v9179_v0 }
  0x71   : > { %5174 = vmatmul.mubr.msk.f32.gmra.mxu0 %vm288_vm5, %v245_v41 }
  0x72   : > { %549 = vmatprep.mubr.f32.mxu0 %v9179_v0 }
  0x75   : > { %5175 = vmatmul.mubr.msk.f32.gmra.mxu0 %vm288_vm5, %v246_v42 }
  0x76   : > { %555 = vmatprep.mubr.f32.mxu0 %v9179_v0 }
  0x79   : > { %5176 = vmatmul.mubr.msk.f32.gmra.mxu0 %vm288_vm5, %v247_v43 }
  0x7a   : > { %561 = vmatprep.mubr.f32.mxu0 %v9179_v0 }
  0x7d   : > { %5177 = vmatmul.mubr.msk.f32.gmra.mxu0 %vm288_vm5, %v248_v44 }
  0x7e   : > { %567 = vmatprep.mubr.f32.mxu0 %v9179_v0 }
  0x81   : > { %5178 = vmatmul.mubr.msk.f32.gmra.mxu0 %vm288_vm5, %v249_v45 }
  0x82   : > { %573 = vmatprep.mubr.f32.mxu0 %v9179_v0 }
  0x85   : > { %5179 = vmatmul.mubr.msk.f32.gmra.mxu0 %vm288_vm5, %v250_v46 }
  0x86   : > { %579 = vmatprep.mubr.f32.mxu0 %v9179_v0 }
  0x89   : > { %5180 = vmatmul.mubr.msk.f32.gmra.mxu0 %vm288_vm5, %v251_v47 }
  0x8a   : > { %585 = vmatprep.mubr.f32.mxu0 %v9179_v0 }
  0x8d   : > { %5181 = vmatmul.mubr.msk.f32.gmra.mxu0 %vm288_vm5, %v252_v48 }
  0x8e   : > { %591 = vmatprep.mubr.f32.mxu0 %v9179_v0 }
  0x91   : > { %5182 = vmatmul.mubr.msk.f32.gmra.mxu0 %vm288_vm5, %v253_v49 }
  0x92   : > { %597 = vmatprep.mubr.f32.mxu0 %v9179_v0 }
  0x95   : > { %5183 = vmatmul.mubr.msk.f32.gmra.mxu0 %vm288_vm5, %v254_v50 }
  0x96   : > { %603 = vmatprep.mubr.f32.mxu0 %v9179_v0 }
  0x99   : > { %5184 = vmatmul.mubr.msk.f32.gmra.mxu0 %vm288_vm5, %v255_v51 }
  0x9a   : > { %609 = vmatprep.mubr.f32.mxu0 %v9179_v0 }
  0x9d   : > { %5185 = vmatmul.mubr.msk.f32.gmra.mxu0 %vm288_vm5, %v256_v52 }
  0x9e   : > { %615 = vmatprep.mubr.f32.mxu0 %v9179_v0 }
  0xa1   : > { %5186 = vmatmul.mubr.msk.f32.gmra.mxu0 %vm288_vm5, %v257_v53 }
  0xa2   : > { %621 = vmatprep.mubr.f32.mxu0 %v9179_v0 }
 0x115   : > { %v503_v54 = vpop.f32.mrf.mxu0 }
 0x116   : > { %v791_v55 = vmul.f32 0.17677669, %v503_v54 }
 0x117   : > { %v505_v56 = vpop.f32.mrf.mxu0 }
 0x118   : > { %799 = vxpose.xlu0.b32.start [1/4] (short) %v791_v55, 128  ;;  %v792_v57 = vmul.f32 0.17677669, %v505_v56 }
 0x119   : > { %v509_v58 = vpop.f32.mrf.mxu0 }
 0x11a   : > { %v793_v59 = vmul.f32 0.17677669, %v509_v58  ;;  %831 = vxpose.xlu1.b32.start [1/4] (short) %v792_v57, 128 }
 0x11b   : > { %v511_v60 = vpop.f32.mrf.mxu0 }
 0x11c   : > { %800 = vxpose.xlu0.b32.cont [2/4] (short) %v793_v59, 128  ;;  %v794_v61 = vmul.f32 0.17677669, %v511_v60 }
 0x11d   : > { %v515_v62 = vpop.f32.mrf.mxu0 }
 0x11e   : > { %v795_v63 = vmul.f32 0.17677669, %v515_v62  ;;  %832 = vxpose.xlu1.b32.cont [2/4] (short) %v794_v61, 128 }
 0x11f   : > { %v517_v1 = vpop.f32.mrf.mxu0 }
 0x120   : > { %801 = vxpose.xlu0.b32.cont [3/4] (short) %v795_v63, 128  ;;  %v796_v2 = vmul.f32 0.17677669, %v517_v1 }
 0x121   : > { %v521_v3 = vpop.f32.mrf.mxu0 }
 0x122   : > { %v797_v4 = vmul.f32 0.17677669, %v521_v3  ;;  %833 = vxpose.xlu1.b32.cont [3/4] (short) %v796_v2, 128 }
 0x123   : > { %v523_v5 = vpop.f32.mrf.mxu0 }
 0x124   : > { %802 = vxpose.xlu0.b32.end [4/4] (short) %v797_v4, 128  ;;  %v798_v6 = vmul.f32 0.17677669, %v523_v5 }
 0x125   : > { %v6427_v7 = vpop.f32.mrf.mxu0 }
 0x126   : > { %9302 = vst [vmem:[#allocation5_spill] sm:$0xff] %v6427_v7  ;;  %834 = vxpose.xlu1.b32.end [4/4] (short) %v798_v6, 128 }
 0x127   : > { %v6429_v8 = vpop.f32.mrf.mxu0 }
 0x128   : > { %9303 = vst [vmem:[#allocation6_spill] sm:$0xff] %v6429_v8 }
 0x129   : > { %v6431_v9 = vpop.f32.mrf.mxu0 }
 0x12a   : > { %9304 = vst [vmem:[#allocation7_spill] sm:$0xff] %v6431_v9 }
 0x12b   : > { %v6433_v10 = vpop.f32.mrf.mxu0 }
 0x12c   : > { %9305 = vst [vmem:[#allocation8_spill] sm:$0xff] %v6433_v10 }
 0x12d   : > { %v6435_v11 = vpop.f32.mrf.mxu0 }
 0x12e   : > { %9306 = vst [vmem:[#allocation9_spill] sm:$0xff] %v6435_v11 }
 0x12f   : > { %v6437_v12 = vpop.f32.mrf.mxu0 }
 0x130   : > { %9307 = vst [vmem:[#allocation10_spill] sm:$0xff] %v6437_v12 }
 0x131   : > { %v6439_v13 = vpop.f32.mrf.mxu0 }
 0x132   : > { %9308 = vst [vmem:[#allocation11_spill] sm:$0xff] %v6439_v13 }
 0x133   : > { %v6441_v14 = vpop.f32.mrf.mxu0 }
 0x134   : > { %9309 = vst [vmem:[#allocation12_spill] sm:$0xff] %v6441_v14 }
 0x135   : > { %v6443_v15 = vpop.f32.mrf.mxu0 }
 0x136   : > { %9310 = vst [vmem:[#allocation13_spill] sm:$0xff] %v6443_v15 }
 0x137   : > { %v6445_v16 = vpop.f32.mrf.mxu0 }
 0x138   : > { %9311 = vst [vmem:[#allocation14_spill] sm:$0xff] %v6445_v16 }
 0x139   : > { %v6447_v17 = vpop.f32.mrf.mxu0 }
 0x13a   : > { %9312 = vst [vmem:[#allocation15_spill] sm:$0xff] %v6447_v17 }
 0x13b   : > { %v6449_v18 = vpop.f32.mrf.mxu0 }
 0x13c   : > { %9313 = vst [vmem:[#allocation16_spill] sm:$0xff] %v6449_v18 }
 0x13d   : > { %v6451_v19 = vpop.f32.mrf.mxu0 }
 0x13e   : > { %9314 = vst [vmem:[#allocation17_spill] sm:$0xff] %v6451_v19 }
 0x13f   : > { %v6453_v20 = vpop.f32.mrf.mxu0 }
 0x140   : > { %9315 = vst [vmem:[#allocation18_spill] sm:$0xff] %v6453_v20 }
 0x141   : > { %v6455_v21 = vpop.f32.mrf.mxu0 }
 0x142   : > { %9316 = vst [vmem:[#allocation19_spill] sm:$0xff] %v6455_v21 }
 0x143   : > { %v6457_v22 = vpop.f32.mrf.mxu0 }
 0x144   : > { %9317 = vst [vmem:[#allocation20_spill] sm:$0xff] %v6457_v22 }
 0x145   : > { %v6459_v23 = vpop.f32.mrf.mxu0 }
 0x146   : > { %9318 = vst [vmem:[#allocation21_spill] sm:$0xff] %v6459_v23 }
 0x147   : > { %v6461_v24 = vpop.f32.mrf.mxu0 }
 0x148   : > { %9319 = vst [vmem:[#allocation22_spill] sm:$0xff] %v6461_v24 }
 0x149   : > { %v6463_v25 = vpop.f32.mrf.mxu0 }
 0x14a   : > { %9320 = vst [vmem:[#allocation23_spill] sm:$0xff] %v6463_v25 }
 0x14b   : > { %v6465_v26 = vpop.f32.mrf.mxu0 }
 0x14c   : > { %9321 = vst [vmem:[#allocation24_spill] sm:$0xff] %v6465_v26 }
 0x14d   : > { %v6467_v27 = vpop.f32.mrf.mxu0 }
 0x14e   : > { %9322 = vst [vmem:[#allocation25_spill] sm:$0xff] %v6467_v27 }
 0x14f   : > { %v6469_v28 = vpop.f32.mrf.mxu0 }
 0x150   : > { %9323 = vst [vmem:[#allocation26_spill] sm:$0xff] %v6469_v28 }
 0x151   : > { %v6471_v29 = vpop.f32.mrf.mxu0 }
 0x152   : > { %9324 = vst [vmem:[#allocation27_spill] sm:$0xff] %v6471_v29 }
 0x153   : > { %v6473_v30 = vpop.f32.mrf.mxu0 }
 0x154   : > { %9325 = vst [vmem:[#allocation28_spill] sm:$0xff] %v6473_v30 }
 0x155   : > { %v599_v31 = vpop.f32.mrf.mxu0 }
 0x157   : > { %v601_v32 = vpop.f32.mrf.mxu0 }
 0x159   : > { %v605_v33 = vpop.f32.mrf.mxu0 }
 0x15b   : > { %v607_v34 = vpop.f32.mrf.mxu0 }
 0x15d   : > { %v611_v35 = vpop.f32.mrf.mxu0 }
 0x15f   : > { %v613_v36 = vpop.f32.mrf.mxu0 }
 0x161   : > { %v617_v37 = vpop.f32.mrf.mxu0 }
 0x163   : > { %v619_v38 = vpop.f32.mrf.mxu0 }
 0x164   : > { %984 = vmatprep.subr.mxu1 %v619_v38 }
 0x165   : > { %985 = vmatpush1.msra.mxu1 %v617_v37 }
 0x166   : > { %986 = vmatprep.subr.mxu1 %v613_v36 }
 0x167   : > { %987 = vmatpush1.msra.mxu1 %v611_v35 }
 0x168   : > { %988 = vmatprep.subr.mxu1 %v607_v34 }
 0x169   : > { %989 = vmatpush1.msra.mxu1 %v605_v33 }
 0x16a   : > { %990 = vmatprep.subr.mxu1 %v601_v32 }
 0x16b   : > { %991 = vmatpush1.msra.mxu1 %v599_v31 }
 0x194   : > { %v815_v39 = vpop.trf.xlu0 }
 0x195   : > { %5215 = vmatmul.mubr.msk.f32.vlgmr.msra.gmra.mxu1 %vm863_vm6, %v815_v39 }
 0x196   : > { %1030 = vmatprep.mubr.f32.mxu1 %v9179_v0  ;;  %v847_v48 = vpop.trf.xlu1 }
 0x198   : > { %v816_v40 = vpop.trf.xlu0 }
 0x199   : > { %5216 = vmatmul.mubr.msk.f32.gmra.mxu1 %vm863_vm6, %v816_v40 }
 0x19a   : > { %1036 = vmatprep.mubr.f32.mxu1 %v9179_v0  ;;  %v848_v50 = vpop.trf.xlu1 }
 0x19c   : > { %v817_v41 = vpop.trf.xlu0 }
 0x19d   : > { %5217 = vmatmul.mubr.msk.f32.gmra.mxu1 %vm863_vm6, %v817_v41 }
 0x19e   : > { %1042 = vmatprep.mubr.f32.mxu1 %v9179_v0  ;;  %v849_v53 = vpop.trf.xlu1 }
 0x1a0   : > { %v818_v42 = vpop.trf.xlu0 }
 0x1a1   : > { %5218 = vmatmul.mubr.msk.f32.gmra.mxu1 %vm863_vm6, %v818_v42 }
 0x1a2   : > { %1048 = vmatprep.mubr.f32.mxu1 %v9179_v0  ;;  %v850_v55 = vpop.trf.xlu1 }
 0x1a4   : > { %v819_v43 = vpop.trf.xlu0 }
 0x1a5   : > { %5219 = vmatmul.mubr.msk.f32.gmra.mxu1 %vm863_vm6, %v819_v43 }
 0x1a6   : > { %1054 = vmatprep.mubr.f32.mxu1 %v9179_v0  ;;  %v851_v58 = vpop.trf.xlu1 }
 0x1a8   : > { %v820_v44 = vpop.trf.xlu0 }
 0x1a9   : > { %5220 = vmatmul.mubr.msk.f32.gmra.mxu1 %vm863_vm6, %v820_v44 }
 0x1aa   : > { %1060 = vmatprep.mubr.f32.mxu1 %v9179_v0  ;;  %v852_v60 = vpop.trf.xlu1 }
 0x1ac   : > { %v821_v45 = vpop.trf.xlu0 }
 0x1ad   : > { %5221 = vmatmul.mubr.msk.f32.gmra.mxu1 %vm863_vm6, %v821_v45 }
 0x1ae   : > { %1066 = vmatprep.mubr.f32.mxu1 %v9179_v0  ;;  %v853_v61 = vpop.trf.xlu1 }
 0x1b0   : > { %v822_v46 = vpop.trf.xlu0 }
 0x1b1   : > { %5222 = vmatmul.mubr.msk.f32.gmra.mxu1 %vm863_vm6, %v822_v46 }
 0x1b2   : > { %1072 = vmatprep.mubr.f32.mxu1 %v9179_v0  ;;  %v854_v62 = vpop.trf.xlu1 }
 0x1b4   : > { %v823_v47 = vpop.trf.xlu0 }
 0x1b5   : > { %5223 = vmatmul.mubr.msk.f32.gmra.mxu1 %vm863_vm6, %v823_v47 }
 0x1b6   : > { %1078 = vmatprep.mubr.f32.mxu1 %v9179_v0  ;;  %v855_v63 = vpop.trf.xlu1 }
 0x1b8   : > { %v824_v49 = vpop.trf.xlu0 }
 0x1b9   : > { %5224 = vmatmul.mubr.msk.f32.gmra.mxu1 %vm863_vm6, %v824_v49 }
 0x1ba   : > { %1084 = vmatprep.mubr.f32.mxu1 %v9179_v0  ;;  %v856_v1 = vpop.trf.xlu1 }
 0x1bc   : > { %v825_v51 = vpop.trf.xlu0 }
 0x1bd   : > { %5225 = vmatmul.mubr.msk.f32.gmra.mxu1 %vm863_vm6, %v825_v51 }
 0x1be   : > { %1090 = vmatprep.mubr.f32.mxu1 %v9179_v0  ;;  %v857_v2 = vpop.trf.xlu1 }
 0x1c0   : > { %v826_v52 = vpop.trf.xlu0 }
 0x1c1   : > { %5226 = vmatmul.mubr.msk.f32.gmra.mxu1 %vm863_vm6, %v826_v52 }
 0x1c2   : > { %1096 = vmatprep.mubr.f32.mxu1 %v9179_v0  ;;  %v858_v3 = vpop.trf.xlu1 }
 0x1c4   : > { %v827_v54 = vpop.trf.xlu0 }
 0x1c5   : > { %5227 = vmatmul.mubr.msk.f32.gmra.mxu1 %vm863_vm6, %v827_v54 }
 0x1c6   : > { %1102 = vmatprep.mubr.f32.mxu1 %v9179_v0  ;;  %v859_v4 = vpop.trf.xlu1 }
 0x1c8   : > { %v828_v56 = vpop.trf.xlu0 }
 0x1c9   : > { %5228 = vmatmul.mubr.msk.f32.gmra.mxu1 %vm863_vm6, %v828_v56 }
 0x1ca   : > { %1108 = vmatprep.mubr.f32.mxu1 %v9179_v0  ;;  %v860_v5 = vpop.trf.xlu1 }
 0x1cc   : > { %v829_v57 = vpop.trf.xlu0 }
 0x1cd   : > { %5229 = vmatmul.mubr.msk.f32.gmra.mxu1 %vm863_vm6, %v829_v57 }
 0x1ce   : > { %1114 = vmatprep.mubr.f32.mxu1 %v9179_v0  ;;  %v861_v6 = vpop.trf.xlu1 }
 0x1d0   : > { %v830_v59 = vpop.trf.xlu0 }
 0x1d1   : > { %5230 = vmatmul.mubr.msk.f32.gmra.mxu1 %vm863_vm6, %v830_v59 }
 0x1d2   : > { %1120 = vmatprep.mubr.f32.mxu1 %v9179_v0  ;;  %v862_v31 = vpop.trf.xlu1 }
 0x1d5   : > { %5231 = vmatmul.mubr.msk.f32.gmra.mxu1 %vm863_vm6, %v847_v48 }
 0x1d6   : > { %1126 = vmatprep.mubr.f32.mxu1 %v9179_v0 }
 0x1d9   : > { %5232 = vmatmul.mubr.msk.f32.gmra.mxu1 %vm863_vm6, %v848_v50 }
 0x1da   : > { %1132 = vmatprep.mubr.f32.mxu1 %v9179_v0 }
 0x1dd   : > { %5233 = vmatmul.mubr.msk.f32.gmra.mxu1 %vm863_vm6, %v849_v53 }
 0x1de   : > { %1138 = vmatprep.mubr.f32.mxu1 %v9179_v0 }
 0x1e1   : > { %5234 = vmatmul.mubr.msk.f32.gmra.mxu1 %vm863_vm6, %v850_v55 }
 0x1e2   : > { %1144 = vmatprep.mubr.f32.mxu1 %v9179_v0 }
 0x1e5   : > { %5235 = vmatmul.mubr.msk.f32.gmra.mxu1 %vm863_vm6, %v851_v58 }
 0x1e6   : > { %1150 = vmatprep.mubr.f32.mxu1 %v9179_v0 }
 0x1e9   : > { %5236 = vmatmul.mubr.msk.f32.gmra.mxu1 %vm863_vm6, %v852_v60 }
 0x1ea   : > { %1156 = vmatprep.mubr.f32.mxu1 %v9179_v0 }
 0x1ed   : > { %5237 = vmatmul.mubr.msk.f32.gmra.mxu1 %vm863_vm6, %v853_v61 }
 0x1ee   : > { %1162 = vmatprep.mubr.f32.mxu1 %v9179_v0 }
 0x1f1   : > { %5238 = vmatmul.mubr.msk.f32.gmra.mxu1 %vm863_vm6, %v854_v62 }
 0x1f2   : > { %1168 = vmatprep.mubr.f32.mxu1 %v9179_v0 }
 0x1f5   : > { %5239 = vmatmul.mubr.msk.f32.gmra.mxu1 %vm863_vm6, %v855_v63 }
 0x1f6   : > { %1174 = vmatprep.mubr.f32.mxu1 %v9179_v0 }
 0x1f9   : > { %5240 = vmatmul.mubr.msk.f32.gmra.mxu1 %vm863_vm6, %v856_v1 }
 0x1fa   : > { %1180 = vmatprep.mubr.f32.mxu1 %v9179_v0 }
 0x1fd   : > { %5241 = vmatmul.mubr.msk.f32.gmra.mxu1 %vm863_vm6, %v857_v2 }
 0x1fe   : > { %1186 = vmatprep.mubr.f32.mxu1 %v9179_v0 }
 0x201   : > { %5242 = vmatmul.mubr.msk.f32.gmra.mxu1 %vm863_vm6, %v858_v3 }
 0x202   : > { %1192 = vmatprep.mubr.f32.mxu1 %v9179_v0 }
 0x205   : > { %5243 = vmatmul.mubr.msk.f32.gmra.mxu1 %vm863_vm6, %v859_v4 }
 0x206   : > { %1198 = vmatprep.mubr.f32.mxu1 %v9179_v0 }
 0x209   : > { %5244 = vmatmul.mubr.msk.f32.gmra.mxu1 %vm863_vm6, %v860_v5 }
 0x20a   : > { %1204 = vmatprep.mubr.f32.mxu1 %v9179_v0 }
 0x20d   : > { %5245 = vmatmul.mubr.msk.f32.gmra.mxu1 %vm863_vm6, %v861_v6 }
 0x20e   : > { %1210 = vmatprep.mubr.f32.mxu1 %v9179_v0 }
 0x211   : > { %5246 = vmatmul.mubr.msk.f32.gmra.mxu1 %vm863_vm6, %v862_v31 }
 0x255   : > { %v6538_v32 = vpop.f32.mrf.mxu1 }
 0x256   : > { %9326 = vst [vmem:[#allocation29_spill] sm:$0xff] %v6538_v32 }
 0x257   : > { %v6540_v33 = vpop.f32.mrf.mxu1 }
 0x258   : > { %9327 = vst [vmem:[#allocation30_spill] sm:$0xff] %v6540_v33  ;;  %v1217_v19 = vmax.f32 %v6538_v32, %v6540_v33 }
 0x259   : > { %v6542_v34 = vpop.f32.mrf.mxu1 }
 0x25b   : > { %v6544_v35 = vpop.f32.mrf.mxu1 }
 0x25d   : > { %v6546_v36 = vpop.f32.mrf.mxu1 }
 0x25e   : > { %9328 = vst [vmem:[#allocation31_spill] sm:$0xff] %v6546_v36 }
 0x25f   : > { %v6548_v37 = vpop.f32.mrf.mxu1 }
 0x260   : > { %9329 = vst [vmem:[#allocation32_spill] sm:$0xff] %v6548_v37  ;;  %v1223_v21 = vmax.f32 %v6546_v36, %v6548_v37  ;;  %v258_v36 = vld [vmem:[%s9175_s1 + $0xa0] sm:$0xff] }
 0x261   : > { %v6550_v38 = vpop.f32.mrf.mxu1  ;;  %5187 = vmatmul.mubr.msk.f32.gmra.mxu0 %vm288_vm5, %v258_v36 }
 0x263   : > { %v6552_v39 = vpop.f32.mrf.mxu1 }
 0x265   : > { %v6554_v40 = vpop.f32.mrf.mxu1 }
 0x267   : > { %v6556_v41 = vpop.f32.mrf.mxu1 }
 0x268   : > { %v1229_v23 = vmax.f32 %v6554_v40, %v6556_v41 }
 0x269   : > { %v6558_v42 = vpop.f32.mrf.mxu1 }
 0x26b   : > { %v6560_v43 = vpop.f32.mrf.mxu1 }
 0x26d   : > { %v6562_v44 = vpop.f32.mrf.mxu1 }
 0x26f   : > { %v6564_v45 = vpop.f32.mrf.mxu1 }
 0x270   : > { %v1235_v25 = vmax.f32 %v6562_v44, %v6564_v45 }
 0x271   : > { %v6566_v46 = vpop.f32.mrf.mxu1 }
 0x273   : > { %v6568_v47 = vpop.f32.mrf.mxu1 }
 0x275   : > { %v6570_v48 = vpop.f32.mrf.mxu1 }
 0x277   : > { %v6572_v49 = vpop.f32.mrf.mxu1 }
 0x278   : > { %v1241_v27 = vmax.f32 %v6570_v48, %v6572_v49 }
 0x279   : > { %v6574_v50 = vpop.f32.mrf.mxu1 }
 0x27b   : > { %v6576_v51 = vpop.f32.mrf.mxu1 }
 0x27d   : > { %v6578_v52 = vpop.f32.mrf.mxu1 }
 0x27f   : > { %v6580_v53 = vpop.f32.mrf.mxu1 }
 0x280   : > { %v1247_v29 = vmax.f32 %v6578_v52, %v6580_v53 }
 0x281   : > { %v6582_v54 = vpop.f32.mrf.mxu1 }
 0x283   : > { %v6584_v55 = vpop.f32.mrf.mxu1 }
 0x284   : > { %v1250_v31 = vmax.f32 %v6582_v54, %v6584_v55 }
 0x285   : > { %v6586_v56 = vpop.f32.mrf.mxu1 }
 0x287   : > { %v6588_v57 = vpop.f32.mrf.mxu1 }
 0x288   : > { %v1253_v6 = vmax.f32 %v6586_v56, %v6588_v57 }
 0x289   : > { %v6590_v58 = vpop.f32.mrf.mxu1 }
 0x28b   : > { %v6592_v59 = vpop.f32.mrf.mxu1 }
 0x28c   : > { %v1256_v2 = vmax.f32 %v6590_v58, %v6592_v59 }
 0x28d   : > { %v6594_v60 = vpop.f32.mrf.mxu1 }
 0x28f   : > { %v6596_v61 = vpop.f32.mrf.mxu1 }
 0x290   : > { %v1259_v62 = vmax.f32 %v6594_v60, %v6596_v61 }
 0x291   : > { %v6600_v63 = vpop.f32.mrf.mxu1 }
 0x292   : > { %1260 = vmax.xlane.f32.xlu1 %v1259_v62 }
 0x293   : > { %v6602_v1 = vpop.f32.mrf.mxu1 }
 0x294   : > { %v1262_v3 = vmax.f32 %v6600_v63, %v6602_v1 }
 0x295   : > { %v6608_v4 = vpop.f32.mrf.mxu1 }
 0x296   : > { %9330 = vst [vmem:[#allocation33_spill] sm:$0xff] %v6608_v4  ;;  %1257 = vmax.xlane.f32.xlu1 %v1256_v2  ;;  %1263 = vmax.xlane.f32.xlu0 %v1262_v3  ;;  %v1244_v2 = vmax.f32 %v6574_v50, %v6576_v51 }
 0x297   : > { %v6610_v5 = vpop.f32.mrf.mxu1 }
 0x298   : > { %9331 = vst [vmem:[#allocation34_spill] sm:$0xff] %v6610_v5 }
 0x299   : > { %v6616_v62 = vpop.f32.mrf.mxu1 }
 0x29a   : > { %9332 = vst [vmem:[#allocation35_spill] sm:$0xff] %v6616_v62  ;;  %1254 = vmax.xlane.f32.xlu1 %v1253_v6  ;;  %1251 = vmax.xlane.f32.xlu0 %v1250_v31  ;;  %v1238_v6 = vmax.f32 %v6566_v46, %v6568_v47 }
 0x29b   : > { %v6618_v0 = vpop.f32.mrf.mxu1 }
 0x29c   : > { %9333 = vst [vmem:[#allocation36_spill] sm:$0xff] %v6618_v0 }
 0x29d   : > { %v6624_v3 = vpop.f32.mrf.mxu1 }
 0x29e   : > { %9334 = vst [vmem:[#allocation37_spill] sm:$0xff] %v6624_v3  ;;  %1248 = vmax.xlane.f32.xlu1 %v1247_v29  ;;  %1245 = vmax.xlane.f32.xlu0 %v1244_v2  ;;  %v1232_v29 = vmax.f32 %v6558_v42, %v6560_v43 }
 0x29f   : > { %v6626_v30 = vpop.f32.mrf.mxu1 }
 0x2a0   : > { %9335 = vst [vmem:[#allocation38_spill] sm:$0xff] %v6626_v30 }
 0x2a1   : > { %v6632_v31 = vpop.f32.mrf.mxu1 }
 0x2a2   : > { %9336 = vst [vmem:[#allocation39_spill] sm:$0xff] %v6632_v31  ;;  %1242 = vmax.xlane.f32.xlu1 %v1241_v27  ;;  %1239 = vmax.xlane.f32.xlu0 %v1238_v6  ;;  %v1226_v27 = vmax.f32 %v6550_v38, %v6552_v39 }
 0x2a3   : > { %v6634_v28 = vpop.f32.mrf.mxu1 }
 0x2a4   : > { %9337 = vst [vmem:[#allocation40_spill] sm:$0xff] %v6634_v28 }
 0x2a5   : > { %v6640_v2 = vpop.f32.mrf.mxu1 }
 0x2a6   : > { %1236 = vmax.xlane.f32.xlu1 %v1235_v25  ;;  %1233 = vmax.xlane.f32.xlu0 %v1232_v29  ;;  %v1220_v25 = vmax.f32 %v6542_v34, %v6544_v35 }
 0x2a7   : > { %v6642_v26 = vpop.f32.mrf.mxu1 }
 0x2a8   : > { %9338 = vst [vmem:[#allocation41_spill] sm:$0xff] %v6642_v26 }
 0x2a9   : > { %v6648_v6 = vpop.f32.mrf.mxu1 }
 0x2aa   : > { %1230 = vmax.xlane.f32.xlu1 %v1229_v23  ;;  %1227 = vmax.xlane.f32.xlu0 %v1226_v27 }
 0x2ab   : > { %v6650_v24 = vpop.f32.mrf.mxu1 }
 0x2ad   : > { %v6656_v29 = vpop.f32.mrf.mxu1 }
 0x2ae   : > { %1224 = vmax.xlane.f32.xlu1 %v1223_v21  ;;  %1221 = vmax.xlane.f32.xlu0 %v1220_v25 }
 0x2af   : > { %v6658_v22 = vpop.f32.mrf.mxu1 }
 0x2b1   : > { %v6662_v20 = vpop.f32.mrf.mxu1 }
 0x2b2   : > { %1218 = vmax.xlane.f32.xlu1 %v1217_v19 }
 0x2b3   : > { %v6664_v23 = vpop.f32.mrf.mxu1 }
 0x2b5   : > { %v6666_v27 = vpop.f32.mrf.mxu1 }
 0x2b7   : > { %v6668_v17 = vpop.f32.mrf.mxu1 }
 0x2b8   : > { %v1289_v36 = vmax.f32 %v6666_v27, %v6668_v17 }
 0x2b9   : > { %v6670_v18 = vpop.f32.mrf.mxu1 }
 0x2bb   : > { %v6672_v15 = vpop.f32.mrf.mxu1 }
 0x2bd   : > { %v6674_v21 = vpop.f32.mrf.mxu1 }
 0x2bf   : > { %v6676_v25 = vpop.f32.mrf.mxu1 }
 0x2c0   : > { %9339 = vst [vmem:[#allocation42_spill] sm:$0xff] %v6676_v25 }
 0x2c1   : > { %v6678_v16 = vpop.f32.mrf.mxu1 }
 0x2c3   : > { %v6680_v14 = vpop.f32.mrf.mxu1 }
 0x2c5   : > { %v6682_v12 = vpop.f32.mrf.mxu1 }
 0x2c7   : > { %v6684_v19 = vpop.f32.mrf.mxu1 }
 0x2c8   : > { %v1301_v32 = vmax.f32 %v6682_v12, %v6684_v19 }
 0x2c9   : > { %v6686_v10 = vpop.f32.mrf.mxu1 }
 0x2cb   : > { %v6688_v13 = vpop.f32.mrf.mxu1 }
 0x2cd   : > { %v6690_v8 = vpop.f32.mrf.mxu1 }
 0x2ce   : > { %9340 = vst [vmem:[#allocation43_spill] sm:$0xff] %v6690_v8 }
 0x2cf   : > { %v6692_v11 = vpop.f32.mrf.mxu1 }
 0x2d0   : > { %9341 = vst [vmem:[#allocation44_spill] sm:$0xff] %v6692_v11  ;;  %v1307_v9 = vmax.f32 %v6690_v8, %v6692_v11  ;;  %v1295_v11 = vmax.f32 %v6674_v21, %v6676_v25  ;;  %v9342_v8 = vmov 0.0   ;;  %v1292_v25 = vmax.f32 %v6670_v18, %v6672_v15 }
 0x2d1   : > { %v6696_v7 = vpop.f32.mrf.mxu1  ;;  %627 = vmatprep.mubr.f32.mxu0 %v9342_v8 }
 0x2d2   : > { %1308 = vmax.xlane.f32.xlu1 %v1307_v9  ;;  %v1304_v9 = vmax.f32 %v6686_v10, %v6688_v13 }
 0x2d3   : > { %v6698_v33 = vpop.f32.mrf.mxu1 }
 0x2d4   : > { %v1310_v37 = vmax.f32 %v6696_v7, %v6698_v33 }
 0x2d6   : > { %1302 = vmax.xlane.f32.xlu1 %v1301_v32  ;;  %1311 = vmax.xlane.f32.xlu0 %v1310_v37  ;;  %v1298_v32 = vmax.f32 %v6678_v16, %v6680_v14  ;;  %v259_v37 = vld [vmem:[%s9175_s1 + $0xa8] sm:$0xff] }
 0x2d7   : > { %5188 = vmatmul.mubr.msk.f32.gmra.mxu0 %vm288_vm5, %v259_v37  ;;  %v1283_v37 = vmax.f32 %v6656_v29, %v6658_v22 }
 0x2d8   : > { %633 = vmatprep.mubr.f32.mxu0 %v9342_v8 }
 0x2da   : > { %1296 = vmax.xlane.f32.xlu1 %v1295_v11  ;;  %1305 = vmax.xlane.f32.xlu0 %v1304_v9  ;;  %v260_v11 = vld [vmem:[%s9175_s1 + $0xb0] sm:$0xff]  ;;  %v261_v9 = vld [vmem:[%s9175_s1 + $0xb8] sm:$0xff] }
 0x2db   : > { %5189 = vmatmul.mubr.msk.f32.gmra.mxu0 %vm288_vm5, %v260_v11  ;;  %v263_v11 = vld [vmem:[%s9175_s1 + $0xc8] sm:$0xff] }
 0x2dc   : > { %639 = vmatprep.mubr.f32.mxu0 %v9342_v8 }
 0x2de   : > { %1299 = vmax.xlane.f32.xlu0 %v1298_v32  ;;  %v262_v32 = vld [vmem:[%s9175_s1 + $0xc0] sm:$0xff] }
 0x2df   : > { %5190 = vmatmul.mubr.msk.f32.gmra.mxu0 %vm288_vm5, %v261_v9  ;;  %v264_v9 = vld [vmem:[%s9175_s1 + $0xd0] sm:$0xff] }
 0x2e0   : > { %645 = vmatprep.mubr.f32.mxu0 %v9342_v8 }
 0x2e2   : > { %1293 = vmax.xlane.f32.xlu0 %v1292_v25  ;;  %v1286_v25 = vmax.f32 %v6662_v20, %v6664_v23 }
 0x2e3   : > { %5191 = vmatmul.mubr.msk.f32.gmra.mxu0 %vm288_vm5, %v262_v32  ;;  %v265_v32 = vld [vmem:[%s9175_s1 + $0xd8] sm:$0xff] }
 0x2e4   : > { %651 = vmatprep.mubr.f32.mxu0 %v9342_v8 }
 0x2e6   : > { %1290 = vmax.xlane.f32.xlu0 %v1289_v36  ;;  %v1280_v36 = vmax.f32 %v6648_v6, %v6650_v24 }
 0x2e7   : > { %5192 = vmatmul.mubr.msk.f32.gmra.mxu0 %vm288_vm5, %v263_v11  ;;  %v266_v11 = vld [vmem:[%s9175_s1 + $0xe0] sm:$0xff] }
 0x2e8   : > { %657 = vmatprep.mubr.f32.mxu0 %v9342_v8 }
 0x2ea   : > { %1287 = vmax.xlane.f32.xlu0 %v1286_v25  ;;  %v1277_v25 = vmax.f32 %v6640_v2, %v6642_v26 }
 0x2eb   : > { %5193 = vmatmul.mubr.msk.f32.gmra.mxu0 %vm288_vm5, %v264_v9  ;;  %v267_v9 = vld [vmem:[%s9175_s1 + $0xe8] sm:$0xff] }
 0x2ec   : > { %663 = vmatprep.mubr.f32.mxu0 %v9342_v8 }
 0x2ee   : > { %1284 = vmax.xlane.f32.xlu0 %v1283_v37  ;;  %v1274_v37 = vmax.f32 %v6632_v31, %v6634_v28 }
 0x2ef   : > { %5194 = vmatmul.mubr.msk.f32.gmra.mxu0 %vm288_vm5, %v265_v32  ;;  %v268_v32 = vld [vmem:[%s9175_s1 + $0xf0] sm:$0xff] }
 0x2f0   : > { %669 = vmatprep.mubr.f32.mxu0 %v9342_v8 }
 0x2f2   : > { %1281 = vmax.xlane.f32.xlu0 %v1280_v36  ;;  %v1271_v36 = vmax.f32 %v6624_v3, %v6626_v30 }
 0x2f3   : > { %5195 = vmatmul.mubr.msk.f32.gmra.mxu0 %vm288_vm5, %v266_v11  ;;  %v269_v11 = vld [vmem:[%s9175_s1 + $0xf8] sm:$0xff] }
 0x2f4   : > { %675 = vmatprep.mubr.f32.mxu0 %v9342_v8 }
 0x2f6   : > { %1278 = vmax.xlane.f32.xlu0 %v1277_v25  ;;  %v1268_v25 = vmax.f32 %v6616_v62, %v6618_v0 }
 0x2f7   : > { %5196 = vmatmul.mubr.msk.f32.gmra.mxu0 %vm288_vm5, %v267_v9  ;;  %v271_v9 = vld [vmem:[%s9175_s1 + $0x108] sm:$0xff] }
 0x2f8   : > { %681 = vmatprep.mubr.f32.mxu0 %v9342_v8 }
 0x2fa   : > { %1275 = vmax.xlane.f32.xlu0 %v1274_v37  ;;  %v1265_v37 = vmax.f32 %v6608_v4, %v6610_v5 }
 0x2fb   : > { %5197 = vmatmul.mubr.msk.f32.gmra.mxu0 %vm288_vm5, %v268_v32  ;;  %v273_v32 = vld [vmem:[%s9175_s1 + $0x118] sm:$0xff] }
 0x2fc   : > { %687 = vmatprep.mubr.f32.mxu0 %v9342_v8 }
 0x2fe   : > { %1272 = vmax.xlane.f32.xlu0 %v1271_v36  ;;  %v270_v36 = vld [vmem:[%s9175_s1 + $0x100] sm:$0xff] }
 0x2ff   : > { %5198 = vmatmul.mubr.msk.f32.gmra.mxu0 %vm288_vm5, %v269_v11 }
 0x300   : > { %693 = vmatprep.mubr.f32.mxu0 %v9342_v8 }
 0x302   : > { %1269 = vmax.xlane.f32.xlu0 %v1268_v25  ;;  %v272_v25 = vld [vmem:[%s9175_s1 + $0x110] sm:$0xff] }
 0x303   : > { %5199 = vmatmul.mubr.msk.f32.gmra.mxu0 %vm288_vm5, %v270_v36 }
 0x304   : > { %699 = vmatprep.mubr.f32.mxu0 %v9342_v8 }
 0x306   : > { %1266 = vmax.xlane.f32.xlu0 %v1265_v37 }
 0x307   : > { %5200 = vmatmul.mubr.msk.f32.gmra.mxu0 %vm288_vm5, %v271_v9 }
 0x308   : > { %705 = vmatprep.mubr.f32.mxu0 %v9342_v8 }
 0x30b   : > { %5201 = vmatmul.mubr.msk.f32.gmra.mxu0 %vm288_vm5, %v272_v25 }
 0x30c   : > { %711 = vmatprep.mubr.f32.mxu0 %v9342_v8 }
 0x30f   : > { %5202 = vmatmul.mubr.msk.f32.gmra.mxu0 %vm288_vm5, %v273_v32 }
 0x310   : > { %717 = vmatprep.mubr.f32.mxu0 %v9342_v8 }
 0x31b   : > { %v1261_v37 = vpop.xlane.xlu1 %1260 }
 0x31c   : > { %v1341_v9 = vsub.f32 %v6594_v60, %v1261_v37  ;;  %v1342_v4 = vsub.f32 %v6596_v61, %v1261_v37 }
 0x31e   : > { %v1433_v3 = vmul.f32 1.442695, %v1341_v9  ;;  %v1435_v32 = vmul.f32 1.442695, %v1342_v4 }
 0x31f   : > { %v1258_v11 = vpop.xlane.xlu1 %1257  ;;  %v1264_v36 = vpop.xlane.xlu0 %1263 }
 0x320   : > { %v1343_v5 = vsub.f32 %v6600_v63, %v1264_v36  ;;  %v1344_v25 = vsub.f32 %v6602_v1, %v1264_v36  ;;  %v1339_v28 = vsub.f32 %v6590_v58, %v1258_v11  ;;  %v1340_v8 = vsub.f32 %v6592_v59, %v1258_v11 }
 0x322   : > { %v1437_v0 = vmul.f32 1.442695, %v1343_v5  ;;  %v1439_v62 = vmul.f32 1.442695, %v1344_v25  ;;  %v1429_v60 = vmul.f32 1.442695, %v1339_v28 }
 0x323   : > { %v1252_v30 = vpop.xlane.xlu0 %1251  ;;  %v1255_v31 = vpop.xlane.xlu1 %1254  ;;  %v1431_v61 = vmul.f32 1.442695, %v1340_v8 }
 0x324   : > { %5405 = vpow2.f32 %v1437_v0  ;;  %v1337_v63 = vsub.f32 %v6586_v56, %v1255_v31  ;;  %v1338_v1 = vsub.f32 %v6588_v57, %v1255_v31  ;;  %v1335_v4 = vsub.f32 %v6582_v54, %v1252_v30 }
 0x325   : > { %5407 = vpow2.f32 %v1439_v62  ;;  %v1336_v0 = vsub.f32 %v6584_v55, %v1252_v30 }
 0x326   : > { %5409 = vpow2.f32 %v1433_v3  ;;  %v1425_v58 = vmul.f32 1.442695, %v1337_v63  ;;  %v1427_v59 = vmul.f32 1.442695, %v1338_v1  ;;  %v1421_v28 = vmul.f32 1.442695, %v1335_v4 }
 0x327   : > { %v1246_v26 = vpop.xlane.xlu0 %1245  ;;  %5411 = vpow2.f32 %v1435_v32  ;;  %v1249_v5 = vpop.xlane.xlu1 %1248  ;;  %v1423_v57 = vmul.f32 1.442695, %v1336_v0 }
 0x328   : > { %5413 = vpow2.f32 %v1429_v60  ;;  %v1333_v56 = vsub.f32 %v6578_v52, %v1249_v5  ;;  %v1334_v3 = vsub.f32 %v6580_v53, %v1249_v5  ;;  %v1331_v9 = vsub.f32 %v6574_v50, %v1246_v26 }
 0x329   : > { %5415 = vpow2.f32 %v1431_v61 }
 0x32a   : > { %5417 = vpow2.f32 %v1425_v58  ;;  %v1417_v52 = vmul.f32 1.442695, %v1333_v56  ;;  %v1419_v53 = vmul.f32 1.442695, %v1334_v3  ;;  %v1413_v1 = vmul.f32 1.442695, %v1331_v9 }
 0x32b   : > { %v6818_v37 = vpop.xlane.xlu0 %1239  ;;  %5419 = vpow2.f32 %v1427_v59  ;;  %v1243_v31 = vpop.xlane.xlu1 %1242 }
 0x32c   : > { %5421 = vpow2.f32 %v1421_v28  ;;  %v1330_v59 = vsub.f32 %v6572_v49, %v1243_v31 }
 0x32d   : > { %5423 = vpow2.f32 %v1423_v57 }
 0x32e   : > { %v1411_v49 = vmul.f32 1.442695, %v1330_v59  ;;  %v9344_v59 = vld [vmem:[#allocation32_spill] sm:$0xff] }
 0x32f   : > { %v1234_v62 = vpop.xlane.xlu0 %1233  ;;  %v1237_v5 = vpop.xlane.xlu1 %1236 }
 0x330   : > { %v1323_v8 = vsub.f32 %v6558_v42, %v1234_v62  ;;  %v1324_v11 = vsub.f32 %v6560_v43, %v1234_v62  ;;  %v1332_v42 = vsub.f32 %v6576_v51, %v1246_v26  ;;  %v1329_v51 = vsub.f32 %v6570_v48, %v1243_v31 }
 0x331   : > { %v6826_v54 = vpop.eup %5405 }
 0x332   : > { %v1397_v36 = vmul.f32 1.442695, %v1323_v8  ;;  %v1399_v30 = vmul.f32 1.442695, %v1324_v11  ;;  %v6829_v25 = vpop.eup %5407  ;;  %v1409_v48 = vmul.f32 1.442695, %v1329_v51 }
 0x333   : > { %v1228_v55 = vpop.xlane.xlu0 %1227  ;;  %v6833_v60 = vpop.eup %5409  ;;  %v1550_v63 = vadd.f32 %v6829_v25, %v6826_v54 }
 0x334   : > { %v1319_v32 = vsub.f32 %v6550_v38, %v1228_v55  ;;  %v1320_v43 = vsub.f32 %v6552_v39, %v1228_v55  ;;  %v6838_v50 = vpop.eup %5411  ;;  %5425 = vpow2.f32 %v1397_v36  ;;  %v1415_v38 = vmul.f32 1.442695, %v1332_v42  ;;  %v1231_v3 = vpop.xlane.xlu1 %1230 }
 0x335   : > { %5427 = vpow2.f32 %v1399_v30  ;;  %1551 = vadd.xlane.f32.xlu1 %v1550_v63  ;;  %v6842_v39 = vpop.eup %5413  ;;  %v1547_v62 = vadd.f32 %v6838_v50, %v6833_v60  ;;  %v1326_v55 = vsub.f32 %v6564_v45, %v1237_v5  ;;  %v1321_v42 = vsub.f32 %v6554_v40, %v1231_v3 }
 0x336   : > { %v1389_v61 = vmul.f32 1.442695, %v1319_v32  ;;  %v1391_v58 = vmul.f32 1.442695, %v1320_v43  ;;  %5429 = vpow2.f32 %v1417_v52  ;;  %v6848_v28 = vpop.eup %5415  ;;  %v1322_v43 = vsub.f32 %v6556_v41, %v1231_v3  ;;  %v9346_v3 = vld [vmem:[#allocation29_spill] sm:$0xff] }
 0x337   : > { %v1222_v26 = vpop.xlane.xlu0 %1221  ;;  %5431 = vpow2.f32 %v1419_v53  ;;  %v6852_v57 = vpop.eup %5417  ;;  %v1544_v31 = vadd.f32 %v6848_v28, %v6842_v39  ;;  %v1403_v45 = vmul.f32 1.442695, %v1326_v55 }
 0x338   : > { %v1315_v4 = vsub.f32 %v6542_v34, %v1222_v26  ;;  %v1316_v0 = vsub.f32 %v6544_v35, %v1222_v26  ;;  %5433 = vpow2.f32 %v1389_v61  ;;  %v1327_v34 = vsub.f32 %v6566_v46, %v6818_v37  ;;  %v6858_v11 = vpop.eup %5419  ;;  %v1225_v32 = vpop.xlane.xlu1 %1224 }
 0x339   : > { %5435 = vpow2.f32 %v1391_v58  ;;  %1548 = vadd.xlane.f32.xlu1 %v1547_v62  ;;  %v1328_v35 = vsub.f32 %v6568_v47, %v6818_v37  ;;  %v1325_v46 = vsub.f32 %v6562_v44, %v1237_v5  ;;  %v6861_v9 = vpop.eup %5421  ;;  %v1541_v47 = vadd.f32 %v6858_v11, %v6852_v57 }
 0x33a   : > { %v1381_v56 = vmul.f32 1.442695, %v1315_v4  ;;  %v1383_v8 = vmul.f32 1.442695, %v1316_v0  ;;  %5437 = vpow2.f32 %v1413_v1  ;;  %v1405_v36 = vmul.f32 1.442695, %v1327_v34  ;;  %v6866_v37 = vpop.eup %5423 }
 0x33b   : > { %5439 = vpow2.f32 %v1415_v38  ;;  %v1407_v30 = vmul.f32 1.442695, %v1328_v35  ;;  %v1401_v44 = vmul.f32 1.442695, %v1325_v46  ;;  %v1538_v61 = vadd.f32 %v6866_v37, %v6861_v9  ;;  %v9343_v38 = vld [vmem:[#allocation31_spill] sm:$0xff] }
 0x33c   : > { %5441 = vpow2.f32 %v1381_v56  ;;  %v1393_v58 = vmul.f32 1.442695, %v1321_v42  ;;  %v1395_v41 = vmul.f32 1.442695, %v1322_v43  ;;  %v1317_v51 = vsub.f32 %v9343_v38, %v1225_v32  ;;  %v1219_v62 = vpop.xlane.xlu1 %1218 }
 0x33d   : > { %5443 = vpow2.f32 %v1383_v8  ;;  %1545 = vadd.xlane.f32.xlu1 %v1544_v31  ;;  %v1318_v0 = vsub.f32 %v9344_v59, %v1225_v32  ;;  %v1313_v31 = vsub.f32 %v9346_v3, %v1219_v62 }
 0x33e   : > { %5445 = vpow2.f32 %v1409_v48  ;;  %v1385_v35 = vmul.f32 1.442695, %v1317_v51 }
 0x33f   : > { %5447 = vpow2.f32 %v1411_v49  ;;  %v1387_v46 = vmul.f32 1.442695, %v1318_v0 }
 0x340   : > { %5449 = vpow2.f32 %v1405_v36 }
 0x341   : > { %v6868_v52 = vpop.eup %5425  ;;  %1542 = vadd.xlane.f32.xlu1 %v1541_v47  ;;  %5451 = vpow2.f32 %v1407_v30  ;;  %v9347_v30 = vld [vmem:[#allocation30_spill] sm:$0xff] }
 0x342   : > { %v6871_v53 = vpop.eup %5427  ;;  %5453 = vpow2.f32 %v1401_v44  ;;  %v1314_v55 = vsub.f32 %v9347_v30, %v1219_v62  ;;  %v1377_v44 = vmul.f32 1.442695, %v1313_v31 }
 0x343   : > { %v6874_v63 = vpop.eup %5429  ;;  %v1520_v1 = vadd.f32 %v6871_v53, %v6868_v52  ;;  %5455 = vpow2.f32 %v1403_v45 }
 0x344   : > { %v6880_v5 = vpop.eup %5431  ;;  %5457 = vpow2.f32 %v1393_v58  ;;  %v1379_v45 = vmul.f32 1.442695, %v1314_v55 }
 0x345   : > { %v6882_v40 = vpop.eup %5433  ;;  %1539 = vadd.xlane.f32.xlu1 %v1538_v61  ;;  %1521 = vadd.xlane.f32.xlu0 %v1520_v1  ;;  %v1535_v56 = vadd.f32 %v6880_v5, %v6874_v63  ;;  %5459 = vpow2.f32 %v1395_v41 }
 0x346   : > { %v6884_v26 = vpop.eup %5435  ;;  %5461 = vpow2.f32 %v1385_v35  ;;  %v9349_v35 = vld [vmem:[#allocation44_spill] sm:$0xff] }
 0x347   : > { %v6887_v4 = vpop.eup %5437  ;;  %v1514_v8 = vadd.f32 %v6884_v26, %v6882_v40  ;;  %5463 = vpow2.f32 %v1387_v46 }
 0x348   : > { %v6894_v48 = vpop.eup %5439  ;;  %5465 = vpow2.f32 %v1377_v44 }
 0x349   : > { %v6896_v34 = vpop.eup %5441  ;;  %1536 = vadd.xlane.f32.xlu1 %v1535_v56  ;;  %1515 = vadd.xlane.f32.xlu0 %v1514_v8  ;;  %v1532_v47 = vadd.f32 %v6894_v48, %v6887_v4  ;;  %5467 = vpow2.f32 %v1379_v45  ;;  %v9348_v56 = vld [vmem:[#allocation43_spill] sm:$0xff] }
 0x34a   : > { %9345 = vst [vmem:[#allocation31_spill] sm:$0xff] %v6896_v34  ;;  %v6898_v49 = vpop.eup %5443 }
 0x34b   : > { %v6901_v36 = vpop.eup %5445  ;;  %v1508_v42 = vadd.f32 %v6898_v49, %v6896_v34 }
 0x34c   : > { %v6908_v32 = vpop.eup %5447 }
 0x34d   : > { %1533 = vadd.xlane.f32.xlu1 %v1532_v47  ;;  %1509 = vadd.xlane.f32.xlu0 %v1508_v42  ;;  %v6910_v43 = vpop.eup %5449  ;;  %v1529_v61 = vadd.f32 %v6908_v32, %v6901_v36 }
 0x34e   : > { %v6914_v1 = vpop.eup %5451 }
 0x34f   : > { %v6916_v58 = vpop.eup %5453  ;;  %v1526_v41 = vadd.f32 %v6914_v1, %v6910_v43 }
 0x350   : > { %v6920_v38 = vpop.eup %5455 }
 0x351   : > { %1530 = vadd.xlane.f32.xlu1 %v1529_v61  ;;  %v6922_v51 = vpop.eup %5457  ;;  %v1523_v0 = vadd.f32 %v6920_v38, %v6916_v58 }
 0x352   : > { %v6924_v59 = vpop.eup %5459 }
 0x353   : > { %v6930_v31 = vpop.eup %5461  ;;  %v1517_v46 = vadd.f32 %v6924_v59, %v6922_v51 }
 0x354   : > { %v6934_v30 = vpop.eup %5463 }
 0x355   : > { %1527 = vadd.xlane.f32.xlu1 %v1526_v41 }
 0x359   : > { %1524 = vadd.xlane.f32.xlu1 %v1523_v0  ;;  %v6939_v0 = vpop.eup %5465 }
 0x35b   : > { %v1309_v62 = vpop.xlane.xlu1 %1308 }
 0x35c   : > { %v1373_v8 = vsub.f32 %v9348_v56, %v1309_v62  ;;  %v1374_v3 = vsub.f32 %v9349_v35, %v1309_v62  ;;  %v1511_v56 = vadd.f32 %v6934_v30, %v6930_v31 }
 0x35d   : > { %1518 = vadd.xlane.f32.xlu1 %v1517_v46 }
 0x35e   : > { %v1497_v55 = vmul.f32 1.442695, %v1373_v8  ;;  %v1499_v47 = vmul.f32 1.442695, %v1374_v3  ;;  %v6944_v8 = vpop.eup %5467 }
 0x35f   : > { %v1303_v42 = vpop.xlane.xlu1 %1302  ;;  %v1312_v44 = vpop.xlane.xlu0 %1311 }
 0x360   : > { %5469 = vpow2.f32 %v1497_v55  ;;  %v1369_v45 = vsub.f32 %v6682_v12, %v1303_v42  ;;  %v1370_v61 = vsub.f32 %v6684_v19, %v1303_v42  ;;  %v1375_v41 = vsub.f32 %v6696_v7, %v1312_v44  ;;  %v9350_v19 = vld [vmem:[#allocation42_spill] sm:$0xff] }
 0x361   : > { %5471 = vpow2.f32 %v1499_v47  ;;  %v1376_v62 = vsub.f32 %v6698_v33, %v1312_v44  ;;  %1512 = vadd.xlane.f32.xlu1 %v1511_v56  ;;  %v1505_v44 = vadd.f32 %v6944_v8, %v6939_v0 }
 0x362   : > { %v1489_v35 = vmul.f32 1.442695, %v1369_v45  ;;  %v1491_v3 = vmul.f32 1.442695, %v1370_v61  ;;  %v1501_v46 = vmul.f32 1.442695, %v1375_v41 }
 0x363   : > { %v1503_v55 = vmul.f32 1.442695, %v1376_v62  ;;  %v1297_v12 = vpop.xlane.xlu1 %1296  ;;  %v1306_v34 = vpop.xlane.xlu0 %1305 }
 0x364   : > { %5473 = vpow2.f32 %v1489_v35  ;;  %v1365_v7 = vsub.f32 %v6674_v21, %v1297_v12  ;;  %v1366_v42 = vsub.f32 %v9350_v19, %v1297_v12  ;;  %v1371_v47 = vsub.f32 %v6686_v10, %v1306_v34 }
 0x365   : > { %5475 = vpow2.f32 %v1491_v3  ;;  %v1372_v33 = vsub.f32 %v6688_v13, %v1306_v34  ;;  %1506 = vadd.xlane.f32.xlu1 %v1505_v44 }
 0x366   : > { %5477 = vpow2.f32 %v1501_v46  ;;  %v1481_v45 = vmul.f32 1.442695, %v1365_v7  ;;  %v1483_v61 = vmul.f32 1.442695, %v1366_v42  ;;  %v1493_v41 = vmul.f32 1.442695, %v1371_v47 }
 0x367   : > { %5479 = vpow2.f32 %v1503_v55  ;;  %v1495_v62 = vmul.f32 1.442695, %v1372_v33  ;;  %v1300_v56 = vpop.xlane.xlu0 %1299 }
 0x368   : > { %5481 = vpow2.f32 %v1481_v45  ;;  %v1367_v21 = vsub.f32 %v6678_v16, %v1300_v56  ;;  %v1368_v35 = vsub.f32 %v6680_v14, %v1300_v56 }
 0x369   : > { %5483 = vpow2.f32 %v1483_v61 }
 0x36a   : > { %5485 = vpow2.f32 %v1493_v41  ;;  %v1485_v10 = vmul.f32 1.442695, %v1367_v21  ;;  %v1487_v13 = vmul.f32 1.442695, %v1368_v35 }
 0x36b   : > { %5487 = vpow2.f32 %v1495_v62  ;;  %v1294_v34 = vpop.xlane.xlu0 %1293 }
 0x36c   : > { %5489 = vpow2.f32 %v1485_v10  ;;  %v1363_v3 = vsub.f32 %v6670_v18, %v1294_v34  ;;  %v1364_v46 = vsub.f32 %v6672_v15, %v1294_v34 }
 0x36d   : > { %v6956_v55 = vpop.eup %5469  ;;  %5491 = vpow2.f32 %v1487_v13 }
 0x36e   : > { %v6958_v12 = vpop.eup %5471  ;;  %v1477_v7 = vmul.f32 1.442695, %v1363_v3  ;;  %v1479_v16 = vmul.f32 1.442695, %v1364_v46 }
 0x36f   : > { %v1291_v19 = vpop.xlane.xlu0 %1290  ;;  %v1595_v14 = vadd.f32 %v6958_v12, %v6956_v55 }
 0x370   : > { %5493 = vpow2.f32 %v1477_v7  ;;  %v1361_v42 = vsub.f32 %v6666_v27, %v1291_v19  ;;  %v1362_v47 = vsub.f32 %v6668_v17, %v1291_v19 }
 0x371   : > { %v6964_v33 = vpop.eup %5473  ;;  %5495 = vpow2.f32 %v1479_v16  ;;  %1596 = vadd.xlane.f32.xlu1 %v1595_v14 }
 0x372   : > { %v6966_v15 = vpop.eup %5475  ;;  %v1473_v18 = vmul.f32 1.442695, %v1361_v42  ;;  %v1475_v44 = vmul.f32 1.442695, %v1362_v47 }
 0x373   : > { %v6968_v45 = vpop.eup %5477  ;;  %v1288_v61 = vpop.xlane.xlu0 %1287  ;;  %v1589_v41 = vadd.f32 %v6966_v15, %v6964_v33 }
 0x374   : > { %v6972_v62 = vpop.eup %5479  ;;  %5497 = vpow2.f32 %v1473_v18  ;;  %v1359_v27 = vsub.f32 %v6662_v20, %v1288_v61  ;;  %v1360_v17 = vsub.f32 %v6664_v23, %v1288_v61 }
 0x375   : > { %v6976_v56 = vpop.eup %5481  ;;  %5499 = vpow2.f32 %v1475_v44  ;;  %1590 = vadd.xlane.f32.xlu1 %v1589_v41  ;;  %v1598_v21 = vadd.f32 %v6972_v62, %v6968_v45 }
 0x376   : > { %v6980_v35 = vpop.eup %5483  ;;  %v1469_v10 = vmul.f32 1.442695, %v1359_v27  ;;  %v1471_v13 = vmul.f32 1.442695, %v1360_v17 }
 0x377   : > { %v6982_v34 = vpop.eup %5485  ;;  %1599 = vadd.xlane.f32.xlu0 %v1598_v21  ;;  %v1285_v3 = vpop.xlane.xlu0 %1284  ;;  %v1583_v20 = vadd.f32 %v6980_v35, %v6976_v56 }
 0x378   : > { %v6986_v46 = vpop.eup %5487  ;;  %5501 = vpow2.f32 %v1469_v10  ;;  %v1357_v23 = vsub.f32 %v6656_v29, %v1285_v3  ;;  %v1358_v7 = vsub.f32 %v6658_v22, %v1285_v3  ;;  %v9351_v3 = vld [vmem:[#allocation41_spill] sm:$0xff] }
 0x379   : > { %v6990_v16 = vpop.eup %5489  ;;  %5503 = vpow2.f32 %v1471_v13  ;;  %1584 = vadd.xlane.f32.xlu1 %v1583_v20  ;;  %v1592_v19 = vadd.f32 %v6986_v46, %v6982_v34 }
 0x37a   : > { %v6994_v14 = vpop.eup %5491  ;;  %v1465_v42 = vmul.f32 1.442695, %v1357_v23  ;;  %v1467_v47 = vmul.f32 1.442695, %v1358_v7 }
 0x37b   : > { %1593 = vadd.xlane.f32.xlu0 %v1592_v19  ;;  %v1282_v18 = vpop.xlane.xlu0 %1281  ;;  %v1586_v44 = vadd.f32 %v6994_v14, %v6990_v16 }
 0x37c   : > { %5505 = vpow2.f32 %v1465_v42  ;;  %v1355_v29 = vsub.f32 %v6648_v6, %v1282_v18  ;;  %v1356_v22 = vsub.f32 %v6650_v24, %v1282_v18 }
 0x37d   : > { %v7000_v61 = vpop.eup %5493  ;;  %5507 = vpow2.f32 %v1467_v47  ;;  %v9352_v47 = vld [vmem:[#allocation39_spill] sm:$0xff] }
 0x37e   : > { %v7002_v41 = vpop.eup %5495  ;;  %v1461_v27 = vmul.f32 1.442695, %v1355_v29  ;;  %v1463_v17 = vmul.f32 1.442695, %v1356_v22 }
 0x37f   : > { %1587 = vadd.xlane.f32.xlu0 %v1586_v44  ;;  %v1279_v21 = vpop.xlane.xlu0 %1278  ;;  %v1580_v10 = vadd.f32 %v7002_v41, %v7000_v61  ;;  %v9353_v44 = vld [vmem:[#allocation40_spill] sm:$0xff] }
 0x380   : > { %5509 = vpow2.f32 %v1461_v27  ;;  %v1353_v13 = vsub.f32 %v6640_v2, %v1279_v21  ;;  %v1354_v20 = vsub.f32 %v9351_v3, %v1279_v21 }
 0x381   : > { %v7008_v6 = vpop.eup %5497  ;;  %5511 = vpow2.f32 %v1463_v17 }
 0x382   : > { %v7010_v24 = vpop.eup %5499  ;;  %v1457_v23 = vmul.f32 1.442695, %v1353_v13  ;;  %v1459_v7 = vmul.f32 1.442695, %v1354_v20  ;;  %v9356_v13 = vld [vmem:[#allocation37_spill] sm:$0xff]  ;;  %v9357_v20 = vld [vmem:[#allocation38_spill] sm:$0xff] }
 0x383   : > { %1581 = vadd.xlane.f32.xlu0 %v1580_v10  ;;  %v1276_v19 = vpop.xlane.xlu0 %1275  ;;  %v1577_v42 = vadd.f32 %v7010_v24, %v7008_v6 }
 0x384   : > { %5513 = vpow2.f32 %v1457_v23  ;;  %v1351_v18 = vsub.f32 %v9352_v47, %v1276_v19  ;;  %v1352_v29 = vsub.f32 %v9353_v44, %v1276_v19 }
 0x385   : > { %v7016_v2 = vpop.eup %5501  ;;  %5515 = vpow2.f32 %v1459_v7  ;;  %1578 = vadd.xlane.f32.xlu1 %v1577_v42 }
 0x386   : > { %9354 = vst [vmem:[#allocation32_spill] sm:$0xff] %v7016_v2  ;;  %v7018_v22 = vpop.eup %5503  ;;  %v1453_v27 = vmul.f32 1.442695, %v1351_v18  ;;  %v1455_v17 = vmul.f32 1.442695, %v1352_v29  ;;  %v9360_v29 = vld [vmem:[#allocation35_spill] sm:$0xff] }
 0x387   : > { %9355 = vst [vmem:[#allocation29_spill] sm:$0xff] %v7018_v22  ;;  %v1273_v21 = vpop.xlane.xlu0 %1272  ;;  %v1574_v10 = vadd.f32 %v7018_v22, %v7016_v2 }
 0x388   : > { %5517 = vpow2.f32 %v1453_v27  ;;  %v1349_v3 = vsub.f32 %v9356_v13, %v1273_v21  ;;  %v1350_v23 = vsub.f32 %v9357_v20, %v1273_v21  ;;  %v9361_v27 = vld [vmem:[#allocation36_spill] sm:$0xff] }
 0x389   : > { %v7024_v47 = vpop.eup %5505  ;;  %5519 = vpow2.f32 %v1455_v17  ;;  %1575 = vadd.xlane.f32.xlu0 %v1574_v10 }
 0x38a   : > { %9358 = vst [vmem:[#allocation30_spill] sm:$0xff] %v7024_v47  ;;  %v7026_v19 = vpop.eup %5507  ;;  %v1449_v7 = vmul.f32 1.442695, %v1349_v3  ;;  %v1451_v42 = vmul.f32 1.442695, %v1350_v23  ;;  %v9362_v23 = vld [vmem:[#allocation33_spill] sm:$0xff] }
 0x38b   : > { %9359 = vst [vmem:[#allocation43_spill] sm:$0xff] %v7026_v19  ;;  %v1270_v44 = vpop.xlane.xlu0 %1269  ;;  %v1571_v18 = vadd.f32 %v7026_v19, %v7024_v47 }
 0x38c   : > { %5521 = vpow2.f32 %v1449_v7  ;;  %v1347_v2 = vsub.f32 %v9360_v29, %v1270_v44  ;;  %v1348_v22 = vsub.f32 %v9361_v27, %v1270_v44  ;;  %v9363_v7 = vld [vmem:[#allocation34_spill] sm:$0xff] }
 0x38d   : > { %v7032_v13 = vpop.eup %5509  ;;  %5523 = vpow2.f32 %v1451_v42  ;;  %1572 = vadd.xlane.f32.xlu1 %v1571_v18 }
 0x38e   : > { %v7034_v21 = vpop.eup %5511  ;;  %v1445_v17 = vmul.f32 1.442695, %v1347_v2  ;;  %v1447_v10 = vmul.f32 1.442695, %v1348_v22 }
 0x38f   : > { %v1267_v20 = vpop.xlane.xlu0 %1266  ;;  %v1568_v3 = vadd.f32 %v7034_v21, %v7032_v13 }
 0x390   : > { %5525 = vpow2.f32 %v1445_v17  ;;  %v1345_v47 = vsub.f32 %v9362_v23, %v1267_v20  ;;  %v1346_v19 = vsub.f32 %v9363_v7, %v1267_v20 }
 0x391   : > { %v7040_v29 = vpop.eup %5513  ;;  %5527 = vpow2.f32 %v1447_v10  ;;  %1569 = vadd.xlane.f32.xlu0 %v1568_v3 }
 0x392   : > { %v7042_v44 = vpop.eup %5515  ;;  %v1441_v42 = vmul.f32 1.442695, %v1345_v47  ;;  %v1443_v18 = vmul.f32 1.442695, %v1346_v19  ;;  %v7056_v47 = vpop.f32.mrf.mxu0 }
 0x393   : > { %v1565_v2 = vadd.f32 %v7042_v44, %v7040_v29  ;;  %9368 = vst [vmem:[#allocation40_spill] sm:$0xff] %v7056_v47 }
 0x394   : > { %5529 = vpow2.f32 %v1441_v42  ;;  %v7060_v3 = vpop.f32.mrf.mxu0 }
 0x395   : > { %v7046_v22 = vpop.eup %5517  ;;  %5531 = vpow2.f32 %v1443_v18  ;;  %1566 = vadd.xlane.f32.xlu1 %v1565_v2  ;;  %9369 = vst [vmem:[#allocation37_spill] sm:$0xff] %v7060_v3 }
 0x396   : > { %9364 = vst [vmem:[#allocation44_spill] sm:$0xff] %v7046_v22  ;;  %v7048_v27 = vpop.eup %5519 }
 0x397   : > { %9365 = vst [vmem:[#allocation42_spill] sm:$0xff] %v7048_v27  ;;  %v1562_v17 = vadd.f32 %v7048_v27, %v7046_v22  ;;  %v7068_v18 = vpop.f32.mrf.mxu0 }
 0x398   : > { %9372 = vst [vmem:[#allocation36_spill] sm:$0xff] %v7068_v18 }
 0x399   : > { %v7052_v20 = vpop.eup %5521  ;;  %1563 = vadd.xlane.f32.xlu0 %v1562_v17  ;;  %v7072_v17 = vpop.f32.mrf.mxu0 }
 0x39a   : > { %9366 = vst [vmem:[#allocation41_spill] sm:$0xff] %v7052_v20  ;;  %v7054_v10 = vpop.eup %5523  ;;  %9374 = vst [vmem:[#allocation34_spill] sm:$0xff] %v7072_v17 }
 0x39b   : > { %9367 = vst [vmem:[#allocation39_spill] sm:$0xff] %v7054_v10  ;;  %v1559_v19 = vadd.f32 %v7054_v10, %v7052_v20  ;;  %v7078_v20 = vpop.f32.mrf.mxu0 }
 0x39c   : > { %9376 = vst [vmem:[#allocation46_spill] sm:$0xff] %v7078_v20 }
 0x39d   : > { %v7062_v23 = vpop.eup %5525  ;;  %1560 = vadd.xlane.f32.xlu1 %v1559_v19  ;;  %v7080_v19 = vpop.f32.mrf.mxu0 }
 0x39e   : > { %9370 = vst [vmem:[#allocation38_spill] sm:$0xff] %v7062_v23  ;;  %v7064_v7 = vpop.eup %5527  ;;  %9377 = vst [vmem:[#allocation47_spill] sm:$0xff] %v7080_v19 }
 0x39f   : > { %9371 = vst [vmem:[#allocation35_spill] sm:$0xff] %v7064_v7  ;;  %v1556_v42 = vadd.f32 %v7064_v7, %v7062_v23  ;;  %v7082_v10 = vpop.f32.mrf.mxu0 }
 0x3a0   : > { %9378 = vst [vmem:[#allocation48_spill] sm:$0xff] %v7082_v10 }
 0x3a1   : > { %v7070_v2 = vpop.eup %5529  ;;  %1557 = vadd.xlane.f32.xlu0 %v1556_v42  ;;  %v7084_v23 = vpop.f32.mrf.mxu0 }
 0x3a2   : > { %9373 = vst [vmem:[#allocation33_spill] sm:$0xff] %v7070_v2  ;;  %v7074_v47 = vpop.eup %5531  ;;  %9379 = vst [vmem:[#allocation49_spill] sm:$0xff] %v7084_v23 }
 0x3a3   : > { %9375 = vst [vmem:[#allocation45_spill] sm:$0xff] %v7074_v47  ;;  %v1553_v3 = vadd.f32 %v7074_v47, %v7070_v2  ;;  %v7086_v18 = vpop.f32.mrf.mxu0 }
 0x3a4   : > { %9380 = vst [vmem:[#allocation50_spill] sm:$0xff] %v7086_v18 }
 0x3a5   : > { %1554 = vadd.xlane.f32.xlu1 %v1553_v3  ;;  %v7088_v7 = vpop.f32.mrf.mxu0 }
 0x3a6   : > { %9381 = vst [vmem:[#allocation51_spill] sm:$0xff] %v7088_v7 }
 0x3a7   : > { %v7090_v42 = vpop.f32.mrf.mxu0 }
 0x3a8   : > { %9382 = vst [vmem:[#allocation52_spill] sm:$0xff] %v7090_v42 }
 0x3a9   : > { %v7092_v17 = vpop.f32.mrf.mxu0 }
 0x3aa   : > { %9383 = vst [vmem:[#allocation53_spill] sm:$0xff] %v7092_v17 }
 0x3ab   : > { %v7094_v22 = vpop.f32.mrf.mxu0 }
 0x3ac   : > { %9384 = vst [vmem:[#allocation54_spill] sm:$0xff] %v7094_v22 }
 0x3ad   : > { %v7096_v2 = vpop.f32.mrf.mxu0 }
 0x3ae   : > { %9385 = vst [vmem:[#allocation55_spill] sm:$0xff] %v7096_v2 }
 0x3af   : > { %v7098_v20 = vpop.f32.mrf.mxu0 }
 0x3b0   : > { %9386 = vst [vmem:[#allocation56_spill] sm:$0xff] %v7098_v20 }
 0x3b1   : > { %v7100_v3 = vpop.f32.mrf.mxu0 }
 0x3b2   : > { %9387 = vst [vmem:[#allocation57_spill] sm:$0xff] %v7100_v3 }
 0x3b3   : > { %v7102_v19 = vpop.f32.mrf.mxu0 }
 0x3b4   : > { %9388 = vst [vmem:[#allocation58_spill] sm:$0xff] %v7102_v19 }
 0x3b5   : > { %v7104_v10 = vpop.f32.mrf.mxu0 }
 0x3b6   : > { %9389 = vst [vmem:[#allocation59_spill] sm:$0xff] %v7104_v10  ;;  %v9397_v10 = vld [vmem:[#allocation5_spill] sm:$0xff] }
 0x3b7   : > { %v7106_v23 = vpop.f32.mrf.mxu0 }
 0x3b8   : > { %9390 = vst [vmem:[#allocation60_spill] sm:$0xff] %v7106_v23  ;;  %v1786_v23 = vmul.f32 0.17677669, %v9397_v10 }
 0x3b9   : > { %v7108_v7 = vpop.f32.mrf.mxu0 }
 0x3ba   : > { %9391 = vst [vmem:[#allocation61_spill] sm:$0xff] %v7108_v7 }
 0x3bb   : > { %v7110_v42 = vpop.f32.mrf.mxu0 }
 0x3bc   : > { %9392 = vst [vmem:[#allocation62_spill] sm:$0xff] %v7110_v42 }
 0x3bd   : > { %v7112_v22 = vpop.f32.mrf.mxu0 }
 0x3be   : > { %v1552_v18 = vpop.xlane.xlu1 %1551  ;;  %9393 = vst [vmem:[#allocation63_spill] sm:$0xff] %v7112_v22  ;;  %v9398_v22 = vld [vmem:[#allocation7_spill] sm:$0xff] }
 0x3bf   : > { %5533 = vrcp.f32 %v1552_v18  ;;  %v7114_v2 = vpop.f32.mrf.mxu0 }
 0x3c0   : > { %9394 = vst [vmem:[#allocation64_spill] sm:$0xff] %v7114_v2  ;;  %v1788_v2 = vmul.f32 0.17677669, %v9398_v22 }
 0x3c1   : > { %v7116_v3 = vpop.f32.mrf.mxu0 }
 0x3c2   : > { %v1549_v17 = vpop.xlane.xlu1 %1548  ;;  %9395 = vst [vmem:[#allocation65_spill] sm:$0xff] %v7116_v3  ;;  %v9399_v3 = vld [vmem:[#allocation9_spill] sm:$0xff] }
 0x3c3   : > { %5535 = vrcp.f32 %v1549_v17  ;;  %v7118_v19 = vpop.f32.mrf.mxu0 }
 0x3c4   : > { %9396 = vst [vmem:[#allocation66_spill] sm:$0xff] %v7118_v19  ;;  %v1790_v19 = vmul.f32 0.17677669, %v9399_v3 }
 0x3c5   : > { %v697_v18 = vpop.f32.mrf.mxu0 }
 0x3c6   : > { %v1546_v20 = vpop.xlane.xlu1 %1545  ;;  %1761 = vmatprep.mubr.f32.mxu1 %v697_v18  ;;  %v9400_v18 = vld [vmem:[#allocation6_spill] sm:$0xff] }
 0x3c7   : > { %5537 = vrcp.f32 %v1546_v20 }
 0x3ca   : > { %v1543_v47 = vpop.xlane.xlu1 %1542 }
 0x3cb   : > { %5539 = vrcp.f32 %v1543_v47 }
 0x3cc   : > { %v5534_v7 = vpop.eup %5533 }
 0x3cd   : > { %v1664_v17 = vmul.f32 %v5534_v7, %v6829_v25  ;;  %v1663_v42 = vmul.f32 %v5534_v7, %v6826_v54  ;;  %v1787_v54 = vmul.f32 0.17677669, %v9400_v18  ;;  %v9401_v7 = vld [vmem:[#allocation11_spill] sm:$0xff] }
 0x3ce   : > { %1794 = vxpose.xlu0.b32.start [1/4] (short) %v1786_v23, 128  ;;  %v1540_v27 = vpop.xlane.xlu1 %1539  ;;  %v1522_v18 = vpop.xlane.xlu0 %1521 }
 0x3cf   : > { %5541 = vrcp.f32 %v1540_v27  ;;  %1697 = vmatprep.subr.mxu1 %v1664_v17 }
 0x3d0   : > { %v5536_v20 = vpop.eup %5535  ;;  %1698 = vmatpush1.xpose.msra.mxu1 %v1663_v42 }
 0x3d1   : > { %v1662_v10 = vmul.f32 %v5536_v20, %v6838_v50  ;;  %v1661_v47 = vmul.f32 %v5536_v20, %v6833_v60  ;;  %v9402_v50 = vld [vmem:[#allocation8_spill] sm:$0xff] }
 0x3d2   : > { %1795 = vxpose.xlu0.b32.cont [2/4] (short) %v1788_v2, 128  ;;  %v1537_v23 = vpop.xlane.xlu1 %1536  ;;  %v1792_v2 = vmul.f32 0.17677669, %v9401_v7  ;;  %v1789_v3 = vmul.f32 0.17677669, %v9402_v50  ;;  %v1516_v50 = vpop.xlane.xlu0 %1515 }
 0x3d3   : > { %5543 = vrcp.f32 %v1537_v23  ;;  %1699 = vmatprep.subr.mxu1 %v1662_v10 }
 0x3d4   : > { %v5538_v25 = vpop.eup %5537  ;;  %1700 = vmatpush1.xpose.msra.mxu1 %v1661_v47 }
 0x3d5   : > { %v1660_v22 = vmul.f32 %v5538_v25, %v6848_v28  ;;  %v1659_v27 = vmul.f32 %v5538_v25, %v6842_v39  ;;  %v9403_v28 = vld [vmem:[#allocation10_spill] sm:$0xff] }
 0x3d6   : > { %1796 = vxpose.xlu0.b32.cont [3/4] (short) %v1790_v19, 128  ;;  %v1534_v42 = vpop.xlane.xlu1 %1533  ;;  %v1791_v10 = vmul.f32 0.17677669, %v9403_v28 }
 0x3d7   : > { %5545 = vrcp.f32 %v1534_v42  ;;  %1701 = vmatprep.subr.mxu1 %v1660_v22 }
 0x3d8   : > { %1826 = vxpose.xlu1.b32.start [1/4] (short) %v1787_v54, 128  ;;  %v5540_v60 = vpop.eup %5539  ;;  %1702 = vmatpush1.xpose.msra.mxu1 %v1659_v27  ;;  %v9404_v54 = vld [vmem:[#allocation12_spill] sm:$0xff] }
 0x3d9   : > { %v1658_v17 = vmul.f32 %v5540_v60, %v6858_v11  ;;  %v1657_v20 = vmul.f32 %v5540_v60, %v6852_v57  ;;  %v1793_v57 = vmul.f32 0.17677669, %v9404_v54 }
 0x3da   : > { %1797 = vxpose.xlu0.b32.end [4/4] (short) %v1792_v2, 128  ;;  %v1531_v19 = vpop.xlane.xlu1 %1530 }
 0x3db   : > { %5547 = vrcp.f32 %v1531_v19  ;;  %1703 = vmatprep.subr.mxu1 %v1658_v17 }
 0x3dc   : > { %1827 = vxpose.xlu1.b32.cont [2/4] (short) %v1789_v3, 128  ;;  %v5542_v39 = vpop.eup %5541  ;;  %1704 = vmatpush1.xpose.msra.mxu1 %v1657_v20 }
 0x3dd   : > { %v1656_v47 = vmul.f32 %v5542_v39, %v6866_v37  ;;  %v1655_v23 = vmul.f32 %v5542_v39, %v6861_v9  ;;  %v1510_v39 = vpop.xlane.xlu0 %1509 }
 0x3de   : > { %v1528_v25 = vpop.xlane.xlu1 %1527 }
 0x3df   : > { %5549 = vrcp.f32 %v1528_v25  ;;  %1705 = vmatprep.subr.mxu1 %v1656_v47 }
 0x3e0   : > { %1828 = vxpose.xlu1.b32.cont [3/4] (short) %v1791_v10, 128  ;;  %v5544_v11 = vpop.eup %5543  ;;  %1706 = vmatpush1.xpose.msra.mxu1 %v1655_v23  ;;  %5551 = vrcp.f32 %v1522_v18 }
 0x3e1   : > { %v1654_v22 = vmul.f32 %v5544_v11, %v6880_v5  ;;  %v1653_v27 = vmul.f32 %v5544_v11, %v6874_v63 }
 0x3e2   : > { %v1525_v7 = vpop.xlane.xlu1 %1524 }
 0x3e3   : > { %5553 = vrcp.f32 %v1525_v7  ;;  %1707 = vmatprep.subr.mxu1 %v1654_v22 }
 0x3e4   : > { %1829 = vxpose.xlu1.b32.end [4/4] (short) %v1793_v57, 128  ;;  %v5546_v37 = vpop.eup %5545  ;;  %1708 = vmatpush1.xpose.msra.mxu1 %v1653_v27  ;;  %v9405_v27 = vld [vmem:[#allocation31_spill] sm:$0xff] }
 0x3e5   : > { %v1652_v9 = vmul.f32 %v5546_v37, %v6894_v48  ;;  %v1651_v2 = vmul.f32 %v5546_v37, %v6887_v4 }
 0x3e6   : > { %v1519_v42 = vpop.xlane.xlu1 %1518 }
 0x3e7   : > { %5555 = vrcp.f32 %v1519_v42  ;;  %1709 = vmatprep.subr.mxu1 %v1652_v9 }
 0x3e8   : > { %v5548_v60 = vpop.eup %5547  ;;  %1710 = vmatpush1.xpose.msra.mxu1 %v1651_v2  ;;  %5557 = vrcp.f32 %v1516_v50 }
 0x3e9   : > { %v1650_v5 = vmul.f32 %v5548_v60, %v6908_v32  ;;  %v1649_v63 = vmul.f32 %v5548_v60, %v6901_v36 }
 0x3ea   : > { %v1513_v17 = vpop.xlane.xlu1 %1512 }
 0x3eb   : > { %1711 = vmatprep.subr.mxu1 %v1650_v5  ;;  %5559 = vrcp.f32 %v1513_v17 }
 0x3ec   : > { %v5550_v3 = vpop.eup %5549  ;;  %1712 = vmatpush1.xpose.msra.mxu1 %v1649_v63  ;;  %5561 = vrcp.f32 %v1510_v39 }
 0x3ed   : > { %v1648_v20 = vmul.f32 %v5550_v3, %v6914_v1  ;;  %v1647_v48 = vmul.f32 %v5550_v3, %v6910_v43  ;;  %v5552_v4 = vpop.eup %5551 }
 0x3ee   : > { %v1644_v36 = vmul.f32 %v5552_v4, %v6871_v53  ;;  %v1507_v47 = vpop.xlane.xlu1 %1506  ;;  %v1643_v43 = vmul.f32 %v5552_v4, %v6868_v52 }
 0x3ef   : > { %1713 = vmatprep.subr.mxu1 %v1648_v20  ;;  %5563 = vrcp.f32 %v1507_v47 }
 0x3f0   : > { %v5554_v19 = vpop.eup %5553  ;;  %1714 = vmatpush1.xpose.msra.mxu1 %v1647_v48 }
 0x3f1   : > { %v1646_v28 = vmul.f32 %v5554_v19, %v6920_v38  ;;  %v1645_v32 = vmul.f32 %v5554_v19, %v6916_v58 }
 0x3f3   : > { %1715 = vmatprep.subr.mxu1 %v1646_v28 }
 0x3f4   : > { %v5556_v10 = vpop.eup %5555  ;;  %1716 = vmatpush1.xpose.msra.mxu1 %v1645_v32 }
 0x3f5   : > { %1717 = vmatprep.subr.mxu1 %v1644_v36  ;;  %v1642_v1 = vmul.f32 %v5556_v10, %v6924_v59  ;;  %v5558_v23 = vpop.eup %5557  ;;  %v1641_v38 = vmul.f32 %v5556_v10, %v6922_v51 }
 0x3f6   : > { %v1640_v58 = vmul.f32 %v5558_v23, %v6884_v26  ;;  %v1639_v11 = vmul.f32 %v5558_v23, %v6882_v40 }
 0x3f8   : > { %1718 = vmatpush1.xpose.msra.mxu1 %v1643_v43  ;;  %v5560_v18 = vpop.eup %5559 }
 0x3f9   : > { %1719 = vmatprep.subr.mxu1 %v1642_v1  ;;  %v1638_v52 = vmul.f32 %v5560_v18, %v6934_v30  ;;  %v5562_v54 = vpop.eup %5561  ;;  %v1637_v57 = vmul.f32 %v5560_v18, %v6930_v31  ;;  %v9407_v1 = vld [vmem:[#allocation32_spill] sm:$0xff] }
 0x3fa   : > { %v1597_v25 = vpop.xlane.xlu1 %1596  ;;  %v1636_v51 = vmul.f32 %v5562_v54, %v6898_v49  ;;  %v1635_v7 = vmul.f32 %v5562_v54, %v9405_v27 }
 0x3fb   : > { %5565 = vrcp.f32 %v1597_v25 }
 0x3fc   : > { %1720 = vmatpush1.xpose.msra.mxu1 %v1641_v38  ;;  %v5564_v26 = vpop.eup %5563 }
 0x3fd   : > { %1721 = vmatprep.subr.mxu1 %v1640_v58  ;;  %v1634_v40 = vmul.f32 %v5564_v26, %v6944_v8  ;;  %v1633_v30 = vmul.f32 %v5564_v26, %v6939_v0  ;;  %v9409_v58 = vld [vmem:[#allocation30_spill] sm:$0xff] }
 0x3fe   : > { %v1591_v22 = vpop.xlane.xlu1 %1590 }
 0x400   : > { %v1600_v53 = vpop.xlane.xlu0 %1599  ;;  %1722 = vmatpush1.xpose.msra.mxu1 %v1639_v11 }
 0x401   : > { %5567 = vrcp.f32 %v1600_v53  ;;  %1723 = vmatprep.subr.mxu1 %v1638_v52 }
 0x402   : > { %v1585_v2 = vpop.xlane.xlu1 %1584 }
 0x404   : > { %v1594_v59 = vpop.xlane.xlu0 %1593  ;;  %1724 = vmatpush1.xpose.msra.mxu1 %v1637_v57 }
 0x405   : > { %5569 = vrcp.f32 %v1594_v59  ;;  %1725 = vmatprep.subr.mxu1 %v1636_v51  ;;  %v9410_v51 = vld [vmem:[#allocation42_spill] sm:$0xff] }
 0x406   : > { %5571 = vrcp.f32 %v1591_v22 }
 0x408   : > { %v1588_v37 = vpop.xlane.xlu0 %1587  ;;  %1726 = vmatpush1.xpose.msra.mxu1 %v1635_v7  ;;  %v5566_v9 = vpop.eup %5565  ;;  %v9412_v7 = vld [vmem:[#allocation39_spill] sm:$0xff] }
 0x409   : > { %1727 = vmatprep.subr.mxu1 %v1634_v40  ;;  %5573 = vrcp.f32 %v1588_v37  ;;  %v1694_v60 = vmul.f32 %v5566_v9, %v6958_v12  ;;  %v1693_v5 = vmul.f32 %v5566_v9, %v6956_v55  ;;  %v9414_v9 = vld [vmem:[#allocation35_spill] sm:$0xff] }
 0x40a   : > { %5575 = vrcp.f32 %v1585_v2 }
 0x40c   : > { %1728 = vmatpush1.xpose.msra.mxu1 %v1633_v30  ;;  %v1582_v8 = vpop.xlane.xlu0 %1581  ;;  %v9413_v30 = vld [vmem:[#allocation41_spill] sm:$0xff] }
 0x40d   : > { %5577 = vrcp.f32 %v1582_v8 }
 0x40e   : > { %v5568_v31 = vpop.eup %5567  ;;  %v1579_v3 = vpop.xlane.xlu1 %1578 }
 0x40f   : > { %v1696_v49 = vmul.f32 %v5568_v31, %v6972_v62  ;;  %v1695_v42 = vmul.f32 %v5568_v31, %v6968_v45  ;;  %5579 = vrcp.f32 %v1579_v3 }
 0x411   : > { %1729 = vmatprep.subr.mxu1 %v1696_v49  ;;  %v9415_v49 = vld [vmem:[#allocation38_spill] sm:$0xff] }
 0x412   : > { %v5570_v50 = vpop.eup %5569  ;;  %1730 = vmatpush2.xpose.msra.mxu1 %v1695_v42  ;;  %v1576_v12 = vpop.xlane.xlu0 %1575 }
 0x413   : > { %1731 = vmatprep.subr.mxu1 %v1694_v60  ;;  %v1692_v0 = vmul.f32 %v5570_v50, %v6986_v46  ;;  %v5572_v63 = vpop.eup %5571  ;;  %v1691_v62 = vmul.f32 %v5570_v50, %v6982_v34  ;;  %5581 = vrcp.f32 %v1576_v12  ;;  %v9416_v60 = vld [vmem:[#allocation45_spill] sm:$0xff]  ;;  %v9420_v12 = vld [vmem:[#allocation48_spill] sm:$0xff] }
 0x414   : > { %v1690_v45 = vmul.f32 %v5572_v63, %v6966_v15  ;;  %v1689_v20 = vmul.f32 %v5572_v63, %v6964_v33 }
 0x416   : > { %1732 = vmatpush2.xpose.msra.mxu1 %v1693_v5  ;;  %v5574_v17 = vpop.eup %5573  ;;  %v1573_v46 = vpop.xlane.xlu1 %1572 }
 0x417   : > { %1733 = vmatprep.subr.mxu1 %v1692_v0  ;;  %v1688_v55 = vmul.f32 %v5574_v17, %v6994_v14  ;;  %v5576_v48 = vpop.eup %5575  ;;  %v1687_v4 = vmul.f32 %v5574_v17, %v6990_v16  ;;  %5583 = vrcp.f32 %v1573_v46  ;;  %v9417_v0 = vld [vmem:[#allocation33_spill] sm:$0xff]  ;;  %v9419_v17 = vld [vmem:[#allocation66_spill] sm:$0xff] }
 0x418   : > { %v1686_v34 = vmul.f32 %v5576_v48, %v6980_v35  ;;  %v1685_v39 = vmul.f32 %v5576_v48, %v6976_v56  ;;  %v9406_v56 = vld [vmem:[#allocation29_spill] sm:$0xff]  ;;  %v9422_v46 = vld [vmem:[#allocation46_spill] sm:$0xff] }
 0x41a   : > { %1734 = vmatpush2.xpose.msra.mxu1 %v1691_v62  ;;  %v5578_v19 = vpop.eup %5577  ;;  %v1570_v15 = vpop.xlane.xlu0 %1569  ;;  %v9418_v62 = vld [vmem:[#allocation49_spill] sm:$0xff] }
 0x41b   : > { %1735 = vmatprep.subr.mxu1 %v1690_v45  ;;  %5585 = vrcp.f32 %v1570_v15  ;;  %v1684_v33 = vmul.f32 %v5578_v19, %v7002_v41  ;;  %v1683_v32 = vmul.f32 %v5578_v19, %v7000_v61  ;;  %v9408_v61 = vld [vmem:[#allocation43_spill] sm:$0xff]  ;;  %v9425_v15 = vld [vmem:[#allocation37_spill] sm:$0xff] }
 0x41c   : > { %v5580_v28 = vpop.eup %5579 }
 0x41d   : > { %v1682_v16 = vmul.f32 %v5580_v28, %v7010_v24  ;;  %v1681_v10 = vmul.f32 %v5580_v28, %v7008_v6 }
 0x41e   : > { %1736 = vmatpush2.xpose.msra.mxu1 %v1689_v20  ;;  %v1567_v14 = vpop.xlane.xlu1 %1566 }
 0x41f   : > { %1737 = vmatprep.subr.mxu1 %v1688_v55  ;;  %5587 = vrcp.f32 %v1567_v14  ;;  %v9421_v55 = vld [vmem:[#allocation47_spill] sm:$0xff]  ;;  %v9427_v14 = vmov 0.0  }
 0x420   : > { %v5582_v36 = vpop.eup %5581 }
 0x421   : > { %v1680_v47 = vmul.f32 %v5582_v36, %v9406_v56  ;;  %v1679_v23 = vmul.f32 %v5582_v36, %v9407_v1 }
 0x422   : > { %1738 = vmatpush2.xpose.msra.mxu1 %v1687_v4  ;;  %v1564_v35 = vpop.xlane.xlu0 %1563  ;;  %v9423_v4 = vld [vmem:[#allocation34_spill] sm:$0xff] }
 0x423   : > { %1739 = vmatprep.subr.mxu1 %v1686_v34  ;;  %5589 = vrcp.f32 %v1564_v35  ;;  %v9424_v34 = vld [vmem:[#allocation36_spill] sm:$0xff] }
 0x424   : > { %v5584_v43 = vpop.eup %5583 }
 0x425   : > { %v1678_v38 = vmul.f32 %v5584_v43, %v9408_v61  ;;  %v1677_v18 = vmul.f32 %v5584_v43, %v9409_v58 }
 0x426   : > { %1740 = vmatpush2.xpose.msra.mxu1 %v1685_v39  ;;  %v1561_v41 = vpop.xlane.xlu1 %1560 }
 0x427   : > { %1741 = vmatprep.subr.mxu1 %v1684_v33  ;;  %5591 = vrcp.f32 %v1561_v41  ;;  %v9426_v33 = vld [vmem:[#allocation40_spill] sm:$0xff] }
 0x428   : > { %v5586_v25 = vpop.eup %5585 }
 0x429   : > { %v1676_v6 = vmul.f32 %v5586_v25, %v7034_v21  ;;  %v1675_v52 = vmul.f32 %v5586_v25, %v7032_v13  ;;  %v9411_v21 = vld [vmem:[#allocation44_spill] sm:$0xff]  ;;  %v701_v13 = vpop.f32.mrf.mxu0 }
 0x42a   : > { %1742 = vmatpush2.xpose.msra.mxu1 %v1683_v32  ;;  %v1558_v24 = vpop.xlane.xlu0 %1557 }
 0x42b   : > { %1743 = vmatprep.subr.mxu1 %v1682_v16  ;;  %5593 = vrcp.f32 %v1558_v24 }
 0x42c   : > { %v5588_v53 = vpop.eup %5587 }
 0x42d   : > { %v1674_v54 = vmul.f32 %v5588_v53, %v7042_v44  ;;  %v1673_v57 = vmul.f32 %v5588_v53, %v7040_v29  ;;  %v703_v29 = vpop.f32.mrf.mxu0 }
 0x42e   : > { %1744 = vmatpush2.xpose.msra.mxu1 %v1681_v10  ;;  %v1555_v11 = vpop.xlane.xlu1 %1554 }
 0x42f   : > { %1745 = vmatprep.subr.mxu1 %v1680_v47  ;;  %5595 = vrcp.f32 %v1555_v11  ;;  %v707_v5 = vpop.f32.mrf.mxu0 }
 0x430   : > { %v5590_v59 = vpop.eup %5589 }
 0x431   : > { %v1672_v26 = vmul.f32 %v5590_v59, %v9410_v51  ;;  %v1671_v27 = vmul.f32 %v5590_v59, %v9411_v21  ;;  %v709_v45 = vpop.f32.mrf.mxu0 }
 0x432   : > { %1746 = vmatpush2.xpose.msra.mxu1 %v1679_v23 }
 0x433   : > { %1747 = vmatprep.subr.mxu1 %v1678_v38  ;;  %v713_v48 = vpop.f32.mrf.mxu0 }
 0x434   : > { %v5592_v22 = vpop.eup %5591 }
 0x435   : > { %v1670_v40 = vmul.f32 %v5592_v22, %v9412_v7  ;;  %v1669_v44 = vmul.f32 %v5592_v22, %v9413_v30  ;;  %v715_v39 = vpop.f32.mrf.mxu0 }
 0x436   : > { %1748 = vmatpush2.xpose.msra.mxu1 %v1677_v18 }
 0x437   : > { %1749 = vmatprep.subr.mxu1 %v1676_v6 }
 0x438   : > { %v5594_v37 = vpop.eup %5593 }
 0x439   : > { %v1668_v31 = vmul.f32 %v5594_v37, %v9414_v9  ;;  %v1667_v42 = vmul.f32 %v5594_v37, %v9415_v49 }
 0x43a   : > { %1750 = vmatpush2.xpose.msra.mxu1 %v1675_v52 }
 0x43b   : > { %1751 = vmatprep.subr.mxu1 %v1674_v54 }
 0x43c   : > { %v5596_v2 = vpop.eup %5595 }
 0x43d   : > { %v1666_v50 = vmul.f32 %v5596_v2, %v9416_v60  ;;  %v1665_v63 = vmul.f32 %v5596_v2, %v9417_v0 }
 0x43e   : > { %1752 = vmatpush2.xpose.msra.mxu1 %v1673_v57 }
 0x43f   : > { %1753 = vmatprep.subr.mxu1 %v1672_v26 }
 0x442   : > { %1754 = vmatpush2.xpose.msra.mxu1 %v1671_v27 }
 0x443   : > { %1755 = vmatprep.subr.mxu1 %v1670_v40 }
 0x446   : > { %1756 = vmatpush2.xpose.msra.mxu1 %v1669_v44 }
 0x447   : > { %1757 = vmatprep.subr.mxu1 %v1668_v31 }
 0x44a   : > { %1758 = vmatpush2.xpose.msra.mxu1 %v1667_v42  ;;  %v1810_v8 = vpop.trf.xlu0 }
 0x44b   : > { %1759 = vmatprep.subr.mxu1 %v1666_v50 }
 0x44e   : > { %1760 = vmatpush2.xpose.msra.mxu1 %v1665_v63  ;;  %v1811_v3 = vpop.trf.xlu0 }
 0x44f   : > { %1978 = vmatprep.subr.mxu1 %v9418_v62 }
 0x451   : > { %1762 = vmatmul.mubr.f32.vlgmr.msra.gmra.mxu1 %v9419_v17 }
 0x452   : > { %1767 = vmatprep.mubr.f32.mxu1 %v703_v29  ;;  %1979 = vmatpush1.msra.mxu1 %v9420_v12  ;;  %v1812_v20 = vpop.trf.xlu0 }
 0x453   : > { %1980 = vmatprep.subr.mxu1 %v9421_v55 }
 0x454   : > { %1981 = vmatpush1.msra.mxu1 %v9422_v46  ;;  %v1842_v47 = vpop.trf.xlu1 }
 0x455   : > { %1768 = vmatmul.mubr.f32.gmra.mxu1 %v701_v13  ;;  %1982 = vmatprep.subr.mxu1 %v9423_v4 }
 0x456   : > { %1773 = vmatprep.mubr.f32.mxu1 %v709_v45  ;;  %1983 = vmatpush1.msra.mxu1 %v9424_v34  ;;  %v1813_v19 = vpop.trf.xlu0 }
 0x457   : > { %1984 = vmatprep.subr.mxu1 %v9425_v15 }
 0x458   : > { %1985 = vmatpush1.msra.mxu1 %v9426_v33  ;;  %v1843_v41 = vpop.trf.xlu1 }
 0x459   : > { %1774 = vmatmul.mubr.f32.gmra.mxu1 %v707_v5 }
 0x45a   : > { %1779 = vmatprep.mubr.f32.mxu1 %v715_v39  ;;  %v1814_v28 = vpop.trf.xlu0 }
 0x45c   : > { %v1844_v23 = vpop.trf.xlu1 }
 0x45d   : > { %1780 = vmatmul.mubr.f32.gmra.mxu1 %v713_v48 }
 0x45e   : > { %2018 = vmatprep.mubr.f32.mxu1 %v9427_v14  ;;  %v1815_v32 = vpop.trf.xlu0 }
 0x460   : > { %v1845_v38 = vpop.trf.xlu1 }
 0x461   : > { %5247 = vmatmul.mubr.msk.f32.vlgmr.msra.gmra.mxu1 %vm863_vm6, %v1810_v8 }
 0x462   : > { %2024 = vmatprep.mubr.f32.mxu1 %v9427_v14  ;;  %v1816_v16 = vpop.trf.xlu0 }
 0x464   : > { %v1846_v24 = vpop.trf.xlu1 }
 0x465   : > { %5248 = vmatmul.mubr.msk.f32.gmra.mxu1 %vm863_vm6, %v1811_v3 }
 0x466   : > { %2030 = vmatprep.mubr.f32.mxu1 %v9427_v14  ;;  %v1817_v36 = vpop.trf.xlu0 }
 0x468   : > { %v1847_v18 = vpop.trf.xlu1 }
 0x469   : > { %5249 = vmatmul.mubr.msk.f32.gmra.mxu1 %vm863_vm6, %v1812_v20 }
 0x46a   : > { %2036 = vmatprep.mubr.f32.mxu1 %v9427_v14  ;;  %v1818_v35 = vpop.trf.xlu0 }
 0x46c   : > { %v1848_v6 = vpop.trf.xlu1 }
 0x46d   : > { %5250 = vmatmul.mubr.msk.f32.gmra.mxu1 %vm863_vm6, %v1813_v19 }
 0x46e   : > { %2042 = vmatprep.mubr.f32.mxu1 %v9427_v14  ;;  %v1819_v10 = vpop.trf.xlu0 }
 0x470   : > { %v1849_v53 = vpop.trf.xlu1 }
 0x471   : > { %5251 = vmatmul.mubr.msk.f32.gmra.mxu1 %vm863_vm6, %v1814_v28 }
 0x472   : > { %2048 = vmatprep.mubr.f32.mxu1 %v9427_v14  ;;  %v1820_v56 = vpop.trf.xlu0 }
 0x474   : > { %v1850_v11 = vpop.trf.xlu1 }
 0x475   : > { %5252 = vmatmul.mubr.msk.f32.gmra.mxu1 %vm863_vm6, %v1815_v32 }
 0x476   : > { %2054 = vmatprep.mubr.f32.mxu1 %v9427_v14  ;;  %v1821_v43 = vpop.trf.xlu0 }
 0x478   : > { %v1851_v52 = vpop.trf.xlu1 }
 0x479   : > { %5253 = vmatmul.mubr.msk.f32.gmra.mxu1 %vm863_vm6, %v1816_v16 }
 0x47a   : > { %2060 = vmatprep.mubr.f32.mxu1 %v9427_v14  ;;  %v1822_v1 = vpop.trf.xlu0 }
 0x47c   : > { %v1852_v54 = vpop.trf.xlu1 }
 0x47d   : > { %5254 = vmatmul.mubr.msk.f32.gmra.mxu1 %vm863_vm6, %v1817_v36 }
 0x47e   : > { %2066 = vmatprep.mubr.f32.mxu1 %v9427_v14  ;;  %v1823_v61 = vpop.trf.xlu0 }
 0x480   : > { %v1853_v59 = vpop.trf.xlu1 }
 0x481   : > { %5255 = vmatmul.mubr.msk.f32.gmra.mxu1 %vm863_vm6, %v1818_v35 }
 0x482   : > { %2072 = vmatprep.mubr.f32.mxu1 %v9427_v14  ;;  %v1824_v25 = vpop.trf.xlu0 }
 0x484   : > { %v1854_v57 = vpop.trf.xlu1 }
 0x485   : > { %5256 = vmatmul.mubr.msk.f32.gmra.mxu1 %vm863_vm6, %v1819_v10 }
 0x486   : > { %2078 = vmatprep.mubr.f32.mxu1 %v9427_v14  ;;  %v1825_v58 = vpop.trf.xlu0 }
 0x488   : > { %v1855_v51 = vpop.trf.xlu1 }
 0x489   : > { %5257 = vmatmul.mubr.msk.f32.gmra.mxu1 %vm863_vm6, %v1820_v56 }
 0x48a   : > { %2084 = vmatprep.mubr.f32.mxu1 %v9427_v14 }
 0x48c   : > { %v1856_v26 = vpop.trf.xlu1 }
 0x48d   : > { %5258 = vmatmul.mubr.msk.f32.gmra.mxu1 %vm863_vm6, %v1821_v43 }
 0x48e   : > { %2090 = vmatprep.mubr.f32.mxu1 %v9427_v14 }
 0x490   : > { %v1857_v22 = vpop.trf.xlu1 }
 0x491   : > { %5259 = vmatmul.mubr.msk.f32.gmra.mxu1 %vm863_vm6, %v1822_v1 }
 0x492   : > { %2096 = vmatprep.mubr.f32.mxu1 %v9427_v14 }
 0x495   : > { %5260 = vmatmul.mubr.msk.f32.gmra.mxu1 %vm863_vm6, %v1823_v61 }
 0x496   : > { %2102 = vmatprep.mubr.f32.mxu1 %v9427_v14 }
 0x499   : > { %5261 = vmatmul.mubr.msk.f32.gmra.mxu1 %vm863_vm6, %v1824_v25 }
 0x49a   : > { %2108 = vmatprep.mubr.f32.mxu1 %v9427_v14 }
 0x49d   : > { %5262 = vmatmul.mubr.msk.f32.gmra.mxu1 %vm863_vm6, %v1825_v58 }
 0x49e   : > { %2114 = vmatprep.mubr.f32.mxu1 %v9427_v14 }
 0x4a1   : > { %5263 = vmatmul.mubr.msk.f32.gmra.mxu1 %vm863_vm6, %v1842_v47 }
 0x4a2   : > { %2120 = vmatprep.mubr.f32.mxu1 %v9427_v14 }
 0x4a5   : > { %5264 = vmatmul.mubr.msk.f32.gmra.mxu1 %vm863_vm6, %v1843_v41 }
 0x4a6   : > { %2126 = vmatprep.mubr.f32.mxu1 %v9427_v14 }
 0x4a9   : > { %5265 = vmatmul.mubr.msk.f32.gmra.mxu1 %vm863_vm6, %v1844_v23 }
 0x4aa   : > { %2132 = vmatprep.mubr.f32.mxu1 %v9427_v14 }
 0x4ad   : > { %5266 = vmatmul.mubr.msk.f32.gmra.mxu1 %vm863_vm6, %v1845_v38 }
 0x4ae   : > { %2138 = vmatprep.mubr.f32.mxu1 %v9427_v14 }
 0x4b1   : > { %5267 = vmatmul.mubr.msk.f32.gmra.mxu1 %vm863_vm6, %v1846_v24 }
 0x4b2   : > { %2144 = vmatprep.mubr.f32.mxu1 %v9427_v14 }
 0x4b5   : > { %5268 = vmatmul.mubr.msk.f32.gmra.mxu1 %vm863_vm6, %v1847_v18 }
 0x4b6   : > { %2150 = vmatprep.mubr.f32.mxu1 %v9427_v14 }
 0x4b9   : > { %5269 = vmatmul.mubr.msk.f32.gmra.mxu1 %vm863_vm6, %v1848_v6 }
 0x4ba   : > { %2156 = vmatprep.mubr.f32.mxu1 %v9427_v14 }
 0x4bd   : > { %5270 = vmatmul.mubr.msk.f32.gmra.mxu1 %vm863_vm6, %v1849_v53 }
 0x4be   : > { %2162 = vmatprep.mubr.f32.mxu1 %v9427_v14 }
 0x4c1   : > { %5271 = vmatmul.mubr.msk.f32.gmra.mxu1 %vm863_vm6, %v1850_v11 }
 0x4c2   : > { %2168 = vmatprep.mubr.f32.mxu1 %v9427_v14 }
 0x4c5   : > { %5272 = vmatmul.mubr.msk.f32.gmra.mxu1 %vm863_vm6, %v1851_v52 }
 0x4c6   : > { %2174 = vmatprep.mubr.f32.mxu1 %v9427_v14 }
 0x4c9   : > { %5273 = vmatmul.mubr.msk.f32.gmra.mxu1 %vm863_vm6, %v1852_v54 }
 0x4ca   : > { %2180 = vmatprep.mubr.f32.mxu1 %v9427_v14 }
 0x4cd   : > { %5274 = vmatmul.mubr.msk.f32.gmra.mxu1 %vm863_vm6, %v1853_v59 }
 0x4ce   : > { %2186 = vmatprep.mubr.f32.mxu1 %v9427_v14 }
 0x4d1   : > { %5275 = vmatmul.mubr.msk.f32.gmra.mxu1 %vm863_vm6, %v1854_v57 }
 0x4d2   : > { %2192 = vmatprep.mubr.f32.mxu1 %v9427_v14 }
 0x4d5   : > { %5276 = vmatmul.mubr.msk.f32.gmra.mxu1 %vm863_vm6, %v1855_v51 }
 0x4d6   : > { %2198 = vmatprep.mubr.f32.mxu1 %v9427_v14 }
 0x4d9   : > { %5277 = vmatmul.mubr.msk.f32.gmra.mxu1 %vm863_vm6, %v1856_v26 }
 0x4da   : > { %2204 = vmatprep.mubr.f32.mxu1 %v9427_v14 }
 0x4dd   : > { %5278 = vmatmul.mubr.msk.f32.gmra.mxu1 %vm863_vm6, %v1857_v22 }
 0x511   : > { %v7265_v21 = vpop.f32.mrf.mxu1 }
 0x512   : > { %9428 = vst [vmem:[#allocation5_spill] sm:$0xff] %v7265_v21 }
 0x513   : > { %v7267_v27 = vpop.f32.mrf.mxu1 }
 0x514   : > { %9429 = vst [vmem:[#allocation7_spill] sm:$0xff] %v7267_v27 }
 0x515   : > { %v7269_v7 = vpop.f32.mrf.mxu1 }
 0x516   : > { %9430 = vst [vmem:[#allocation9_spill] sm:$0xff] %v7269_v7 }
 0x517   : > { %v7271_v40 = vpop.f32.mrf.mxu1 }
 0x518   : > { %9431 = vst [vmem:[#allocation6_spill] sm:$0xff] %v7271_v40 }
 0x519   : > { %v7273_v37 = vpop.f32.mrf.mxu1 }
 0x51a   : > { %9432 = vst [vmem:[#allocation11_spill] sm:$0xff] %v7273_v37 }
 0x51b   : > { %v7275_v13 = vpop.f32.mrf.mxu1 }
 0x51c   : > { %9433 = vst [vmem:[#allocation8_spill] sm:$0xff] %v7275_v13 }
 0x51d   : > { %v7277_v30 = vpop.f32.mrf.mxu1 }
 0x51e   : > { %9434 = vst [vmem:[#allocation10_spill] sm:$0xff] %v7277_v30 }
 0x51f   : > { %v7279_v44 = vpop.f32.mrf.mxu1 }
 0x520   : > { %9435 = vst [vmem:[#allocation12_spill] sm:$0xff] %v7279_v44 }
 0x521   : > { %v7281_v9 = vpop.f32.mrf.mxu1 }
 0x522   : > { %9436 = vst [vmem:[#allocation31_spill] sm:$0xff] %v7281_v9 }
 0x523   : > { %v7283_v31 = vpop.f32.mrf.mxu1 }
 0x524   : > { %9437 = vst [vmem:[#allocation29_spill] sm:$0xff] %v7283_v31 }
 0x525   : > { %v7285_v2 = vpop.f32.mrf.mxu1 }
 0x527   : > { %v7287_v29 = vpop.f32.mrf.mxu1 }
 0x529   : > { %v7289_v49 = vpop.f32.mrf.mxu1 }
 0x52a   : > { %9438 = vst [vmem:[#allocation32_spill] sm:$0xff] %v7289_v49 }
 0x52b   : > { %v7291_v42 = vpop.f32.mrf.mxu1 }
 0x52c   : > { %9439 = vst [vmem:[#allocation43_spill] sm:$0xff] %v7291_v42  ;;  %v2217_v26 = vmax.f32 %v7289_v49, %v7291_v42 }
 0x52d   : > { %v7293_v60 = vpop.f32.mrf.mxu1 }
 0x52f   : > { %v7295_v50 = vpop.f32.mrf.mxu1 }
 0x531   : > { %v7297_v8 = vpop.f32.mrf.mxu1 }
 0x532   : > { %9440 = vst [vmem:[#allocation30_spill] sm:$0xff] %v7297_v8 }
 0x533   : > { %v7299_v5 = vpop.f32.mrf.mxu1 }
 0x534   : > { %9441 = vst [vmem:[#allocation42_spill] sm:$0xff] %v7299_v5  ;;  %v2223_v54 = vmax.f32 %v7297_v8, %v7299_v5 }
 0x535   : > { %v7301_v0 = vpop.f32.mrf.mxu1 }
 0x537   : > { %v7303_v63 = vpop.f32.mrf.mxu1 }
 0x538   : > { %v2226_v22 = vmax.f32 %v7301_v0, %v7303_v63 }
 0x539   : > { %v7305_v3 = vpop.f32.mrf.mxu1 }
 0x53b   : > { %v7307_v62 = vpop.f32.mrf.mxu1 }
 0x53c   : > { %v2229_v6 = vmax.f32 %v7305_v3, %v7307_v62 }
 0x53d   : > { %v7309_v45 = vpop.f32.mrf.mxu1 }
 0x53f   : > { %v7311_v17 = vpop.f32.mrf.mxu1 }
 0x540   : > { %v2232_v59 = vmax.f32 %v7309_v45, %v7311_v17 }
 0x541   : > { %v7313_v12 = vpop.f32.mrf.mxu1 }
 0x543   : > { %v7315_v20 = vpop.f32.mrf.mxu1 }
 0x544   : > { %v2235_v25 = vmax.f32 %v7313_v12, %v7315_v20 }
 0x545   : > { %v7317_v55 = vpop.f32.mrf.mxu1 }
 0x547   : > { %v7319_v48 = vpop.f32.mrf.mxu1 }
 0x548   : > { %v2238_v53 = vmax.f32 %v7317_v55, %v7319_v48 }
 0x549   : > { %v7321_v46 = vpop.f32.mrf.mxu1 }
 0x54b   : > { %v7323_v4 = vpop.f32.mrf.mxu1 }
 0x54c   : > { %v2241_v1 = vmax.f32 %v7321_v46, %v7323_v4 }
 0x54d   : > { %v7325_v34 = vpop.f32.mrf.mxu1 }
 0x54f   : > { %v7327_v19 = vpop.f32.mrf.mxu1 }
 0x550   : > { %v2244_v24 = vmax.f32 %v7325_v34, %v7327_v19 }
 0x551   : > { %v7329_v15 = vpop.f32.mrf.mxu1 }
 0x553   : > { %v7331_v39 = vpop.f32.mrf.mxu1 }
 0x554   : > { %v2247_v56 = vmax.f32 %v7329_v15, %v7331_v39 }
 0x555   : > { %v7333_v33 = vpop.f32.mrf.mxu1 }
 0x557   : > { %v7335_v28 = vpop.f32.mrf.mxu1 }
 0x558   : > { %v2250_v23 = vmax.f32 %v7333_v33, %v7335_v28 }
 0x559   : > { %v7337_v32 = vpop.f32.mrf.mxu1 }
 0x55b   : > { %v7339_v16 = vpop.f32.mrf.mxu1 }
 0x55c   : > { %v2253_v36 = vmax.f32 %v7337_v32, %v7339_v16 }
 0x55d   : > { %v7343_v35 = vpop.f32.mrf.mxu1 }
 0x55e   : > { %2254 = vmax.xlane.f32.xlu1 %v2253_v36 }
 0x55f   : > { %v7345_v10 = vpop.f32.mrf.mxu1 }
 0x560   : > { %v2256_v47 = vmax.f32 %v7343_v35, %v7345_v10 }
 0x561   : > { %v7351_v43 = vpop.f32.mrf.mxu1 }
 0x562   : > { %9442 = vst [vmem:[#allocation44_spill] sm:$0xff] %v7351_v43  ;;  %2248 = vmax.xlane.f32.xlu1 %v2247_v56  ;;  %2257 = vmax.xlane.f32.xlu0 %v2256_v47  ;;  %v2211_v47 = vmax.f32 %v7281_v9, %v7283_v31 }
 0x563   : > { %v7353_v41 = vpop.f32.mrf.mxu1 }
 0x564   : > { %9443 = vst [vmem:[#allocation39_spill] sm:$0xff] %v7353_v41 }
 0x565   : > { %v7359_v61 = vpop.f32.mrf.mxu1 }
 0x566   : > { %9444 = vst [vmem:[#allocation41_spill] sm:$0xff] %v7359_v61  ;;  %2242 = vmax.xlane.f32.xlu1 %v2241_v1  ;;  %2251 = vmax.xlane.f32.xlu0 %v2250_v23  ;;  %v2220_v1 = vmax.f32 %v7293_v60, %v7295_v50 }
 0x567   : > { %v7361_v38 = vpop.f32.mrf.mxu1 }
 0x568   : > { %9445 = vst [vmem:[#allocation35_spill] sm:$0xff] %v7361_v38 }
 0x569   : > { %v7367_v58 = vpop.f32.mrf.mxu1 }
 0x56a   : > { %9446 = vst [vmem:[#allocation38_spill] sm:$0xff] %v7367_v58  ;;  %2236 = vmax.xlane.f32.xlu1 %v2235_v25  ;;  %2245 = vmax.xlane.f32.xlu0 %v2244_v24  ;;  %v2214_v24 = vmax.f32 %v7285_v2, %v7287_v29 }
 0x56b   : > { %v7369_v18 = vpop.f32.mrf.mxu1 }
 0x56c   : > { %9447 = vst [vmem:[#allocation45_spill] sm:$0xff] %v7369_v18 }
 0x56d   : > { %v7375_v11 = vpop.f32.mrf.mxu1 }
 0x56e   : > { %9448 = vst [vmem:[#allocation33_spill] sm:$0xff] %v7375_v11  ;;  %2230 = vmax.xlane.f32.xlu1 %v2229_v6  ;;  %2239 = vmax.xlane.f32.xlu0 %v2238_v53 }
 0x56f   : > { %v7377_v52 = vpop.f32.mrf.mxu1 }
 0x570   : > { %9449 = vst [vmem:[#allocation49_spill] sm:$0xff] %v7377_v52 }
 0x571   : > { %v7383_v57 = vpop.f32.mrf.mxu1 }
 0x572   : > { %2224 = vmax.xlane.f32.xlu1 %v2223_v54  ;;  %2233 = vmax.xlane.f32.xlu0 %v2232_v59 }
 0x573   : > { %v7385_v51 = vpop.f32.mrf.mxu1 }
 0x574   : > { %9450 = vst [vmem:[#allocation66_spill] sm:$0xff] %v7385_v51 }
 0x575   : > { %v7391_v36 = vpop.f32.mrf.mxu1 }
 0x576   : > { %2218 = vmax.xlane.f32.xlu1 %v2217_v26  ;;  %2227 = vmax.xlane.f32.xlu0 %v2226_v22 }
 0x577   : > { %v7393_v56 = vpop.f32.mrf.mxu1 }
 0x579   : > { %v7399_v23 = vpop.f32.mrf.mxu1 }
 0x57a   : > { %2212 = vmax.xlane.f32.xlu1 %v2211_v47  ;;  %2221 = vmax.xlane.f32.xlu0 %v2220_v1 }
 0x57b   : > { %v7401_v25 = vpop.f32.mrf.mxu1 }
 0x57d   : > { %v7405_v6 = vpop.f32.mrf.mxu1 }
 0x57e   : > { %2215 = vmax.xlane.f32.xlu0 %v2214_v24 }
 0x57f   : > { %v7407_v53 = vpop.f32.mrf.mxu1 }
 0x581   : > { %v7409_v54 = vpop.f32.mrf.mxu1 }
 0x583   : > { %v7411_v59 = vpop.f32.mrf.mxu1 }
 0x585   : > { %v7413_v26 = vpop.f32.mrf.mxu1 }
 0x587   : > { %v7415_v22 = vpop.f32.mrf.mxu1 }
 0x589   : > { %v7417_v47 = vpop.f32.mrf.mxu1 }
 0x58b   : > { %v7419_v1 = vpop.f32.mrf.mxu1 }
 0x58c   : > { %v2289_v5 = vmax.f32 %v7417_v47, %v7419_v1 }
 0x58d   : > { %v7421_v21 = vpop.f32.mrf.mxu1 }
 0x58f   : > { %v7423_v27 = vpop.f32.mrf.mxu1 }
 0x591   : > { %v7425_v7 = vpop.f32.mrf.mxu1 }
 0x593   : > { %v7427_v24 = vpop.f32.mrf.mxu1 }
 0x594   : > { %9451 = vst [vmem:[#allocation48_spill] sm:$0xff] %v7427_v24  ;;  %v2295_v42 = vmax.f32 %v7425_v7, %v7427_v24  ;;  %v2286_v24 = vmax.f32 %v7413_v26, %v7415_v22 }
 0x595   : > { %v7429_v40 = vpop.f32.mrf.mxu1 }
 0x597   : > { %v7431_v37 = vpop.f32.mrf.mxu1 }
 0x598   : > { %v2298_v8 = vmax.f32 %v7429_v40, %v7431_v37 }
 0x599   : > { %v7433_v13 = vpop.f32.mrf.mxu1 }
 0x59b   : > { %v7435_v30 = vpop.f32.mrf.mxu1 }
 0x59c   : > { %v2301_v44 = vmax.f32 %v7433_v13, %v7435_v30 }
 0x59d   : > { %v7439_v31 = vpop.f32.mrf.mxu1 }
 0x59e   : > { %2302 = vmax.xlane.f32.xlu1 %v2301_v44  ;;  %v2292_v44 = vmax.f32 %v7421_v21, %v7423_v27 }
 0x59f   : > { %v7441_v9 = vpop.f32.mrf.mxu1 }
 0x5a0   : > { %v2304_v49 = vmax.f32 %v7439_v31, %v7441_v9 }
 0x5a2   : > { %2296 = vmax.xlane.f32.xlu1 %v2295_v42  ;;  %2305 = vmax.xlane.f32.xlu0 %v2304_v49  ;;  %v2283_v42 = vmax.f32 %v7409_v54, %v7411_v59  ;;  %v2280_v49 = vmax.f32 %v7405_v6, %v7407_v53 }
 0x5a6   : > { %2290 = vmax.xlane.f32.xlu1 %v2289_v5  ;;  %2299 = vmax.xlane.f32.xlu0 %v2298_v8  ;;  %v2277_v5 = vmax.f32 %v7399_v23, %v7401_v25  ;;  %v2274_v8 = vmax.f32 %v7391_v36, %v7393_v56 }
 0x5aa   : > { %2293 = vmax.xlane.f32.xlu0 %v2292_v44  ;;  %v2271_v44 = vmax.f32 %v7383_v57, %v7385_v51 }
 0x5ae   : > { %2287 = vmax.xlane.f32.xlu0 %v2286_v24  ;;  %v2268_v24 = vmax.f32 %v7375_v11, %v7377_v52 }
 0x5b2   : > { %2284 = vmax.xlane.f32.xlu0 %v2283_v42  ;;  %v2265_v42 = vmax.f32 %v7367_v58, %v7369_v18 }
 0x5b6   : > { %2281 = vmax.xlane.f32.xlu0 %v2280_v49  ;;  %v2262_v49 = vmax.f32 %v7359_v61, %v7361_v38 }
 0x5ba   : > { %2278 = vmax.xlane.f32.xlu0 %v2277_v5  ;;  %v2259_v5 = vmax.f32 %v7351_v43, %v7353_v41 }
 0x5be   : > { %2275 = vmax.xlane.f32.xlu0 %v2274_v8  ;;  %v274_v8 = vld [vmem:[%s9175_s1 + $0x120] sm:$0xff] }
 0x5bf   : > { %5203 = vmatmul.mubr.msk.f32.gmra.mxu0 %vm288_vm5, %v274_v8 }
 0x5c0   : > { %723 = vmatprep.mubr.f32.mxu0 %v9427_v14 }
 0x5c2   : > { %2272 = vmax.xlane.f32.xlu0 %v2271_v44  ;;  %v275_v44 = vld [vmem:[%s9175_s1 + $0x128] sm:$0xff] }
 0x5c3   : > { %5204 = vmatmul.mubr.msk.f32.gmra.mxu0 %vm288_vm5, %v275_v44 }
 0x5c4   : > { %729 = vmatprep.mubr.f32.mxu0 %v9427_v14 }
 0x5c6   : > { %2269 = vmax.xlane.f32.xlu0 %v2268_v24  ;;  %v276_v24 = vld [vmem:[%s9175_s1 + $0x130] sm:$0xff] }
 0x5c7   : > { %5205 = vmatmul.mubr.msk.f32.gmra.mxu0 %vm288_vm5, %v276_v24 }
 0x5c8   : > { %735 = vmatprep.mubr.f32.mxu0 %v9427_v14 }
 0x5ca   : > { %2266 = vmax.xlane.f32.xlu0 %v2265_v42  ;;  %v277_v42 = vld [vmem:[%s9175_s1 + $0x138] sm:$0xff] }
 0x5cb   : > { %5206 = vmatmul.mubr.msk.f32.gmra.mxu0 %vm288_vm5, %v277_v42 }
 0x5cc   : > { %741 = vmatprep.mubr.f32.mxu0 %v9427_v14 }
 0x5ce   : > { %2263 = vmax.xlane.f32.xlu0 %v2262_v49 }
 0x5d2   : > { %2260 = vmax.xlane.f32.xlu0 %v2259_v5 }
 0x5e7   : > { %v2255_v49 = vpop.xlane.xlu1 %2254 }
 0x5e8   : > { %v2335_v8 = vsub.f32 %v7337_v32, %v2255_v49  ;;  %v2336_v43 = vsub.f32 %v7339_v16, %v2255_v49 }
 0x5ea   : > { %v2427_v58 = vmul.f32 1.442695, %v2335_v8  ;;  %v2429_v42 = vmul.f32 1.442695, %v2336_v43 }
 0x5eb   : > { %v2258_v5 = vpop.xlane.xlu0 %2257  ;;  %v2249_v44 = vpop.xlane.xlu1 %2248 }
 0x5ec   : > { %v2337_v41 = vsub.f32 %v7343_v35, %v2258_v5  ;;  %v2338_v24 = vsub.f32 %v7345_v10, %v2258_v5  ;;  %v2331_v35 = vsub.f32 %v7329_v15, %v2249_v44  ;;  %v2332_v16 = vsub.f32 %v7331_v39, %v2249_v44 }
 0x5ee   : > { %v2431_v38 = vmul.f32 1.442695, %v2337_v41  ;;  %v2433_v61 = vmul.f32 1.442695, %v2338_v24  ;;  %v2419_v49 = vmul.f32 1.442695, %v2331_v35 }
 0x5ef   : > { %v2252_v18 = vpop.xlane.xlu0 %2251  ;;  %v2243_v11 = vpop.xlane.xlu1 %2242  ;;  %v2421_v43 = vmul.f32 1.442695, %v2332_v16 }
 0x5f0   : > { %v2333_v52 = vsub.f32 %v7333_v33, %v2252_v18  ;;  %v2334_v14 = vsub.f32 %v7335_v28, %v2252_v18  ;;  %5597 = vpow2.f32 %v2431_v38  ;;  %v2328_v38 = vsub.f32 %v7323_v4, %v2243_v11 }
 0x5f1   : > { %5599 = vpow2.f32 %v2433_v61  ;;  %v2327_v61 = vsub.f32 %v7321_v46, %v2243_v11 }
 0x5f2   : > { %5601 = vpow2.f32 %v2427_v58  ;;  %v2423_v51 = vmul.f32 1.442695, %v2333_v52  ;;  %v2425_v10 = vmul.f32 1.442695, %v2334_v14 }
 0x5f3   : > { %v2246_v32 = vpop.xlane.xlu0 %2245  ;;  %5603 = vpow2.f32 %v2429_v42  ;;  %v2237_v5 = vpop.xlane.xlu1 %2236  ;;  %v2411_v52 = vmul.f32 1.442695, %v2327_v61 }
 0x5f4   : > { %5605 = vpow2.f32 %v2423_v51  ;;  %v2329_v33 = vsub.f32 %v7325_v34, %v2246_v32  ;;  %v2330_v28 = vsub.f32 %v7327_v19, %v2246_v32  ;;  %v2323_v15 = vsub.f32 %v7313_v12, %v2237_v5 }
 0x5f5   : > { %5607 = vpow2.f32 %v2425_v10  ;;  %v2324_v14 = vsub.f32 %v7315_v20, %v2237_v5  ;;  %v2413_v51 = vmul.f32 1.442695, %v2328_v38 }
 0x5f6   : > { %5609 = vpow2.f32 %v2419_v49  ;;  %v2415_v39 = vmul.f32 1.442695, %v2329_v33  ;;  %v2417_v18 = vmul.f32 1.442695, %v2330_v28  ;;  %v2403_v8 = vmul.f32 1.442695, %v2323_v15 }
 0x5f7   : > { %v2240_v41 = vpop.xlane.xlu0 %2239  ;;  %5611 = vpow2.f32 %v2421_v43  ;;  %v2405_v46 = vmul.f32 1.442695, %v2324_v14  ;;  %v2231_v16 = vpop.xlane.xlu1 %2230 }
 0x5f8   : > { %5613 = vpow2.f32 %v2415_v39  ;;  %v2325_v12 = vsub.f32 %v7317_v55, %v2240_v41  ;;  %v2326_v20 = vsub.f32 %v7319_v48, %v2240_v41 }
 0x5f9   : > { %5615 = vpow2.f32 %v2417_v18 }
 0x5fa   : > { %5617 = vpow2.f32 %v2411_v52 }
 0x5fb   : > { %v7506_v58 = vpop.xlane.xlu0 %2233  ;;  %5619 = vpow2.f32 %v2413_v51  ;;  %v2225_v14 = vpop.xlane.xlu1 %2224 }
 0x5fc   : > { %5621 = vpow2.f32 %v2403_v8  ;;  %v2322_v39 = vsub.f32 %v7311_v17, %v7506_v58 }
 0x5fd   : > { %v7509_v34 = vpop.eup %5597  ;;  %5623 = vpow2.f32 %v2405_v46 }
 0x5fe   : > { %v7511_v44 = vpop.eup %5599  ;;  %v2401_v46 = vmul.f32 1.442695, %v2322_v39 }
 0x5ff   : > { %v2228_v19 = vpop.xlane.xlu0 %2227  ;;  %v7515_v11 = vpop.eup %5601  ;;  %v2544_v42 = vadd.f32 %v7511_v44, %v7509_v34 }
 0x600   : > { %v2317_v4 = vsub.f32 %v7301_v0, %v2228_v19  ;;  %v2318_v24 = vsub.f32 %v7303_v63, %v2228_v19  ;;  %v7521_v32 = vpop.eup %5603  ;;  %v2407_v0 = vmul.f32 1.442695, %v2325_v12  ;;  %v2409_v63 = vmul.f32 1.442695, %v2326_v20 }
 0x601   : > { %2545 = vadd.xlane.f32.xlu1 %v2544_v42  ;;  %v7524_v5 = vpop.eup %5605  ;;  %v2541_v41 = vadd.f32 %v7521_v32, %v7515_v11  ;;  %v2320_v19 = vsub.f32 %v7307_v62, %v2231_v16 }
 0x602   : > { %v2391_v35 = vmul.f32 1.442695, %v2317_v4  ;;  %v2393_v10 = vmul.f32 1.442695, %v2318_v24  ;;  %v7529_v33 = vpop.eup %5607  ;;  %v9452_v4 = vld [vmem:[#allocation30_spill] sm:$0xff]  ;;  %v2219_v24 = vpop.xlane.xlu1 %2218 }
 0x603   : > { %v2222_v55 = vpop.xlane.xlu0 %2221  ;;  %v2538_v18 = vadd.f32 %v7529_v33, %v7524_v5  ;;  %v2315_v20 = vsub.f32 %v9452_v4, %v2225_v14  ;;  %v9458_v4 = vld [vmem:[#allocation29_spill] sm:$0xff] }
 0x604   : > { %v2313_v49 = vsub.f32 %v7293_v60, %v2222_v55  ;;  %v2314_v48 = vsub.f32 %v7295_v50, %v2222_v55  ;;  %5625 = vpow2.f32 %v2391_v35  ;;  %v2321_v60 = vsub.f32 %v7309_v45, %v7506_v58  ;;  %v7535_v50 = vpop.eup %5609  ;;  %v9453_v35 = vld [vmem:[#allocation42_spill] sm:$0xff] }
 0x605   : > { %5627 = vpow2.f32 %v2393_v10  ;;  %2542 = vadd.xlane.f32.xlu1 %v2541_v41  ;;  %v7541_v52 = vpop.eup %5611  ;;  %v2316_v10 = vsub.f32 %v9453_v35, %v2225_v14 }
 0x606   : > { %v2383_v43 = vmul.f32 1.442695, %v2313_v49  ;;  %v2385_v28 = vmul.f32 1.442695, %v2314_v48  ;;  %5629 = vpow2.f32 %v2407_v0  ;;  %v7544_v45 = vpop.eup %5613  ;;  %v2535_v17 = vadd.f32 %v7541_v52, %v7535_v50 }
 0x607   : > { %v2216_v61 = vpop.xlane.xlu0 %2215  ;;  %5631 = vpow2.f32 %v2409_v63  ;;  %v7549_v58 = vpop.eup %5615  ;;  %v2387_v63 = vmul.f32 1.442695, %v2315_v20  ;;  %v2389_v41 = vmul.f32 1.442695, %v2316_v10 }
 0x608   : > { %v2309_v38 = vsub.f32 %v7285_v2, %v2216_v61  ;;  %v2310_v15 = vsub.f32 %v7287_v29, %v2216_v61  ;;  %5633 = vpow2.f32 %v2383_v43  ;;  %v2319_v2 = vsub.f32 %v7305_v3, %v2231_v16  ;;  %v7551_v12 = vpop.eup %5617  ;;  %v9454_v43 = vld [vmem:[#allocation32_spill] sm:$0xff] }
 0x609   : > { %5635 = vpow2.f32 %v2385_v28  ;;  %2539 = vadd.xlane.f32.xlu1 %v2538_v18  ;;  %v2399_v29 = vmul.f32 1.442695, %v2321_v60  ;;  %v7554_v3 = vpop.eup %5619  ;;  %v2397_v16 = vmul.f32 1.442695, %v2320_v19  ;;  %v2532_v55 = vadd.f32 %v7549_v58, %v7544_v45  ;;  %v9455_v60 = vld [vmem:[#allocation43_spill] sm:$0xff] }
 0x60a   : > { %v2375_v51 = vmul.f32 1.442695, %v2309_v38  ;;  %v2377_v8 = vmul.f32 1.442695, %v2310_v15  ;;  %v2395_v42 = vmul.f32 1.442695, %v2319_v2  ;;  %v7557_v62 = vpop.eup %5621  ;;  %v2311_v28 = vsub.f32 %v9454_v43, %v2219_v24  ;;  %v2213_v15 = vpop.xlane.xlu1 %2212 }
 0x60b   : > { %v7561_v0 = vpop.eup %5623  ;;  %v2312_v38 = vsub.f32 %v9455_v60, %v2219_v24  ;;  %v2529_v14 = vadd.f32 %v7554_v3, %v7551_v12  ;;  %v2308_v20 = vsub.f32 %v9458_v4, %v2213_v15 }
 0x60c   : > { %5637 = vpow2.f32 %v2375_v51  ;;  %v2379_v2 = vmul.f32 1.442695, %v2311_v28 }
 0x60d   : > { %5639 = vpow2.f32 %v2377_v8  ;;  %2536 = vadd.xlane.f32.xlu1 %v2535_v17  ;;  %v2381_v17 = vmul.f32 1.442695, %v2312_v38 }
 0x60e   : > { %5641 = vpow2.f32 %v2399_v29  ;;  %v9456_v29 = vld [vmem:[#allocation31_spill] sm:$0xff] }
 0x60f   : > { %5643 = vpow2.f32 %v2401_v46  ;;  %v2307_v19 = vsub.f32 %v9456_v29, %v2213_v15 }
 0x610   : > { %5645 = vpow2.f32 %v2395_v42 }
 0x611   : > { %v7563_v49 = vpop.eup %5625  ;;  %2533 = vadd.xlane.f32.xlu1 %v2532_v55  ;;  %5647 = vpow2.f32 %v2397_v16  ;;  %v2371_v16 = vmul.f32 1.442695, %v2307_v19 }
 0x612   : > { %v7565_v48 = vpop.eup %5627  ;;  %5649 = vpow2.f32 %v2387_v63  ;;  %v2373_v63 = vmul.f32 1.442695, %v2308_v20 }
 0x613   : > { %v7568_v61 = vpop.eup %5629  ;;  %v2514_v39 = vadd.f32 %v7565_v48, %v7563_v49  ;;  %5651 = vpow2.f32 %v2389_v41  ;;  %v2523_v41 = vadd.f32 %v7561_v0, %v7557_v62 }
 0x614   : > { %v7575_v18 = vpop.eup %5631  ;;  %5653 = vpow2.f32 %v2379_v2 }
 0x615   : > { %v7577_v51 = vpop.eup %5633  ;;  %2530 = vadd.xlane.f32.xlu1 %v2529_v14  ;;  %2515 = vadd.xlane.f32.xlu0 %v2514_v39  ;;  %v2526_v24 = vadd.f32 %v7575_v18, %v7568_v61  ;;  %5655 = vpow2.f32 %v2381_v17 }
 0x616   : > { %v7579_v8 = vpop.eup %5635  ;;  %5657 = vpow2.f32 %v2371_v16 }
 0x617   : > { %v2508_v42 = vadd.f32 %v7579_v8, %v7577_v51  ;;  %5659 = vpow2.f32 %v2373_v63 }
 0x619   : > { %v7582_v46 = vpop.eup %5637  ;;  %2527 = vadd.xlane.f32.xlu1 %v2526_v24  ;;  %2509 = vadd.xlane.f32.xlu0 %v2508_v42 }
 0x61a   : > { %9457 = vst [vmem:[#allocation47_spill] sm:$0xff] %v7582_v46  ;;  %v7589_v35 = vpop.eup %5639 }
 0x61b   : > { %9459 = vst [vmem:[#allocation46_spill] sm:$0xff] %v7589_v35  ;;  %v2502_v10 = vadd.f32 %v7589_v35, %v7582_v46  ;;  %v7593_v55 = vpop.eup %5641 }
 0x61c   : > { %v7597_v43 = vpop.eup %5643 }
 0x61d   : > { %2524 = vadd.xlane.f32.xlu1 %v2523_v41  ;;  %2503 = vadd.xlane.f32.xlu0 %v2502_v10  ;;  %v7599_v28 = vpop.eup %5645  ;;  %v2520_v60 = vadd.f32 %v7597_v43, %v7593_v55  ;;  %v9460_v41 = vld [vmem:[#allocation48_spill] sm:$0xff] }
 0x61e   : > { %v7603_v38 = vpop.eup %5647 }
 0x61f   : > { %v7605_v15 = vpop.eup %5649  ;;  %v2517_v39 = vadd.f32 %v7603_v38, %v7599_v28 }
 0x620   : > { %v7607_v14 = vpop.eup %5651 }
 0x621   : > { %2521 = vadd.xlane.f32.xlu1 %v2520_v60  ;;  %v7613_v17 = vpop.eup %5653  ;;  %v2511_v4 = vadd.f32 %v7607_v14, %v7605_v15 }
 0x622   : > { %v7617_v20 = vpop.eup %5655 }
 0x625   : > { %2518 = vadd.xlane.f32.xlu1 %v2517_v39 }
 0x627   : > { %v2303_v2 = vpop.xlane.xlu1 %2302 }
 0x628   : > { %v2367_v29 = vsub.f32 %v7433_v13, %v2303_v2  ;;  %v2368_v19 = vsub.f32 %v7435_v30, %v2303_v2  ;;  %v7622_v30 = vpop.eup %5657  ;;  %v2505_v2 = vadd.f32 %v7617_v20, %v7613_v17 }
 0x629   : > { %2512 = vadd.xlane.f32.xlu1 %v2511_v4 }
 0x62a   : > { %v2491_v24 = vmul.f32 1.442695, %v2367_v29  ;;  %v2493_v42 = vmul.f32 1.442695, %v2368_v19  ;;  %v7627_v29 = vpop.eup %5659 }
 0x62b   : > { %v2297_v10 = vpop.xlane.xlu1 %2296  ;;  %v2306_v16 = vpop.xlane.xlu0 %2305 }
 0x62c   : > { %5661 = vpow2.f32 %v2491_v24  ;;  %v2363_v63 = vsub.f32 %v7425_v7, %v2297_v10  ;;  %v2364_v60 = vsub.f32 %v9460_v41, %v2297_v10  ;;  %v2369_v13 = vsub.f32 %v7439_v31, %v2306_v16 }
 0x62d   : > { %5663 = vpow2.f32 %v2493_v42  ;;  %v2370_v39 = vsub.f32 %v7441_v9, %v2306_v16  ;;  %2506 = vadd.xlane.f32.xlu1 %v2505_v2  ;;  %v2499_v16 = vadd.f32 %v7627_v29, %v7622_v30 }
 0x62e   : > { %v2483_v19 = vmul.f32 1.442695, %v2363_v63  ;;  %v2485_v4 = vmul.f32 1.442695, %v2364_v60  ;;  %v2495_v46 = vmul.f32 1.442695, %v2369_v13 }
 0x62f   : > { %v2497_v24 = vmul.f32 1.442695, %v2370_v39  ;;  %v2291_v7 = vpop.xlane.xlu1 %2290  ;;  %v2300_v35 = vpop.xlane.xlu0 %2299 }
 0x630   : > { %5665 = vpow2.f32 %v2483_v19  ;;  %v2359_v31 = vsub.f32 %v7417_v47, %v2291_v7  ;;  %v2360_v10 = vsub.f32 %v7419_v1, %v2291_v7  ;;  %v2365_v42 = vsub.f32 %v7429_v40, %v2300_v35 }
 0x631   : > { %5667 = vpow2.f32 %v2485_v4  ;;  %v2366_v9 = vsub.f32 %v7431_v37, %v2300_v35  ;;  %2500 = vadd.xlane.f32.xlu1 %v2499_v16 }
 0x632   : > { %5669 = vpow2.f32 %v2495_v46  ;;  %v2475_v63 = vmul.f32 1.442695, %v2359_v31  ;;  %v2477_v41 = vmul.f32 1.442695, %v2360_v10  ;;  %v2487_v60 = vmul.f32 1.442695, %v2365_v42 }
 0x633   : > { %5671 = vpow2.f32 %v2497_v24  ;;  %v2489_v13 = vmul.f32 1.442695, %v2366_v9  ;;  %v2294_v39 = vpop.xlane.xlu0 %2293 }
 0x634   : > { %5673 = vpow2.f32 %v2475_v63  ;;  %v2361_v47 = vsub.f32 %v7421_v21, %v2294_v39  ;;  %v2362_v1 = vsub.f32 %v7423_v27, %v2294_v39 }
 0x635   : > { %5675 = vpow2.f32 %v2477_v41 }
 0x636   : > { %5677 = vpow2.f32 %v2487_v60  ;;  %v2479_v40 = vmul.f32 1.442695, %v2361_v47  ;;  %v2481_v37 = vmul.f32 1.442695, %v2362_v1 }
 0x637   : > { %5679 = vpow2.f32 %v2489_v13  ;;  %v2288_v35 = vpop.xlane.xlu0 %2287 }
 0x638   : > { %5681 = vpow2.f32 %v2479_v40  ;;  %v2357_v46 = vsub.f32 %v7413_v26, %v2288_v35  ;;  %v2358_v2 = vsub.f32 %v7415_v22, %v2288_v35 }
 0x639   : > { %v7639_v19 = vpop.eup %5661  ;;  %5683 = vpow2.f32 %v2481_v37 }
 0x63a   : > { %v7641_v4 = vpop.eup %5663  ;;  %v2471_v24 = vmul.f32 1.442695, %v2357_v46  ;;  %v2473_v21 = vmul.f32 1.442695, %v2358_v2 }
 0x63b   : > { %v2285_v7 = vpop.xlane.xlu0 %2284  ;;  %v2589_v27 = vadd.f32 %v7641_v4, %v7639_v19 }
 0x63c   : > { %5685 = vpow2.f32 %v2471_v24  ;;  %v2355_v31 = vsub.f32 %v7409_v54, %v2285_v7  ;;  %v2356_v10 = vsub.f32 %v7411_v59, %v2285_v7 }
 0x63d   : > { %v7647_v42 = vpop.eup %5665  ;;  %5687 = vpow2.f32 %v2473_v21  ;;  %2590 = vadd.xlane.f32.xlu1 %v2589_v27 }
 0x63e   : > { %v7649_v26 = vpop.eup %5667  ;;  %v2467_v22 = vmul.f32 1.442695, %v2355_v31  ;;  %v2469_v9 = vmul.f32 1.442695, %v2356_v10 }
 0x63f   : > { %v7651_v16 = vpop.eup %5669  ;;  %v2282_v63 = vpop.xlane.xlu0 %2281  ;;  %v2583_v41 = vadd.f32 %v7649_v26, %v7647_v42 }
 0x640   : > { %v7655_v60 = vpop.eup %5671  ;;  %5689 = vpow2.f32 %v2467_v22  ;;  %v2353_v54 = vsub.f32 %v7405_v6, %v2282_v63  ;;  %v2354_v59 = vsub.f32 %v7407_v53, %v2282_v63 }
 0x641   : > { %v7659_v13 = vpop.eup %5673  ;;  %5691 = vpow2.f32 %v2469_v9  ;;  %2584 = vadd.xlane.f32.xlu1 %v2583_v41  ;;  %v2592_v39 = vadd.f32 %v7655_v60, %v7651_v16 }
 0x642   : > { %v7663_v47 = vpop.eup %5675  ;;  %v2463_v1 = vmul.f32 1.442695, %v2353_v54  ;;  %v2465_v40 = vmul.f32 1.442695, %v2354_v59 }
 0x643   : > { %v7665_v37 = vpop.eup %5677  ;;  %2593 = vadd.xlane.f32.xlu0 %v2592_v39  ;;  %v2279_v35 = vpop.xlane.xlu0 %2278  ;;  %v2577_v6 = vadd.f32 %v7663_v47, %v7659_v13 }
 0x644   : > { %v7669_v46 = vpop.eup %5679  ;;  %5693 = vpow2.f32 %v2463_v1  ;;  %v2351_v53 = vsub.f32 %v7399_v23, %v2279_v35  ;;  %v2352_v2 = vsub.f32 %v7401_v25, %v2279_v35 }
 0x645   : > { %v7673_v24 = vpop.eup %5681  ;;  %5695 = vpow2.f32 %v2465_v40  ;;  %2578 = vadd.xlane.f32.xlu1 %v2577_v6  ;;  %v2586_v21 = vadd.f32 %v7669_v46, %v7665_v37  ;;  %v9461_v40 = vld [vmem:[#allocation66_spill] sm:$0xff] }
 0x646   : > { %v7677_v7 = vpop.eup %5683  ;;  %v2459_v27 = vmul.f32 1.442695, %v2351_v53  ;;  %v2461_v31 = vmul.f32 1.442695, %v2352_v2 }
 0x647   : > { %2587 = vadd.xlane.f32.xlu0 %v2586_v21  ;;  %v2276_v10 = vpop.xlane.xlu0 %2275  ;;  %v2580_v22 = vadd.f32 %v7677_v7, %v7673_v24 }
 0x648   : > { %5697 = vpow2.f32 %v2459_v27  ;;  %v2349_v23 = vsub.f32 %v7391_v36, %v2276_v10  ;;  %v2350_v25 = vsub.f32 %v7393_v56, %v2276_v10  ;;  %v9462_v27 = vld [vmem:[#allocation33_spill] sm:$0xff] }
 0x649   : > { %v7683_v9 = vpop.eup %5685  ;;  %5699 = vpow2.f32 %v2461_v31  ;;  %v9463_v10 = vld [vmem:[#allocation49_spill] sm:$0xff] }
 0x64a   : > { %v7685_v63 = vpop.eup %5687  ;;  %v2455_v41 = vmul.f32 1.442695, %v2349_v23  ;;  %v2457_v54 = vmul.f32 1.442695, %v2350_v25 }
 0x64b   : > { %2581 = vadd.xlane.f32.xlu0 %v2580_v22  ;;  %v2273_v59 = vpop.xlane.xlu0 %2272  ;;  %v2574_v39 = vadd.f32 %v7685_v63, %v7683_v9 }
 0x64c   : > { %5701 = vpow2.f32 %v2455_v41  ;;  %v2347_v1 = vsub.f32 %v7383_v57, %v2273_v59  ;;  %v2348_v35 = vsub.f32 %v9461_v40, %v2273_v59  ;;  %v9466_v40 = vld [vmem:[#allocation45_spill] sm:$0xff] }
 0x64d   : > { %v7691_v36 = vpop.eup %5689  ;;  %5703 = vpow2.f32 %v2457_v54 }
 0x64e   : > { %v7693_v56 = vpop.eup %5691  ;;  %v2451_v6 = vmul.f32 1.442695, %v2347_v1  ;;  %v2453_v53 = vmul.f32 1.442695, %v2348_v35 }
 0x64f   : > { %2575 = vadd.xlane.f32.xlu0 %v2574_v39  ;;  %v2270_v2 = vpop.xlane.xlu0 %2269  ;;  %v2571_v21 = vadd.f32 %v7693_v56, %v7691_v36  ;;  %v9465_v39 = vld [vmem:[#allocation38_spill] sm:$0xff] }
 0x650   : > { %5705 = vpow2.f32 %v2451_v6  ;;  %v2345_v31 = vsub.f32 %v9462_v27, %v2270_v2  ;;  %v2346_v22 = vsub.f32 %v9463_v10, %v2270_v2  ;;  %v9469_v10 = vld [vmem:[#allocation41_spill] sm:$0xff] }
 0x651   : > { %v7699_v57 = vpop.eup %5693  ;;  %5707 = vpow2.f32 %v2453_v53  ;;  %2572 = vadd.xlane.f32.xlu1 %v2571_v21 }
 0x652   : > { %9464 = vst [vmem:[#allocation34_spill] sm:$0xff] %v7699_v57  ;;  %v7701_v23 = vpop.eup %5695  ;;  %v2447_v25 = vmul.f32 1.442695, %v2345_v31  ;;  %v2449_v41 = vmul.f32 1.442695, %v2346_v22 }
 0x653   : > { %v2267_v54 = vpop.xlane.xlu0 %2266  ;;  %v2568_v59 = vadd.f32 %v7701_v23, %v7699_v57 }
 0x654   : > { %5709 = vpow2.f32 %v2447_v25  ;;  %v2343_v1 = vsub.f32 %v9465_v39, %v2267_v54  ;;  %v2344_v35 = vsub.f32 %v9466_v40, %v2267_v54  ;;  %v9470_v25 = vld [vmem:[#allocation35_spill] sm:$0xff] }
 0x655   : > { %v7707_v6 = vpop.eup %5697  ;;  %5711 = vpow2.f32 %v2449_v41  ;;  %2569 = vadd.xlane.f32.xlu0 %v2568_v59 }
 0x656   : > { %9467 = vst [vmem:[#allocation36_spill] sm:$0xff] %v7707_v6  ;;  %v7709_v2 = vpop.eup %5699  ;;  %v2443_v53 = vmul.f32 1.442695, %v2343_v1  ;;  %v2445_v21 = vmul.f32 1.442695, %v2344_v35  ;;  %v9471_v35 = vld [vmem:[#allocation44_spill] sm:$0xff] }
 0x657   : > { %9468 = vst [vmem:[#allocation37_spill] sm:$0xff] %v7709_v2  ;;  %v2264_v27 = vpop.xlane.xlu0 %2263  ;;  %v2565_v31 = vadd.f32 %v7709_v2, %v7707_v6 }
 0x658   : > { %5713 = vpow2.f32 %v2443_v53  ;;  %v2341_v22 = vsub.f32 %v9469_v10, %v2264_v27  ;;  %v2342_v57 = vsub.f32 %v9470_v25, %v2264_v27  ;;  %v9472_v53 = vld [vmem:[#allocation39_spill] sm:$0xff] }
 0x659   : > { %v7715_v39 = vpop.eup %5701  ;;  %5715 = vpow2.f32 %v2445_v21  ;;  %2566 = vadd.xlane.f32.xlu1 %v2565_v31 }
 0x65a   : > { %v7717_v54 = vpop.eup %5703  ;;  %v2439_v41 = vmul.f32 1.442695, %v2341_v22  ;;  %v2441_v59 = vmul.f32 1.442695, %v2342_v57 }
 0x65b   : > { %v2261_v40 = vpop.xlane.xlu0 %2260  ;;  %v2562_v1 = vadd.f32 %v7717_v54, %v7715_v39 }
 0x65c   : > { %5717 = vpow2.f32 %v2439_v41  ;;  %v2339_v6 = vsub.f32 %v9471_v35, %v2261_v40  ;;  %v2340_v2 = vsub.f32 %v9472_v53, %v2261_v40 }
 0x65d   : > { %v7723_v10 = vpop.eup %5705  ;;  %5719 = vpow2.f32 %v2441_v59  ;;  %2563 = vadd.xlane.f32.xlu0 %v2562_v1 }
 0x65e   : > { %v7725_v27 = vpop.eup %5707  ;;  %v2435_v21 = vmul.f32 1.442695, %v2339_v6  ;;  %v2437_v31 = vmul.f32 1.442695, %v2340_v2 }
 0x65f   : > { %v2559_v57 = vadd.f32 %v7725_v27, %v7723_v10 }
 0x660   : > { %5721 = vpow2.f32 %v2435_v21 }
 0x661   : > { %v7729_v22 = vpop.eup %5709  ;;  %5723 = vpow2.f32 %v2437_v31  ;;  %2560 = vadd.xlane.f32.xlu1 %v2559_v57  ;;  %v278_v57 = vld [vmem:[%s9175_s1 + $0x140] sm:$0xff] }
 0x662   : > { %9473 = vst [vmem:[#allocation40_spill] sm:$0xff] %v7729_v22  ;;  %v7731_v25 = vpop.eup %5711  ;;  %5207 = vmatmul.mubr.msk.f32.gmra.mxu0 %vm288_vm5, %v278_v57  ;;  %v281_v57 = vld [vmem:[%s9175_s1 + $0x158] sm:$0xff] }
 0x663   : > { %9474 = vst [vmem:[#allocation30_spill] sm:$0xff] %v7731_v25  ;;  %v2556_v41 = vadd.f32 %v7731_v25, %v7729_v22 }
 0x665   : > { %v7735_v40 = vpop.eup %5713  ;;  %2557 = vadd.xlane.f32.xlu0 %v2556_v41  ;;  %v9481_v41 = vmov 0.0  }
 0x666   : > { %9475 = vst [vmem:[#allocation42_spill] sm:$0xff] %v7735_v40  ;;  %v7737_v59 = vpop.eup %5715  ;;  %747 = vmatprep.mubr.f32.mxu0 %v9481_v41 }
 0x667   : > { %9476 = vst [vmem:[#allocation32_spill] sm:$0xff] %v7737_v59  ;;  %v2553_v6 = vadd.f32 %v7737_v59, %v7735_v40 }
 0x669   : > { %v7741_v2 = vpop.eup %5717  ;;  %2554 = vadd.xlane.f32.xlu1 %v2553_v6  ;;  %v279_v6 = vld [vmem:[%s9175_s1 + $0x148] sm:$0xff] }
 0x66a   : > { %9477 = vst [vmem:[#allocation43_spill] sm:$0xff] %v7741_v2  ;;  %v7743_v1 = vpop.eup %5719  ;;  %5208 = vmatmul.mubr.msk.f32.gmra.mxu0 %vm288_vm5, %v279_v6  ;;  %v282_v6 = vld [vmem:[%s9175_s1 + $0x160] sm:$0xff] }
 0x66b   : > { %9478 = vst [vmem:[#allocation31_spill] sm:$0xff] %v7743_v1  ;;  %v2550_v35 = vadd.f32 %v7743_v1, %v7741_v2  ;;  %753 = vmatprep.mubr.f32.mxu0 %v9481_v41 }
 0x66d   : > { %v7747_v53 = vpop.eup %5721  ;;  %2551 = vadd.xlane.f32.xlu0 %v2550_v35  ;;  %v7764_v35 = vld [vmem:[%s9176_s2] sm:$0xf] }
 0x66e   : > { %9479 = vst [vmem:[#allocation29_spill] sm:$0xff] %v7747_v53  ;;  %v7749_v21 = vpop.eup %5723  ;;  %9482 = vst [vmem:[#allocation66_spill] sm:$0xff] %v7764_v35 }
 0x66f   : > { %9480 = vst [vmem:[#allocation48_spill] sm:$0xff] %v7749_v21  ;;  %v2547_v31 = vadd.f32 %v7749_v21, %v7747_v53 }
 0x671   : > { %2548 = vadd.xlane.f32.xlu1 %v2547_v31  ;;  %v280_v31 = vld [vmem:[%s9175_s1 + $0x150] sm:$0xff] }
 0x672   : > { %5209 = vmatmul.mubr.msk.f32.gmra.mxu0 %vm288_vm5, %v280_v31  ;;  %v283_v31 = vld [vmem:[%s9175_s1 + $0x168] sm:$0xff] }
 0x673   : > { %759 = vmatprep.mubr.f32.mxu0 %v9481_v41 }
 0x676   : > { %5210 = vmatmul.mubr.msk.f32.gmra.mxu0 %vm288_vm5, %v281_v57  ;;  %v284_v57 = vld [vmem:[%s9175_s1 + $0x170] sm:$0xff] }
 0x677   : > { %765 = vmatprep.mubr.f32.mxu0 %v9481_v41 }
 0x67a   : > { %5211 = vmatmul.mubr.msk.f32.gmra.mxu0 %vm288_vm5, %v282_v6  ;;  %v285_v6 = vld [vmem:[%s9175_s1 + $0x178] sm:$0xff] }
 0x67b   : > { %771 = vmatprep.mubr.f32.mxu0 %v9481_v41 }
 0x67e   : > { %5212 = vmatmul.mubr.msk.f32.gmra.mxu0 %vm288_vm5, %v283_v31 }
 0x67f   : > { %777 = vmatprep.mubr.f32.mxu0 %v9481_v41 }
 0x682   : > { %5213 = vmatmul.mubr.msk.f32.gmra.mxu0 %vm288_vm5, %v284_v57 }
 0x683   : > { %2781 = vrot.lane.b32.xlu0 %v7764_v35, %s6238_s7  ;;  %783 = vmatprep.mubr.f32.mxu0 %v9481_v41  ;;  %v9484_v41 = vld [vmem:[#allocation14_spill] sm:$0xff] }
 0x686   : > { %5214 = vmatmul.mubr.msk.f32.gmra.mxu0 %vm288_vm5, %v285_v6 }
 0x68a   : > { %v2546_v35 = vpop.xlane.xlu1 %2545 }
 0x68b   : > { %5725 = vrcp.f32 %v2546_v35  ;;  %v7794_v35 = vpop.f32.mrf.mxu0 }
 0x68c   : > { %9483 = vst [vmem:[#allocation33_spill] sm:$0xff] %v7794_v35  ;;  %v2930_v35 = vmul.f32 0.17677669, %v9484_v41 }
 0x68d   : > { %v721_v2 = vpop.f32.mrf.mxu0 }
 0x68e   : > { %v2543_v53 = vpop.xlane.xlu1 %2542  ;;  %2755 = vmatprep.mubr.f32.mxu0 %v721_v2 }
 0x68f   : > { %5727 = vrcp.f32 %v2543_v53 }
 0x692   : > { %v2540_v21 = vpop.xlane.xlu1 %2539 }
 0x693   : > { %5729 = vrcp.f32 %v2540_v21 }
 0x696   : > { %v2537_v31 = vpop.xlane.xlu1 %2536 }
 0x697   : > { %5731 = vrcp.f32 %v2537_v31 }
 0x698   : > { %v5726_v53 = vpop.eup %5725 }
 0x699   : > { %v2658_v1 = vmul.f32 %v5726_v53, %v7511_v44  ;;  %v2657_v40 = vmul.f32 %v5726_v53, %v7509_v34  ;;  %v9485_v44 = vld [vmem:[#allocation13_spill] sm:$0xff]  ;;  %v9486_v34 = vld [vmem:[#allocation16_spill] sm:$0xff] }
 0x69a   : > { %v2534_v21 = vpop.xlane.xlu1 %2533  ;;  %v2929_v25 = vmul.f32 0.17677669, %v9485_v44  ;;  %v2932_v2 = vmul.f32 0.17677669, %v9486_v34 }
 0x69b   : > { %5733 = vrcp.f32 %v2534_v21  ;;  %2691 = vmatprep.subr.mxu0 %v2658_v1 }
 0x69c   : > { %v5728_v57 = vpop.eup %5727  ;;  %2692 = vmatpush1.xpose.msra.mxu0 %v2657_v40 }
 0x69d   : > { %v2656_v59 = vmul.f32 %v5728_v57, %v7521_v32  ;;  %v2655_v22 = vmul.f32 %v5728_v57, %v7515_v11  ;;  %v9487_v32 = vld [vmem:[#allocation15_spill] sm:$0xff] }
 0x69e   : > { %v2531_v6 = vpop.xlane.xlu1 %2530  ;;  %v2931_v41 = vmul.f32 0.17677669, %v9487_v32 }
 0x69f   : > { %5735 = vrcp.f32 %v2531_v6  ;;  %2693 = vmatprep.subr.mxu0 %v2656_v59  ;;  %v9488_v59 = vld [vmem:[#allocation18_spill] sm:$0xff]  ;;  %v9490_v6 = vld [vmem:[#allocation20_spill] sm:$0xff] }
 0x6a0   : > { %v5730_v31 = vpop.eup %5729  ;;  %2694 = vmatpush1.xpose.msra.mxu0 %v2655_v22 }
 0x6a1   : > { %2969 = vxpose.xlu0.b32.start [1/4] (short) %v2930_v35, 128  ;;  %v2654_v1 = vmul.f32 %v5730_v31, %v7529_v33  ;;  %v2653_v40 = vmul.f32 %v5730_v31, %v7524_v5  ;;  %v2934_v35 = vmul.f32 0.17677669, %v9488_v59  ;;  %v9489_v33 = vld [vmem:[#allocation17_spill] sm:$0xff]  ;;  %v2936_v31 = vmul.f32 0.17677669, %v9490_v6 }
 0x6a2   : > { %v2528_v53 = vpop.xlane.xlu1 %2527 }
 0x6a3   : > { %5737 = vrcp.f32 %v2528_v53  ;;  %2695 = vmatprep.subr.mxu0 %v2654_v1  ;;  %v9491_v1 = vld [vmem:[#allocation19_spill] sm:$0xff] }
 0x6a4   : > { %2937 = vxpose.xlu1.b32.start [1/4] (short) %v2929_v25, 128  ;;  %v5732_v11 = vpop.eup %5731  ;;  %2696 = vmatpush1.xpose.msra.mxu0 %v2653_v40  ;;  %v2933_v25 = vmul.f32 0.17677669, %v9489_v33  ;;  %v2935_v40 = vmul.f32 0.17677669, %v9491_v1 }
 0x6a5   : > { %2970 = vxpose.xlu0.b32.cont [2/4] (short) %v2932_v2, 128  ;;  %v2652_v21 = vmul.f32 %v5732_v11, %v7541_v52  ;;  %v2651_v22 = vmul.f32 %v5732_v11, %v7535_v50  ;;  %v2516_v52 = vpop.xlane.xlu0 %2515 }
 0x6a6   : > { %v2525_v57 = vpop.xlane.xlu1 %2524 }
 0x6a7   : > { %5739 = vrcp.f32 %v2525_v57  ;;  %2697 = vmatprep.subr.mxu0 %v2652_v21 }
 0x6a8   : > { %2938 = vxpose.xlu1.b32.cont [2/4] (short) %v2931_v41, 128  ;;  %v5734_v5 = vpop.eup %5733  ;;  %2698 = vmatpush1.xpose.msra.mxu0 %v2651_v22 }
 0x6a9   : > { %2971 = vxpose.xlu0.b32.cont [3/4] (short) %v2934_v35, 128  ;;  %v2650_v44 = vmul.f32 %v5734_v5, %v7549_v58  ;;  %v2649_v34 = vmul.f32 %v5734_v5, %v7544_v45  ;;  %v2510_v21 = vpop.xlane.xlu0 %2509 }
 0x6aa   : > { %v2522_v2 = vpop.xlane.xlu1 %2521 }
 0x6ab   : > { %5741 = vrcp.f32 %v2522_v2  ;;  %2699 = vmatprep.subr.mxu0 %v2650_v44 }
 0x6ac   : > { %2939 = vxpose.xlu1.b32.cont [3/4] (short) %v2933_v25, 128  ;;  %v5736_v50 = vpop.eup %5735  ;;  %2700 = vmatpush1.xpose.msra.mxu0 %v2649_v34  ;;  %5743 = vrcp.f32 %v2516_v52 }
 0x6ad   : > { %2972 = vxpose.xlu0.b32.end [4/4] (short) %v2936_v31, 128  ;;  %v2648_v53 = vmul.f32 %v5736_v50, %v7554_v3  ;;  %v2647_v11 = vmul.f32 %v5736_v50, %v7551_v12  ;;  %v2504_v25 = vpop.xlane.xlu0 %2503 }
 0x6ae   : > { %v2519_v32 = vpop.xlane.xlu1 %2518 }
 0x6af   : > { %5745 = vrcp.f32 %v2519_v32  ;;  %2701 = vmatprep.subr.mxu0 %v2648_v53  ;;  %v9493_v32 = vld [vmem:[#allocation47_spill] sm:$0xff] }
 0x6b0   : > { %2940 = vxpose.xlu1.b32.end [4/4] (short) %v2935_v40, 128  ;;  %v5738_v45 = vpop.eup %5737  ;;  %2702 = vmatpush1.xpose.msra.mxu0 %v2647_v11 }
 0x6b1   : > { %v2646_v58 = vmul.f32 %v5738_v45, %v7575_v18  ;;  %v2645_v41 = vmul.f32 %v5738_v45, %v7568_v61 }
 0x6b2   : > { %v2513_v59 = vpop.xlane.xlu1 %2512 }
 0x6b3   : > { %5747 = vrcp.f32 %v2513_v59  ;;  %2703 = vmatprep.subr.mxu0 %v2646_v58 }
 0x6b4   : > { %v5740_v35 = vpop.eup %5739  ;;  %2704 = vmatpush1.xpose.msra.mxu0 %v2645_v41  ;;  %5749 = vrcp.f32 %v2510_v21 }
 0x6b5   : > { %v2644_v3 = vmul.f32 %v5740_v35, %v7561_v0  ;;  %v2643_v12 = vmul.f32 %v5740_v35, %v7557_v62 }
 0x6b6   : > { %v2507_v57 = vpop.xlane.xlu1 %2506 }
 0x6b7   : > { %2705 = vmatprep.subr.mxu0 %v2644_v3  ;;  %5751 = vrcp.f32 %v2507_v57 }
 0x6b8   : > { %v5742_v22 = vpop.eup %5741  ;;  %2706 = vmatpush1.xpose.msra.mxu0 %v2643_v12  ;;  %5753 = vrcp.f32 %v2504_v25 }
 0x6b9   : > { %v2642_v5 = vmul.f32 %v5742_v22, %v7597_v43  ;;  %v2641_v18 = vmul.f32 %v5742_v22, %v7593_v55  ;;  %v5744_v61 = vpop.eup %5743 }
 0x6ba   : > { %v2638_v62 = vmul.f32 %v5744_v61, %v7565_v48  ;;  %v2501_v44 = vpop.xlane.xlu1 %2500  ;;  %v2637_v55 = vmul.f32 %v5744_v61, %v7563_v49 }
 0x6bb   : > { %2707 = vmatprep.subr.mxu0 %v2642_v5  ;;  %5755 = vrcp.f32 %v2501_v44 }
 0x6bc   : > { %v5746_v33 = vpop.eup %5745  ;;  %2708 = vmatpush1.xpose.msra.mxu0 %v2641_v18 }
 0x6bd   : > { %v2640_v6 = vmul.f32 %v5746_v33, %v7603_v38  ;;  %v2639_v0 = vmul.f32 %v5746_v33, %v7599_v28 }
 0x6bf   : > { %2709 = vmatprep.subr.mxu0 %v2640_v6 }
 0x6c0   : > { %v5748_v31 = vpop.eup %5747  ;;  %2710 = vmatpush1.xpose.msra.mxu0 %v2639_v0 }
 0x6c1   : > { %2711 = vmatprep.subr.mxu0 %v2638_v62  ;;  %v2636_v43 = vmul.f32 %v5748_v31, %v7607_v14  ;;  %v5750_v34 = vpop.eup %5749  ;;  %v2635_v38 = vmul.f32 %v5748_v31, %v7605_v15  ;;  %v9492_v15 = vld [vmem:[#allocation46_spill] sm:$0xff] }
 0x6c2   : > { %v2634_v28 = vmul.f32 %v5750_v34, %v7579_v8  ;;  %v2633_v50 = vmul.f32 %v5750_v34, %v7577_v51  ;;  %v9494_v34 = vld [vmem:[#allocation34_spill] sm:$0xff] }
 0x6c4   : > { %2712 = vmatpush1.xpose.msra.mxu0 %v2637_v55  ;;  %v5752_v52 = vpop.eup %5751 }
 0x6c5   : > { %2713 = vmatprep.subr.mxu0 %v2636_v43  ;;  %v2632_v49 = vmul.f32 %v5752_v52, %v7617_v20  ;;  %v5754_v1 = vpop.eup %5753  ;;  %v2631_v40 = vmul.f32 %v5752_v52, %v7613_v17  ;;  %v9496_v52 = vld [vmem:[#allocation36_spill] sm:$0xff] }
 0x6c6   : > { %v2591_v2 = vpop.xlane.xlu1 %2590  ;;  %v2630_v53 = vmul.f32 %v5754_v1, %v9492_v15  ;;  %v2629_v45 = vmul.f32 %v5754_v1, %v9493_v32  ;;  %v9497_v15 = vld [vmem:[#allocation30_spill] sm:$0xff]  ;;  %v9499_v32 = vld [vmem:[#allocation32_spill] sm:$0xff] }
 0x6c7   : > { %5757 = vrcp.f32 %v2591_v2 }
 0x6c8   : > { %2714 = vmatpush1.xpose.msra.mxu0 %v2635_v38  ;;  %v5756_v8 = vpop.eup %5755 }
 0x6c9   : > { %2715 = vmatprep.subr.mxu0 %v2634_v28  ;;  %v2628_v51 = vmul.f32 %v5756_v8, %v7627_v29  ;;  %v2627_v20 = vmul.f32 %v5756_v8, %v7622_v30 }
 0x6ca   : > { %v2585_v11 = vpop.xlane.xlu1 %2584 }
 0x6cc   : > { %v2594_v48 = vpop.xlane.xlu0 %2593  ;;  %2716 = vmatpush1.xpose.msra.mxu0 %v2633_v50 }
 0x6cd   : > { %5759 = vrcp.f32 %v2594_v48  ;;  %2717 = vmatprep.subr.mxu0 %v2632_v49 }
 0x6ce   : > { %v2579_v59 = vpop.xlane.xlu1 %2578 }
 0x6d0   : > { %v2588_v14 = vpop.xlane.xlu0 %2587  ;;  %2718 = vmatpush1.xpose.msra.mxu0 %v2631_v40 }
 0x6d1   : > { %5761 = vrcp.f32 %v2588_v14  ;;  %2719 = vmatprep.subr.mxu0 %v2630_v53 }
 0x6d2   : > { %5763 = vrcp.f32 %v2585_v11 }
 0x6d4   : > { %v2582_v58 = vpop.xlane.xlu0 %2581  ;;  %2720 = vmatpush1.xpose.msra.mxu0 %v2629_v45  ;;  %v5758_v41 = vpop.eup %5757 }
 0x6d5   : > { %2721 = vmatprep.subr.mxu0 %v2628_v51  ;;  %5765 = vrcp.f32 %v2582_v58  ;;  %v2688_v3 = vmul.f32 %v5758_v41, %v7641_v4  ;;  %v2687_v22 = vmul.f32 %v5758_v41, %v7639_v19  ;;  %v9500_v58 = vld [vmem:[#allocation42_spill] sm:$0xff] }
 0x6d6   : > { %5767 = vrcp.f32 %v2579_v59  ;;  %v9502_v59 = vld [vmem:[#allocation43_spill] sm:$0xff] }
 0x6d8   : > { %2722 = vmatpush1.xpose.msra.mxu0 %v2627_v20  ;;  %v2576_v29 = vpop.xlane.xlu0 %2575  ;;  %v9501_v20 = vld [vmem:[#allocation31_spill] sm:$0xff] }
 0x6d9   : > { %5769 = vrcp.f32 %v2576_v29  ;;  %v9504_v29 = vld [vmem:[#allocation29_spill] sm:$0xff] }
 0x6da   : > { %v5760_v17 = vpop.eup %5759  ;;  %v2573_v5 = vpop.xlane.xlu1 %2572 }
 0x6db   : > { %v2690_v35 = vmul.f32 %v5760_v17, %v7655_v60  ;;  %v2689_v21 = vmul.f32 %v5760_v17, %v7651_v16  ;;  %5771 = vrcp.f32 %v2573_v5 }
 0x6dd   : > { %2723 = vmatprep.subr.mxu0 %v2690_v35 }
 0x6de   : > { %v5762_v12 = vpop.eup %5761  ;;  %2724 = vmatpush2.xpose.msra.mxu0 %v2689_v21  ;;  %v2570_v4 = vpop.xlane.xlu0 %2569  ;;  %v9503_v21 = vld [vmem:[#allocation48_spill] sm:$0xff] }
 0x6df   : > { %2725 = vmatprep.subr.mxu0 %v2688_v3  ;;  %v2686_v30 = vmul.f32 %v5762_v12, %v7669_v46  ;;  %v5764_v57 = vpop.eup %5763  ;;  %v2685_v60 = vmul.f32 %v5762_v12, %v7665_v37  ;;  %5773 = vrcp.f32 %v2570_v4 }
 0x6e0   : > { %v2684_v16 = vmul.f32 %v5764_v57, %v7649_v26  ;;  %v2683_v61 = vmul.f32 %v5764_v57, %v7647_v42  ;;  %v9505_v57 = vld [vmem:[#allocation33_spill] sm:$0xff] }
 0x6e2   : > { %2726 = vmatpush2.xpose.msra.mxu0 %v2687_v22  ;;  %v5766_v18 = vpop.eup %5765  ;;  %v2567_v46 = vpop.xlane.xlu1 %2566 }
 0x6e3   : > { %2727 = vmatprep.subr.mxu0 %v2686_v30  ;;  %v2682_v19 = vmul.f32 %v5766_v18, %v7677_v7  ;;  %v5768_v33 = vpop.eup %5767  ;;  %v2681_v25 = vmul.f32 %v5766_v18, %v7673_v24  ;;  %5775 = vrcp.f32 %v2567_v46 }
 0x6e4   : > { %v2680_v37 = vmul.f32 %v5768_v33, %v7663_v47  ;;  %v2679_v0 = vmul.f32 %v5768_v33, %v7659_v13 }
 0x6e6   : > { %2728 = vmatpush2.xpose.msra.mxu0 %v2685_v60  ;;  %v5770_v6 = vpop.eup %5769  ;;  %v2564_v26 = vpop.xlane.xlu0 %2563 }
 0x6e7   : > { %2729 = vmatprep.subr.mxu0 %v2684_v16  ;;  %5777 = vrcp.f32 %v2564_v26  ;;  %v2678_v42 = vmul.f32 %v5770_v6, %v7685_v63  ;;  %v2677_v31 = vmul.f32 %v5770_v6, %v7683_v9  ;;  %v9495_v9 = vld [vmem:[#allocation37_spill] sm:$0xff]  ;;  %v9506_v16 = vmov 0.0  }
 0x6e8   : > { %v5772_v62 = vpop.eup %5771 }
 0x6e9   : > { %v2676_v24 = vmul.f32 %v5772_v62, %v7693_v56  ;;  %v2675_v55 = vmul.f32 %v5772_v62, %v7691_v36 }
 0x6ea   : > { %2730 = vmatpush2.xpose.msra.mxu0 %v2683_v61  ;;  %v2561_v7 = vpop.xlane.xlu1 %2560 }
 0x6eb   : > { %2731 = vmatprep.subr.mxu0 %v2682_v19  ;;  %5779 = vrcp.f32 %v2561_v7 }
 0x6ec   : > { %v5774_v44 = vpop.eup %5773 }
 0x6ed   : > { %v2674_v13 = vmul.f32 %v5774_v44, %v7701_v23  ;;  %v2673_v38 = vmul.f32 %v5774_v44, %v9494_v34 }
 0x6ee   : > { %2732 = vmatpush2.xpose.msra.mxu0 %v2681_v25  ;;  %v2558_v47 = vpop.xlane.xlu0 %2557 }
 0x6ef   : > { %2733 = vmatprep.subr.mxu0 %v2680_v37  ;;  %5781 = vrcp.f32 %v2558_v47 }
 0x6f0   : > { %v5776_v43 = vpop.eup %5775 }
 0x6f1   : > { %v2672_v2 = vmul.f32 %v5776_v43, %v9495_v9  ;;  %v2671_v48 = vmul.f32 %v5776_v43, %v9496_v52  ;;  %v9521_v52 = vld [vmem:[#allocation12_spill] sm:$0xff] }
 0x6f2   : > { %2734 = vmatpush2.xpose.msra.mxu0 %v2679_v0  ;;  %v2555_v63 = vpop.xlane.xlu1 %2554 }
 0x6f3   : > { %2735 = vmatprep.subr.mxu0 %v2678_v42  ;;  %5783 = vrcp.f32 %v2555_v63 }
 0x6f4   : > { %v5778_v28 = vpop.eup %5777 }
 0x6f5   : > { %v2670_v36 = vmul.f32 %v5778_v28, %v7717_v54  ;;  %v2669_v49 = vmul.f32 %v5778_v28, %v7715_v39  ;;  %v9498_v54 = vld [vmem:[#allocation40_spill] sm:$0xff]  ;;  %v725_v39 = vpop.f32.mrf.mxu0 }
 0x6f6   : > { %2736 = vmatpush2.xpose.msra.mxu0 %v2677_v31  ;;  %v2552_v56 = vpop.xlane.xlu0 %2551 }
 0x6f7   : > { %2737 = vmatprep.subr.mxu0 %v2676_v24  ;;  %5785 = vrcp.f32 %v2552_v56 }
 0x6f8   : > { %v5780_v50 = vpop.eup %5779 }
 0x6f9   : > { %v2668_v1 = vmul.f32 %v5780_v50, %v7725_v27  ;;  %v2667_v40 = vmul.f32 %v5780_v50, %v7723_v10  ;;  %v727_v10 = vpop.f32.mrf.mxu0  ;;  %v9523_v50 = vld [vmem:[#allocation8_spill] sm:$0xff] }
 0x6fa   : > { %2738 = vmatpush2.xpose.msra.mxu0 %v2675_v55  ;;  %v2549_v23 = vpop.xlane.xlu1 %2548  ;;  %v2782_v56 = vpop.permute.xlu0 %2781 }
 0x6fb   : > { %2739 = vmatprep.subr.mxu0 %v2674_v13  ;;  %5787 = vrcp.f32 %v2549_v23  ;;  %v731_v12 = vpop.f32.mrf.mxu0  ;;  %v9524_v23 = vld [vmem:[#allocation11_spill] sm:$0xff] }
 0x6fc   : > { %v5782_v14 = vpop.eup %5781 }
 0x6fd   : > { %v2666_v53 = vmul.f32 %v5782_v14, %v9497_v15  ;;  %v2665_v11 = vmul.f32 %v5782_v14, %v9498_v54  ;;  %v733_v30 = vpop.f32.mrf.mxu0  ;;  %v9527_v14 = vld [vmem:[#allocation7_spill] sm:$0xff]  ;;  %v9531_v54 = vld [vmem:[#allocation56_spill] sm:$0xff] }
 0x6fe   : > { %2740 = vmatpush2.xpose.msra.mxu0 %v2673_v38 }
 0x6ff   : > { %2741 = vmatprep.subr.mxu0 %v2672_v2  ;;  %v737_v5 = vpop.f32.mrf.mxu0 }
 0x700   : > { %v5784_v8 = vpop.eup %5783 }
 0x701   : > { %v2664_v45 = vmul.f32 %v5784_v8, %v9499_v32  ;;  %v2663_v27 = vmul.f32 %v5784_v8, %v9500_v58  ;;  %v739_v60 = vpop.f32.mrf.mxu0  ;;  %v9530_v8 = vld [vmem:[#allocation66_spill] sm:$0xff]  ;;  %v9536_v58 = vld [vmem:[#allocation51_spill] sm:$0xff] }
 0x702   : > { %2742 = vmatpush2.xpose.msra.mxu0 %v2671_v48  ;;  %v9522_v48 = vld [vmem:[#allocation10_spill] sm:$0xff] }
 0x703   : > { %2743 = vmatprep.subr.mxu0 %v2670_v36  ;;  %v9533_v32 = vld [vmem:[#allocation54_spill] sm:$0xff] }
 0x704   : > { %v5786_v51 = vpop.eup %5785 }
 0x705   : > { %v2662_v41 = vmul.f32 %v5786_v51, %v9501_v20  ;;  %v2661_v35 = vmul.f32 %v5786_v51, %v9502_v59  ;;  %v9535_v51 = vld [vmem:[#allocation52_spill] sm:$0xff] }
 0x706   : > { %2744 = vmatpush2.xpose.msra.mxu0 %v2669_v49  ;;  %v9525_v49 = vld [vmem:[#allocation6_spill] sm:$0xff] }
 0x707   : > { %2745 = vmatprep.subr.mxu0 %v2668_v1  ;;  %v9526_v1 = vld [vmem:[#allocation9_spill] sm:$0xff] }
 0x708   : > { %v5788_v17 = vpop.eup %5787 }
 0x709   : > { %v2660_v3 = vmul.f32 %v5788_v17, %v9503_v21  ;;  %v2659_v22 = vmul.f32 %v5788_v17, %v9504_v29 }
 0x70a   : > { %2746 = vmatpush2.xpose.msra.mxu0 %v2667_v40  ;;  %v9528_v40 = vld [vmem:[#allocation5_spill] sm:$0xff] }
 0x70b   : > { %2747 = vmatprep.subr.mxu0 %v2666_v53  ;;  %v9529_v53 = vld [vmem:[#allocation57_spill] sm:$0xff] }
 0x70e   : > { %2748 = vmatpush2.xpose.msra.mxu0 %v2665_v11  ;;  %v9532_v11 = vld [vmem:[#allocation55_spill] sm:$0xff] }
 0x70f   : > { %2749 = vmatprep.subr.mxu0 %v2664_v45  ;;  %v9534_v45 = vld [vmem:[#allocation53_spill] sm:$0xff] }
 0x712   : > { %2750 = vmatpush2.xpose.msra.mxu0 %v2663_v27  ;;  %v9537_v27 = vld [vmem:[#allocation50_spill] sm:$0xff] }
 0x713   : > { %2751 = vmatprep.subr.mxu0 %v2662_v41 }
 0x716   : > { %2752 = vmatpush2.xpose.msra.mxu0 %v2661_v35 }
 0x717   : > { %2753 = vmatprep.subr.mxu0 %v2660_v3 }
 0x71a   : > { %2754 = vmatpush2.xpose.msra.mxu0 %v2659_v22 }
 0x71d   : > { %2756 = vmatmul.mubr.f32.vlgmr.msra.gmra.mxu0 %v9505_v57  ;;  %v2985_v35 = vpop.trf.xlu0 }
 0x71e   : > { %2761 = vmatprep.mubr.f32.mxu0 %v727_v10 }
 0x720   : > { %v2953_v43 = vpop.trf.xlu1 }
 0x721   : > { %2762 = vmatmul.mubr.f32.gmra.mxu0 %v725_v39  ;;  %v2986_v3 = vpop.trf.xlu0 }
 0x722   : > { %2767 = vmatprep.mubr.f32.mxu0 %v733_v30  ;;  %v7874_v18 = vpop.f32.mrf.mxu0 }
 0x723   : > { %9507 = vst [vmem:[#allocation49_spill] sm:$0xff] %v7874_v18 }
 0x724   : > { %v745_v4 = vpop.f32.mrf.mxu0  ;;  %v2954_v9 = vpop.trf.xlu1 }
 0x725   : > { %2768 = vmatmul.mubr.f32.gmra.mxu0 %v731_v12  ;;  %3898 = vmatprep.mubr.f32.mxu1 %v745_v4  ;;  %v2987_v29 = vpop.trf.xlu0 }
 0x726   : > { %2773 = vmatprep.mubr.f32.mxu0 %v739_v60 }
 0x728   : > { %v2955_v28 = vpop.trf.xlu1 }
 0x729   : > { %2774 = vmatmul.mubr.f32.gmra.mxu0 %v737_v5  ;;  %v2988_v30 = vpop.trf.xlu0 }
 0x72a   : > { %2849 = vmatprep.mubr.f32.mxu0 %v9506_v16  ;;  %v7876_v61 = vpop.f32.mrf.mxu0 }
 0x72b   : > { %9508 = vst [vmem:[#allocation38_spill] sm:$0xff] %v7876_v61 }
 0x72c   : > { %v7878_v19 = vpop.f32.mrf.mxu0  ;;  %v2956_v36 = vpop.trf.xlu1 }
 0x72d   : > { %9509 = vst [vmem:[#allocation45_spill] sm:$0xff] %v7878_v19  ;;  %v2989_v5 = vpop.trf.xlu0 }
 0x730   : > { %v2957_v15 = vpop.trf.xlu1 }
 0x731   : > { %v2990_v4 = vpop.trf.xlu0 }
 0x732   : > { %v7880_v33 = vpop.f32.mrf.mxu0 }
 0x733   : > { %9510 = vst [vmem:[#allocation41_spill] sm:$0xff] %v7880_v33 }
 0x734   : > { %v7882_v46 = vpop.f32.mrf.mxu0  ;;  %v2958_v39 = vpop.trf.xlu1 }
 0x735   : > { %9511 = vst [vmem:[#allocation35_spill] sm:$0xff] %v7882_v46 }
 0x736   : > { %v7884_v25 = vpop.f32.mrf.mxu0 }
 0x737   : > { %9512 = vst [vmem:[#allocation44_spill] sm:$0xff] %v7884_v25 }
 0x738   : > { %v7886_v37 = vpop.f32.mrf.mxu0  ;;  %v2959_v20 = vpop.trf.xlu1 }
 0x739   : > { %9513 = vst [vmem:[#allocation39_spill] sm:$0xff] %v7886_v37 }
 0x73a   : > { %v7888_v6 = vpop.f32.mrf.mxu0 }
 0x73b   : > { %9514 = vst [vmem:[#allocation14_spill] sm:$0xff] %v7888_v6 }
 0x73c   : > { %v7890_v26 = vpop.f32.mrf.mxu0  ;;  %v2960_v41 = vpop.trf.xlu1 }
 0x73e   : > { %v7892_v0 = vpop.f32.mrf.mxu0 }
 0x73f   : > { %9515 = vst [vmem:[#allocation13_spill] sm:$0xff] %v7892_v0 }
 0x740   : > { %v7894_v42 = vpop.f32.mrf.mxu0  ;;  %v2961_v17 = vpop.trf.xlu1 }
 0x741   : > { %9516 = vst [vmem:[#allocation16_spill] sm:$0xff] %v7894_v42 }
 0x742   : > { %v7896_v62 = vpop.f32.mrf.mxu0 }
 0x743   : > { %9517 = vst [vmem:[#allocation15_spill] sm:$0xff] %v7896_v62 }
 0x744   : > { %v7898_v7 = vpop.f32.mrf.mxu0  ;;  %v2962_v10 = vpop.trf.xlu1 }
 0x745   : > { %9518 = vst [vmem:[#allocation18_spill] sm:$0xff] %v7898_v7 }
 0x746   : > { %v7900_v31 = vpop.f32.mrf.mxu0 }
 0x747   : > { %9519 = vst [vmem:[#allocation17_spill] sm:$0xff] %v7900_v31 }
 0x748   : > { %v7902_v24 = vpop.f32.mrf.mxu0  ;;  %v2963_v59 = vpop.trf.xlu1 }
 0x749   : > { %9520 = vst [vmem:[#allocation20_spill] sm:$0xff] %v7902_v24 }
 0x74c   : > { %v2964_v21 = vpop.trf.xlu1 }
 0x750   : > { %v2965_v12 = vpop.trf.xlu1 }
 0x754   : > { %v2966_v22 = vpop.trf.xlu1 }
 0x758   : > { %v2967_v57 = vpop.trf.xlu1 }
 0x75c   : > { %v2968_v60 = vpop.trf.xlu1 }
 0x7dd   : > { %v2757_v44 = vpop.f32.mrf.mxu0 }
 0x7df   : > { %v2759_v47 = vpop.f32.mrf.mxu0 }
 0x7e1   : > { %v2763_v55 = vpop.f32.mrf.mxu0 }
 0x7e3   : > { %v2765_v13 = vpop.f32.mrf.mxu0 }
 0x7e5   : > { %v2769_v63 = vpop.f32.mrf.mxu0 }
 0x7e7   : > { %v2771_v34 = vpop.f32.mrf.mxu0 }
 0x7e9   : > { %v2775_v38 = vpop.f32.mrf.mxu0 }
 0x7eb   : > { %v2777_v2 = vpop.f32.mrf.mxu0 }
 0x7ec   : > { %2809 = vmatprep.subr.mxu0 %v2777_v2 }
 0x7ed   : > { %2810 = vmatpush1.msra.mxu0 %v2775_v38 }
 0x7ee   : > { %2811 = vmatprep.subr.mxu0 %v2771_v34 }
 0x7ef   : > { %2812 = vmatpush1.msra.mxu0 %v2769_v63 }
 0x7f0   : > { %2813 = vmatprep.subr.mxu0 %v2765_v13 }
 0x7f1   : > { %2814 = vmatpush1.msra.mxu0 %v2763_v55 }
 0x7f2   : > { %2815 = vmatprep.subr.mxu0 %v2759_v47 }
 0x7f3   : > { %2816 = vmatpush1.msra.mxu0 %v2757_v44  ;;  %v2991_v44 = vpop.trf.xlu0 }
 0x7f4   : > { %2882 = vmatprep.subr.mxu0 %v9521_v52  ;;  %5279 = vmatmul.mubr.msk.f32.vlgmr.msra.gmra.mxu0 %vm863_vm6, %v2782_v56 }
 0x7f5   : > { %2883 = vmatpush1.msra.mxu0 %v9522_v48  ;;  %2922 = vmatprep.mubr.f32.mxu0 %v9506_v16 }
 0x7f6   : > { %2884 = vmatprep.subr.mxu0 %v9523_v50 }
 0x7f7   : > { %2885 = vmatpush1.msra.mxu0 %v9524_v23  ;;  %v2992_v47 = vpop.trf.xlu0 }
 0x7f8   : > { %2886 = vmatprep.subr.mxu0 %v9525_v49 }
 0x7f9   : > { %2887 = vmatpush1.msra.mxu0 %v9526_v1 }
 0x7fa   : > { %2888 = vmatprep.subr.mxu0 %v9527_v14 }
 0x7fb   : > { %2889 = vmatpush1.msra.mxu0 %v9528_v40  ;;  %v2993_v55 = vpop.trf.xlu0 }
 0x7fc   : > { %3121 = vmatprep.subr.mxu0 %v9529_v53  ;;  %5280 = vmatmul.mubr.msk.f32.vlgmr.msra.gmra.mxu0 %vm863_vm6, %v9530_v8 }
 0x7fd   : > { %3122 = vmatpush1.msra.mxu0 %v9531_v54  ;;  %3161 = vmatprep.mubr.f32.mxu0 %v9506_v16 }
 0x7fe   : > { %3123 = vmatprep.subr.mxu0 %v9532_v11 }
 0x7ff   : > { %3124 = vmatpush1.msra.mxu0 %v9533_v32  ;;  %v2994_v13 = vpop.trf.xlu0 }
 0x800   : > { %3125 = vmatprep.subr.mxu0 %v9534_v45 }
 0x801   : > { %3126 = vmatpush1.msra.mxu0 %v9535_v51 }
 0x802   : > { %3127 = vmatprep.subr.mxu0 %v9536_v58 }
 0x803   : > { %3128 = vmatpush1.msra.mxu0 %v9537_v27 }
 0x804   : > { %5281 = vmatmul.mubr.msk.f32.vlgmr.msra.gmra.mxu0 %vm863_vm6, %v2953_v43  ;;  %v2995_v43 = vpop.trf.xlu0 }
 0x805   : > { %3167 = vmatprep.mubr.f32.mxu0 %v9506_v16 }
 0x808   : > { %5282 = vmatmul.mubr.msk.f32.gmra.mxu0 %vm863_vm6, %v2954_v9  ;;  %v2996_v63 = vpop.trf.xlu0 }
 0x809   : > { %3173 = vmatprep.mubr.f32.mxu0 %v9506_v16 }
 0x80c   : > { %5283 = vmatmul.mubr.msk.f32.gmra.mxu0 %vm863_vm6, %v2955_v28  ;;  %v2997_v34 = vpop.trf.xlu0 }
 0x80d   : > { %3179 = vmatprep.mubr.f32.mxu0 %v9506_v16 }
 0x810   : > { %5284 = vmatmul.mubr.msk.f32.gmra.mxu0 %vm863_vm6, %v2956_v36  ;;  %v2998_v38 = vpop.trf.xlu0 }
 0x811   : > { %3185 = vmatprep.mubr.f32.mxu0 %v9506_v16 }
 0x814   : > { %5285 = vmatmul.mubr.msk.f32.gmra.mxu0 %vm863_vm6, %v2957_v15  ;;  %v2999_v9 = vpop.trf.xlu0 }
 0x815   : > { %3191 = vmatprep.mubr.f32.mxu0 %v9506_v16 }
 0x818   : > { %5286 = vmatmul.mubr.msk.f32.gmra.mxu0 %vm863_vm6, %v2958_v39  ;;  %v3000_v2 = vpop.trf.xlu0 }
 0x819   : > { %3197 = vmatprep.mubr.f32.mxu0 %v9506_v16 }
 0x81c   : > { %5287 = vmatmul.mubr.msk.f32.gmra.mxu0 %vm863_vm6, %v2959_v20 }
 0x81d   : > { %3203 = vmatprep.mubr.f32.mxu0 %v9506_v16 }
 0x820   : > { %5288 = vmatmul.mubr.msk.f32.gmra.mxu0 %vm863_vm6, %v2960_v41 }
 0x821   : > { %3209 = vmatprep.mubr.f32.mxu0 %v9506_v16 }
 0x824   : > { %5289 = vmatmul.mubr.msk.f32.gmra.mxu0 %vm863_vm6, %v2961_v17 }
 0x825   : > { %3215 = vmatprep.mubr.f32.mxu0 %v9506_v16 }
 0x828   : > { %5290 = vmatmul.mubr.msk.f32.gmra.mxu0 %vm863_vm6, %v2962_v10 }
 0x829   : > { %3221 = vmatprep.mubr.f32.mxu0 %v9506_v16 }
 0x82c   : > { %5291 = vmatmul.mubr.msk.f32.gmra.mxu0 %vm863_vm6, %v2963_v59 }
 0x82d   : > { %3227 = vmatprep.mubr.f32.mxu0 %v9506_v16 }
 0x830   : > { %5292 = vmatmul.mubr.msk.f32.gmra.mxu0 %vm863_vm6, %v2964_v21 }
 0x831   : > { %3233 = vmatprep.mubr.f32.mxu0 %v9506_v16 }
 0x834   : > { %5293 = vmatmul.mubr.msk.f32.gmra.mxu0 %vm863_vm6, %v2965_v12 }
 0x835   : > { %3239 = vmatprep.mubr.f32.mxu0 %v9506_v16 }
 0x838   : > { %5294 = vmatmul.mubr.msk.f32.gmra.mxu0 %vm863_vm6, %v2966_v22 }
 0x839   : > { %3245 = vmatprep.mubr.f32.mxu0 %v9506_v16 }
 0x83c   : > { %5295 = vmatmul.mubr.msk.f32.gmra.mxu0 %vm863_vm6, %v2967_v57 }
 0x83d   : > { %3251 = vmatprep.mubr.f32.mxu0 %v9506_v16 }
 0x840   : > { %5296 = vmatmul.mubr.msk.f32.gmra.mxu0 %vm863_vm6, %v2968_v60 }
 0x841   : > { %3257 = vmatprep.mubr.f32.mxu0 %v9506_v16 }
 0x844   : > { %5297 = vmatmul.mubr.msk.f32.gmra.mxu0 %vm863_vm6, %v2985_v35 }
 0x845   : > { %3263 = vmatprep.mubr.f32.mxu0 %v9506_v16 }
 0x848   : > { %5298 = vmatmul.mubr.msk.f32.gmra.mxu0 %vm863_vm6, %v2986_v3 }
 0x849   : > { %3269 = vmatprep.mubr.f32.mxu0 %v9506_v16 }
 0x84c   : > { %5299 = vmatmul.mubr.msk.f32.gmra.mxu0 %vm863_vm6, %v2987_v29 }
 0x84d   : > { %3275 = vmatprep.mubr.f32.mxu0 %v9506_v16 }
 0x850   : > { %5300 = vmatmul.mubr.msk.f32.gmra.mxu0 %vm863_vm6, %v2988_v30 }
 0x851   : > { %3281 = vmatprep.mubr.f32.mxu0 %v9506_v16 }
 0x854   : > { %5301 = vmatmul.mubr.msk.f32.gmra.mxu0 %vm863_vm6, %v2989_v5 }
 0x855   : > { %3287 = vmatprep.mubr.f32.mxu0 %v9506_v16 }
 0x858   : > { %5302 = vmatmul.mubr.msk.f32.gmra.mxu0 %vm863_vm6, %v2990_v4 }
 0x859   : > { %3293 = vmatprep.mubr.f32.mxu0 %v9506_v16 }
 0x85c   : > { %5303 = vmatmul.mubr.msk.f32.gmra.mxu0 %vm863_vm6, %v2991_v44 }
 0x85d   : > { %3299 = vmatprep.mubr.f32.mxu0 %v9506_v16 }
 0x860   : > { %5304 = vmatmul.mubr.msk.f32.gmra.mxu0 %vm863_vm6, %v2992_v47 }
 0x861   : > { %3305 = vmatprep.mubr.f32.mxu0 %v9506_v16 }
 0x864   : > { %5305 = vmatmul.mubr.msk.f32.gmra.mxu0 %vm863_vm6, %v2993_v55 }
 0x865   : > { %3311 = vmatprep.mubr.f32.mxu0 %v9506_v16 }
 0x868   : > { %5306 = vmatmul.mubr.msk.f32.gmra.mxu0 %vm863_vm6, %v2994_v13 }
 0x869   : > { %3317 = vmatprep.mubr.f32.mxu0 %v9506_v16 }
 0x86c   : > { %5307 = vmatmul.mubr.msk.f32.gmra.mxu0 %vm863_vm6, %v2995_v43 }
 0x86d   : > { %3323 = vmatprep.mubr.f32.mxu0 %v9506_v16 }
 0x870   : > { %5308 = vmatmul.mubr.msk.f32.gmra.mxu0 %vm863_vm6, %v2996_v63 }
 0x871   : > { %3329 = vmatprep.mubr.f32.mxu0 %v9506_v16 }
 0x874   : > { %5309 = vmatmul.mubr.msk.f32.gmra.mxu0 %vm863_vm6, %v2997_v34 }
 0x875   : > { %3335 = vmatprep.mubr.f32.mxu0 %v9506_v16 }
 0x878   : > { %5310 = vmatmul.mubr.msk.f32.gmra.mxu0 %vm863_vm6, %v2998_v38 }
 0x879   : > { %3341 = vmatprep.mubr.f32.mxu0 %v9506_v16 }
 0x87c   : > { %5311 = vmatmul.mubr.msk.f32.gmra.mxu0 %vm863_vm6, %v2999_v9 }
 0x87d   : > { %3347 = vmatprep.mubr.f32.mxu0 %v9506_v16 }
 0x880   : > { %5312 = vmatmul.mubr.msk.f32.gmra.mxu0 %vm863_vm6, %v3000_v2 }
 0x881   : > { %4969 = vmatprep.mubr.f32.mxu0 %v7890_v26 }
 0x8b4   : > { %v2851_v28 = vpop.f32.mrf.mxu0 }
 0x8b6   : > { %v2853_v56 = vpop.f32.mrf.mxu0 }
 0x8bc   : > { %v2924_v52 = vpop.f32.mrf.mxu0 }
 0x8bd   : > { %v7989_v48 = vadd.f32 %v2924_v52, %v2851_v28 }
 0x8be   : > { %v2926_v36 = vpop.f32.mrf.mxu0 }
 0x8bf   : > { %9538 = vst [vmem:[#allocation19_spill] sm:$0xff] %v7989_v48  ;;  %v7991_v50 = vadd.f32 %v2926_v36, %v2853_v56 }
 0x8c1   : > { %9539 = vst [vmem:[#allocation46_spill] sm:$0xff] %v7991_v50 }
 0x8c4   : > { %v7993_v23 = vpop.f32.mrf.mxu0 }
 0x8c5   : > { %9540 = vst [vmem:[#allocation47_spill] sm:$0xff] %v7993_v23 }
 0x8c6   : > { %v7995_v49 = vpop.f32.mrf.mxu0 }
 0x8c7   : > { %9541 = vst [vmem:[#allocation34_spill] sm:$0xff] %v7995_v49  ;;  %v3354_v7 = vmax.f32 %v7993_v23, %v7995_v49 }
 0x8c8   : > { %v7997_v1 = vpop.f32.mrf.mxu0 }
 0x8ca   : > { %v7999_v14 = vpop.f32.mrf.mxu0 }
 0x8cb   : > { %v3357_v24 = vmax.f32 %v7997_v1, %v7999_v14 }
 0x8cc   : > { %v8001_v40 = vpop.f32.mrf.mxu0 }
 0x8cd   : > { %9542 = vst [vmem:[#allocation37_spill] sm:$0xff] %v8001_v40 }
 0x8ce   : > { %v8003_v15 = vpop.f32.mrf.mxu0 }
 0x8cf   : > { %9543 = vst [vmem:[#allocation36_spill] sm:$0xff] %v8003_v15 }
 0x8d0   : > { %v8005_v26 = vpop.f32.mrf.mxu0 }
 0x8d2   : > { %v8007_v53 = vpop.f32.mrf.mxu0 }
 0x8d4   : > { %v8009_v8 = vpop.f32.mrf.mxu0 }
 0x8d6   : > { %v8011_v54 = vpop.f32.mrf.mxu0 }
 0x8d7   : > { %9544 = vst [vmem:[#allocation30_spill] sm:$0xff] %v8011_v54 }
 0x8d8   : > { %v8013_v11 = vpop.f32.mrf.mxu0 }
 0x8da   : > { %v8015_v32 = vpop.f32.mrf.mxu0 }
 0x8dc   : > { %v8017_v45 = vpop.f32.mrf.mxu0 }
 0x8de   : > { %v8019_v51 = vpop.f32.mrf.mxu0 }
 0x8e0   : > { %v8021_v39 = vpop.f32.mrf.mxu0 }
 0x8e2   : > { %v8023_v58 = vpop.f32.mrf.mxu0 }
 0x8e3   : > { %v3375_v52 = vmax.f32 %v8021_v39, %v8023_v58 }
 0x8e4   : > { %v8025_v27 = vpop.f32.mrf.mxu0 }
 0x8e6   : > { %v8027_v20 = vpop.f32.mrf.mxu0 }
 0x8e7   : > { %v3378_v36 = vmax.f32 %v8025_v27, %v8027_v20 }
 0x8e8   : > { %v8029_v41 = vpop.f32.mrf.mxu0 }
 0x8ea   : > { %v8031_v17 = vpop.f32.mrf.mxu0 }
 0x8eb   : > { %v3381_v9 = vmax.f32 %v8029_v41, %v8031_v17 }
 0x8ec   : > { %v8033_v10 = vpop.f32.mrf.mxu0 }
 0x8ee   : > { %v8035_v59 = vpop.f32.mrf.mxu0 }
 0x8ef   : > { %v3384_v2 = vmax.f32 %v8033_v10, %v8035_v59 }
 0x8f0   : > { %v8037_v35 = vpop.f32.mrf.mxu0 }
 0x8f2   : > { %v8039_v21 = vpop.f32.mrf.mxu0 }
 0x8f3   : > { %v3387_v43 = vmax.f32 %v8037_v35, %v8039_v21 }
 0x8f4   : > { %v8041_v3 = vpop.f32.mrf.mxu0 }
 0x8f6   : > { %v8043_v12 = vpop.f32.mrf.mxu0 }
 0x8f7   : > { %v3390_v63 = vmax.f32 %v8041_v3, %v8043_v12 }
 0x8f8   : > { %v8045_v29 = vpop.f32.mrf.mxu0 }
 0x8fa   : > { %v8047_v22 = vpop.f32.mrf.mxu0 }
 0x8fb   : > { %v3393_v44 = vmax.f32 %v8045_v29, %v8047_v22 }
 0x8fc   : > { %v8049_v30 = vpop.f32.mrf.mxu0 }
 0x8fe   : > { %v8051_v57 = vpop.f32.mrf.mxu0 }
 0x8ff   : > { %v3396_v5 = vmax.f32 %v8049_v30, %v8051_v57 }
 0x900   : > { %v8055_v60 = vpop.f32.mrf.mxu0 }
 0x901   : > { %3397 = vmax.xlane.f32.xlu1 %v3396_v5 }
 0x902   : > { %v8057_v4 = vpop.f32.mrf.mxu0 }
 0x903   : > { %v3399_v47 = vmax.f32 %v8055_v60, %v8057_v4 }
 0x904   : > { %v8063_v55 = vpop.f32.mrf.mxu0 }
 0x905   : > { %9545 = vst [vmem:[#allocation40_spill] sm:$0xff] %v8063_v55  ;;  %3394 = vmax.xlane.f32.xlu1 %v3393_v44  ;;  %3400 = vmax.xlane.f32.xlu0 %v3399_v47  ;;  %v3369_v47 = vmax.f32 %v8013_v11, %v8015_v32 }
 0x906   : > { %v8065_v13 = vpop.f32.mrf.mxu0 }
 0x907   : > { %9546 = vst [vmem:[#allocation32_spill] sm:$0xff] %v8065_v13 }
 0x908   : > { %v8071_v34 = vpop.f32.mrf.mxu0 }
 0x909   : > { %9547 = vst [vmem:[#allocation42_spill] sm:$0xff] %v8071_v34  ;;  %3391 = vmax.xlane.f32.xlu1 %v3390_v63  ;;  %3388 = vmax.xlane.f32.xlu0 %v3387_v43  ;;  %v3372_v43 = vmax.f32 %v8017_v45, %v8019_v51 }
 0x90a   : > { %v8073_v38 = vpop.f32.mrf.mxu0 }
 0x90b   : > { %9548 = vst [vmem:[#allocation31_spill] sm:$0xff] %v8073_v38 }
 0x90c   : > { %v8079_v28 = vpop.f32.mrf.mxu0 }
 0x90d   : > { %9549 = vst [vmem:[#allocation43_spill] sm:$0xff] %v8079_v28  ;;  %3385 = vmax.xlane.f32.xlu1 %v3384_v2  ;;  %3382 = vmax.xlane.f32.xlu0 %v3381_v9  ;;  %v3363_v2 = vmax.f32 %v8005_v26, %v8007_v53 }
 0x90e   : > { %v8081_v56 = vpop.f32.mrf.mxu0 }
 0x90f   : > { %9550 = vst [vmem:[#allocation48_spill] sm:$0xff] %v8081_v56 }
 0x910   : > { %v8087_v5 = vpop.f32.mrf.mxu0 }
 0x911   : > { %9551 = vst [vmem:[#allocation29_spill] sm:$0xff] %v8087_v5  ;;  %3379 = vmax.xlane.f32.xlu1 %v3378_v36  ;;  %3376 = vmax.xlane.f32.xlu0 %v3375_v52  ;;  %v3366_v52 = vmax.f32 %v8009_v8, %v8011_v54 }
 0x912   : > { %v8089_v44 = vpop.f32.mrf.mxu0 }
 0x913   : > { %9552 = vst [vmem:[#allocation33_spill] sm:$0xff] %v8089_v44 }
 0x914   : > { %v8095_v63 = vpop.f32.mrf.mxu0 }
 0x915   : > { %3373 = vmax.xlane.f32.xlu1 %v3372_v43  ;;  %3370 = vmax.xlane.f32.xlu0 %v3369_v47  ;;  %v3360_v47 = vmax.f32 %v8001_v40, %v8003_v15 }
 0x916   : > { %v8097_v9 = vpop.f32.mrf.mxu0 }
 0x917   : > { %9553 = vst [vmem:[#allocation12_spill] sm:$0xff] %v8097_v9 }
 0x918   : > { %v8103_v36 = vpop.f32.mrf.mxu0 }
 0x919   : > { %3367 = vmax.xlane.f32.xlu1 %v3366_v52  ;;  %3364 = vmax.xlane.f32.xlu0 %v3363_v2 }
 0x91a   : > { %v8105_v31 = vpop.f32.mrf.mxu0 }
 0x91b   : > { %9554 = vst [vmem:[#allocation10_spill] sm:$0xff] %v8105_v31 }
 0x91c   : > { %v8111_v43 = vpop.f32.mrf.mxu0 }
 0x91d   : > { %3361 = vmax.xlane.f32.xlu1 %v3360_v47  ;;  %3358 = vmax.xlane.f32.xlu0 %v3357_v24 }
 0x91e   : > { %v8113_v62 = vpop.f32.mrf.mxu0 }
 0x920   : > { %v8117_v0 = vpop.f32.mrf.mxu0 }
 0x921   : > { %3355 = vmax.xlane.f32.xlu1 %v3354_v7 }
 0x922   : > { %v8119_v2 = vpop.f32.mrf.mxu0 }
 0x924   : > { %v8121_v52 = vpop.f32.mrf.mxu0 }
 0x926   : > { %v8123_v42 = vpop.f32.mrf.mxu0 }
 0x928   : > { %v8125_v6 = vpop.f32.mrf.mxu0 }
 0x92a   : > { %v8127_v50 = vpop.f32.mrf.mxu0 }
 0x92c   : > { %v8129_v47 = vpop.f32.mrf.mxu0 }
 0x92e   : > { %v8131_v24 = vpop.f32.mrf.mxu0 }
 0x92f   : > { %v3432_v40 = vmax.f32 %v8129_v47, %v8131_v24 }
 0x930   : > { %v8133_v48 = vpop.f32.mrf.mxu0 }
 0x932   : > { %v8135_v16 = vpop.f32.mrf.mxu0 }
 0x934   : > { %v8137_v25 = vpop.f32.mrf.mxu0 }
 0x936   : > { %v8139_v7 = vpop.f32.mrf.mxu0 }
 0x937   : > { %9555 = vst [vmem:[#allocation8_spill] sm:$0xff] %v8139_v7  ;;  %v3438_v23 = vmax.f32 %v8137_v25, %v8139_v7  ;;  %v3429_v7 = vmax.f32 %v8125_v6, %v8127_v50 }
 0x938   : > { %v8141_v37 = vpop.f32.mrf.mxu0 }
 0x93a   : > { %v8143_v33 = vpop.f32.mrf.mxu0 }
 0x93b   : > { %v3441_v54 = vmax.f32 %v8141_v37, %v8143_v33 }
 0x93c   : > { %v8145_v46 = vpop.f32.mrf.mxu0 }
 0x93e   : > { %v8147_v61 = vpop.f32.mrf.mxu0 }
 0x93f   : > { %v3444_v19 = vmax.f32 %v8145_v46, %v8147_v61 }
 0x940   : > { %v8151_v18 = vpop.f32.mrf.mxu0 }
 0x941   : > { %3445 = vmax.xlane.f32.xlu1 %v3444_v19  ;;  %v3435_v19 = vmax.f32 %v8133_v48, %v8135_v16 }
 0x942   : > { %v8153_v49 = vpop.f32.mrf.mxu0 }
 0x943   : > { %v3447_v15 = vmax.f32 %v8151_v18, %v8153_v49 }
 0x945   : > { %3439 = vmax.xlane.f32.xlu1 %v3438_v23  ;;  %3448 = vmax.xlane.f32.xlu0 %v3447_v15  ;;  %v3426_v23 = vmax.f32 %v8121_v52, %v8123_v42  ;;  %v3423_v15 = vmax.f32 %v8117_v0, %v8119_v2 }
 0x949   : > { %3433 = vmax.xlane.f32.xlu1 %v3432_v40  ;;  %3442 = vmax.xlane.f32.xlu0 %v3441_v54  ;;  %v3420_v40 = vmax.f32 %v8111_v43, %v8113_v62  ;;  %v3417_v54 = vmax.f32 %v8103_v36, %v8105_v31 }
 0x94d   : > { %3436 = vmax.xlane.f32.xlu0 %v3435_v19  ;;  %v3414_v19 = vmax.f32 %v8095_v63, %v8097_v9 }
 0x951   : > { %3430 = vmax.xlane.f32.xlu0 %v3429_v7  ;;  %v3411_v7 = vmax.f32 %v8087_v5, %v8089_v44 }
 0x955   : > { %3427 = vmax.xlane.f32.xlu0 %v3426_v23  ;;  %v3408_v23 = vmax.f32 %v8079_v28, %v8081_v56 }
 0x959   : > { %3424 = vmax.xlane.f32.xlu0 %v3423_v15  ;;  %v3405_v15 = vmax.f32 %v8071_v34, %v8073_v38 }
 0x95d   : > { %3421 = vmax.xlane.f32.xlu0 %v3420_v40  ;;  %v3402_v40 = vmax.f32 %v8063_v55, %v8065_v13 }
 0x961   : > { %3418 = vmax.xlane.f32.xlu0 %v3417_v54 }
 0x965   : > { %3415 = vmax.xlane.f32.xlu0 %v3414_v19 }
 0x969   : > { %3412 = vmax.xlane.f32.xlu0 %v3411_v7 }
 0x96d   : > { %3409 = vmax.xlane.f32.xlu0 %v3408_v23 }
 0x971   : > { %3406 = vmax.xlane.f32.xlu0 %v3405_v15 }
 0x975   : > { %3403 = vmax.xlane.f32.xlu0 %v3402_v40 }
 0x98a   : > { %v3398_v54 = vpop.xlane.xlu1 %3397 }
 0x98b   : > { %v3478_v19 = vsub.f32 %v8049_v30, %v3398_v54  ;;  %v3479_v7 = vsub.f32 %v8051_v57, %v3398_v54 }
 0x98d   : > { %v3570_v38 = vmul.f32 1.442695, %v3478_v19  ;;  %v3572_v34 = vmul.f32 1.442695, %v3479_v7 }
 0x98e   : > { %v3395_v31 = vpop.xlane.xlu1 %3394  ;;  %v3401_v9 = vpop.xlane.xlu0 %3400 }
 0x98f   : > { %v3480_v44 = vsub.f32 %v8055_v60, %v3401_v9  ;;  %v3481_v56 = vsub.f32 %v8057_v4, %v3401_v9  ;;  %v3476_v15 = vsub.f32 %v8045_v29, %v3395_v31  ;;  %v3477_v40 = vsub.f32 %v8047_v22, %v3395_v31 }
 0x991   : > { %v3574_v23 = vmul.f32 1.442695, %v3480_v44  ;;  %v3576_v28 = vmul.f32 1.442695, %v3481_v56  ;;  %v3566_v30 = vmul.f32 1.442695, %v3476_v15 }
 0x992   : > { %v3389_v5 = vpop.xlane.xlu0 %3388  ;;  %v3392_v13 = vpop.xlane.xlu1 %3391  ;;  %v3568_v57 = vmul.f32 1.442695, %v3477_v40 }
 0x993   : > { %5789 = vpow2.f32 %v3574_v23  ;;  %v3474_v60 = vsub.f32 %v8041_v3, %v3392_v13  ;;  %v3475_v4 = vsub.f32 %v8043_v12, %v3392_v13  ;;  %v3472_v9 = vsub.f32 %v8037_v35, %v3389_v5 }
 0x994   : > { %5791 = vpow2.f32 %v3576_v28  ;;  %v3473_v22 = vsub.f32 %v8039_v21, %v3389_v5 }
 0x995   : > { %5793 = vpow2.f32 %v3570_v38  ;;  %v3562_v29 = vmul.f32 1.442695, %v3474_v60  ;;  %v3564_v31 = vmul.f32 1.442695, %v3475_v4  ;;  %v3558_v38 = vmul.f32 1.442695, %v3472_v9 }
 0x996   : > { %v3383_v55 = vpop.xlane.xlu0 %3382  ;;  %5795 = vpow2.f32 %v3572_v34  ;;  %v3386_v56 = vpop.xlane.xlu1 %3385  ;;  %v3560_v12 = vmul.f32 1.442695, %v3473_v22 }
 0x997   : > { %5797 = vpow2.f32 %v3566_v30  ;;  %v3470_v3 = vsub.f32 %v8033_v10, %v3386_v56  ;;  %v3471_v13 = vsub.f32 %v8035_v59, %v3386_v56  ;;  %v3468_v23 = vsub.f32 %v8029_v41, %v3383_v55 }
 0x998   : > { %5799 = vpow2.f32 %v3568_v57 }
 0x999   : > { %5801 = vpow2.f32 %v3562_v29  ;;  %v3554_v10 = vmul.f32 1.442695, %v3470_v3  ;;  %v3556_v59 = vmul.f32 1.442695, %v3471_v13  ;;  %v3550_v4 = vmul.f32 1.442695, %v3468_v23 }
 0x99a   : > { %v8193_v44 = vpop.xlane.xlu0 %3376  ;;  %5803 = vpow2.f32 %v3564_v31  ;;  %v3380_v54 = vpop.xlane.xlu1 %3379 }
 0x99b   : > { %5805 = vpow2.f32 %v3558_v38  ;;  %v3467_v31 = vsub.f32 %v8027_v20, %v3380_v54 }
 0x99c   : > { %5807 = vpow2.f32 %v3560_v12 }
 0x99d   : > { %v3548_v20 = vmul.f32 1.442695, %v3467_v31 }
 0x99e   : > { %v3371_v28 = vpop.xlane.xlu0 %3370  ;;  %v3374_v56 = vpop.xlane.xlu1 %3373 }
 0x99f   : > { %v3460_v34 = vsub.f32 %v8013_v11, %v3371_v28  ;;  %v3461_v19 = vsub.f32 %v8015_v32, %v3371_v28  ;;  %v3469_v11 = vsub.f32 %v8031_v17, %v3383_v55  ;;  %v3466_v55 = vsub.f32 %v8025_v27, %v3380_v54 }
 0x9a0   : > { %v8201_v35 = vpop.eup %5789 }
 0x9a1   : > { %v3534_v7 = vmul.f32 1.442695, %v3460_v34  ;;  %v3536_v21 = vmul.f32 1.442695, %v3461_v19  ;;  %v8204_v15 = vpop.eup %5791  ;;  %v3546_v27 = vmul.f32 1.442695, %v3466_v55 }
 0x9a2   : > { %v3365_v5 = vpop.xlane.xlu0 %3364  ;;  %v8208_v30 = vpop.eup %5793  ;;  %v3687_v60 = vadd.f32 %v8204_v15, %v8201_v35 }
 0x9a3   : > { %v3456_v40 = vsub.f32 %v8005_v26, %v3365_v5  ;;  %v3457_v32 = vsub.f32 %v8007_v53, %v3365_v5  ;;  %v8213_v41 = vpop.eup %5795  ;;  %5809 = vpow2.f32 %v3534_v7  ;;  %v3552_v26 = vmul.f32 1.442695, %v3469_v11  ;;  %v3368_v13 = vpop.xlane.xlu1 %3367 }
 0x9a4   : > { %5811 = vpow2.f32 %v3536_v21  ;;  %3688 = vadd.xlane.f32.xlu1 %v3687_v60  ;;  %v8217_v53 = vpop.eup %5797  ;;  %v3684_v28 = vadd.f32 %v8213_v41, %v8208_v30  ;;  %v3463_v5 = vsub.f32 %v8019_v51, %v3374_v56  ;;  %v3458_v11 = vsub.f32 %v8009_v8, %v3368_v13 }
 0x9a5   : > { %v3526_v57 = vmul.f32 1.442695, %v3456_v40  ;;  %v3528_v29 = vmul.f32 1.442695, %v3457_v32  ;;  %5813 = vpow2.f32 %v3554_v10  ;;  %v8223_v38 = vpop.eup %5799  ;;  %v9556_v32 = vld [vmem:[#allocation30_spill] sm:$0xff] }
 0x9a6   : > { %v3359_v17 = vpop.xlane.xlu0 %3358  ;;  %5815 = vpow2.f32 %v3556_v59  ;;  %v8227_v12 = vpop.eup %5801  ;;  %v3681_v54 = vadd.f32 %v8223_v38, %v8217_v53  ;;  %v3459_v60 = vsub.f32 %v9556_v32, %v3368_v13  ;;  %v3540_v51 = vmul.f32 1.442695, %v3463_v5 }
 0x9a7   : > { %v3452_v9 = vsub.f32 %v7997_v1, %v3359_v17  ;;  %v3453_v22 = vsub.f32 %v7999_v14, %v3359_v17  ;;  %5817 = vpow2.f32 %v3526_v57  ;;  %v3464_v1 = vsub.f32 %v8021_v39, %v8193_v44  ;;  %v8233_v19 = vpop.eup %5803  ;;  %v3362_v40 = vpop.xlane.xlu1 %3361 }
 0x9a8   : > { %5819 = vpow2.f32 %v3528_v29  ;;  %3685 = vadd.xlane.f32.xlu1 %v3684_v28  ;;  %v3465_v14 = vsub.f32 %v8023_v58, %v8193_v44  ;;  %v3462_v39 = vsub.f32 %v8017_v45, %v3374_v56  ;;  %v8236_v23 = vpop.eup %5805  ;;  %v3678_v58 = vadd.f32 %v8233_v19, %v8227_v12  ;;  %v9558_v28 = vld [vmem:[#allocation36_spill] sm:$0xff] }
 0x9a9   : > { %v3518_v3 = vmul.f32 1.442695, %v3452_v9  ;;  %v3520_v34 = vmul.f32 1.442695, %v3453_v22  ;;  %5821 = vpow2.f32 %v3550_v4  ;;  %v3542_v7 = vmul.f32 1.442695, %v3464_v1  ;;  %v8241_v44 = vpop.eup %5807 }
 0x9aa   : > { %5823 = vpow2.f32 %v3552_v26  ;;  %v3544_v21 = vmul.f32 1.442695, %v3465_v14  ;;  %v3538_v45 = vmul.f32 1.442695, %v3462_v39  ;;  %v3675_v4 = vadd.f32 %v8241_v44, %v8236_v23  ;;  %v9557_v9 = vld [vmem:[#allocation37_spill] sm:$0xff] }
 0x9ab   : > { %5825 = vpow2.f32 %v3518_v3  ;;  %v3530_v17 = vmul.f32 1.442695, %v3458_v11  ;;  %v3532_v55 = vmul.f32 1.442695, %v3459_v60  ;;  %v3454_v31 = vsub.f32 %v9557_v9, %v3362_v40 }
 0x9ac   : > { %5827 = vpow2.f32 %v3520_v34  ;;  %3682 = vadd.xlane.f32.xlu1 %v3681_v54  ;;  %v3455_v3 = vsub.f32 %v9558_v28, %v3362_v40  ;;  %v3356_v34 = vpop.xlane.xlu1 %3355 }
 0x9ad   : > { %5829 = vpow2.f32 %v3546_v27  ;;  %v3522_v54 = vmul.f32 1.442695, %v3454_v31 }
 0x9ae   : > { %5831 = vpow2.f32 %v3548_v20  ;;  %v3524_v5 = vmul.f32 1.442695, %v3455_v3 }
 0x9af   : > { %5833 = vpow2.f32 %v3542_v7  ;;  %v9560_v7 = vld [vmem:[#allocation47_spill] sm:$0xff] }
 0x9b0   : > { %v8243_v10 = vpop.eup %5809  ;;  %3679 = vadd.xlane.f32.xlu1 %v3678_v58  ;;  %5835 = vpow2.f32 %v3544_v21  ;;  %v3450_v39 = vsub.f32 %v9560_v7, %v3356_v34  ;;  %v9561_v58 = vld [vmem:[#allocation34_spill] sm:$0xff] }
 0x9b1   : > { %v8246_v59 = vpop.eup %5811  ;;  %5837 = vpow2.f32 %v3538_v45  ;;  %v3451_v11 = vsub.f32 %v9561_v58, %v3356_v34 }
 0x9b2   : > { %v8249_v57 = vpop.eup %5813  ;;  %v3657_v56 = vadd.f32 %v8246_v59, %v8243_v10  ;;  %5839 = vpow2.f32 %v3540_v51  ;;  %v3514_v60 = vmul.f32 1.442695, %v3450_v39 }
 0x9b3   : > { %v8255_v29 = vpop.eup %5815  ;;  %5841 = vpow2.f32 %v3530_v17 }
 0x9b4   : > { %v8257_v8 = vpop.eup %5817  ;;  %3676 = vadd.xlane.f32.xlu1 %v3675_v4  ;;  %3658 = vadd.xlane.f32.xlu0 %v3657_v56  ;;  %v3672_v27 = vadd.f32 %v8255_v29, %v8249_v57  ;;  %5843 = vpow2.f32 %v3532_v55  ;;  %v3516_v4 = vmul.f32 1.442695, %v3451_v11 }
 0x9b5   : > { %v8259_v26 = vpop.eup %5819  ;;  %5845 = vpow2.f32 %v3522_v54 }
 0x9b6   : > { %v8262_v22 = vpop.eup %5821  ;;  %v3651_v1 = vadd.f32 %v8259_v26, %v8257_v8  ;;  %5847 = vpow2.f32 %v3524_v5 }
 0x9b7   : > { %v8269_v20 = vpop.eup %5823  ;;  %5849 = vpow2.f32 %v3514_v60 }
 0x9b8   : > { %v8271_v14 = vpop.eup %5825  ;;  %3673 = vadd.xlane.f32.xlu1 %v3672_v27  ;;  %3652 = vadd.xlane.f32.xlu0 %v3651_v1  ;;  %v3669_v40 = vadd.f32 %v8269_v20, %v8262_v22  ;;  %5851 = vpow2.f32 %v3516_v4  ;;  %v9562_v4 = vld [vmem:[#allocation8_spill] sm:$0xff] }
 0x9b9   : > { %9559 = vst [vmem:[#allocation11_spill] sm:$0xff] %v8271_v14  ;;  %v8273_v13 = vpop.eup %5827 }
 0x9ba   : > { %v8276_v21 = vpop.eup %5829  ;;  %v3645_v45 = vadd.f32 %v8273_v13, %v8271_v14 }
 0x9bb   : > { %v8283_v32 = vpop.eup %5831 }
 0x9bc   : > { %3670 = vadd.xlane.f32.xlu1 %v3669_v40  ;;  %3646 = vadd.xlane.f32.xlu0 %v3645_v45  ;;  %v8285_v51 = vpop.eup %5833  ;;  %v3666_v56 = vadd.f32 %v8283_v32, %v8276_v21 }
 0x9bd   : > { %v8289_v17 = vpop.eup %5835 }
 0x9be   : > { %v8291_v55 = vpop.eup %5837  ;;  %v3663_v9 = vadd.f32 %v8289_v17, %v8285_v51 }
 0x9bf   : > { %v8295_v31 = vpop.eup %5839 }
 0x9c0   : > { %3667 = vadd.xlane.f32.xlu1 %v3666_v56  ;;  %v8297_v28 = vpop.eup %5841  ;;  %v3660_v34 = vadd.f32 %v8295_v31, %v8291_v55 }
 0x9c1   : > { %v8299_v3 = vpop.eup %5843 }
 0x9c2   : > { %v8305_v7 = vpop.eup %5845  ;;  %v3654_v39 = vadd.f32 %v8299_v3, %v8297_v28 }
 0x9c3   : > { %v8309_v5 = vpop.eup %5847 }
 0x9c4   : > { %3664 = vadd.xlane.f32.xlu1 %v3663_v9 }
 0x9c8   : > { %3661 = vadd.xlane.f32.xlu1 %v3660_v34  ;;  %v3648_v34 = vadd.f32 %v8309_v5, %v8305_v7 }
 0x9ca   : > { %v3446_v27 = vpop.xlane.xlu1 %3445 }
 0x9cb   : > { %v3510_v1 = vsub.f32 %v8145_v46, %v3446_v27  ;;  %v3511_v54 = vsub.f32 %v8147_v61, %v3446_v27  ;;  %v8314_v61 = vpop.eup %5849 }
 0x9cc   : > { %3655 = vadd.xlane.f32.xlu1 %v3654_v39  ;;  %v8319_v27 = vpop.eup %5851 }
 0x9cd   : > { %v3634_v58 = vmul.f32 1.442695, %v3510_v1  ;;  %v3636_v11 = vmul.f32 1.442695, %v3511_v54 }
 0x9ce   : > { %v3440_v40 = vpop.xlane.xlu1 %3439  ;;  %v3449_v45 = vpop.xlane.xlu0 %3448 }
 0x9cf   : > { %5853 = vpow2.f32 %v3634_v58  ;;  %v3506_v60 = vsub.f32 %v8137_v25, %v3440_v40  ;;  %v3507_v56 = vsub.f32 %v9562_v4, %v3440_v40  ;;  %v3512_v46 = vsub.f32 %v8151_v18, %v3449_v45 }
 0x9d0   : > { %5855 = vpow2.f32 %v3636_v11  ;;  %v3513_v9 = vsub.f32 %v8153_v49, %v3449_v45  ;;  %3649 = vadd.xlane.f32.xlu1 %v3648_v34  ;;  %v3642_v45 = vadd.f32 %v8319_v27, %v8314_v61 }
 0x9d1   : > { %v3626_v1 = vmul.f32 1.442695, %v3506_v60  ;;  %v3628_v54 = vmul.f32 1.442695, %v3507_v56  ;;  %v3638_v39 = vmul.f32 1.442695, %v3512_v46 }
 0x9d2   : > { %v3640_v58 = vmul.f32 1.442695, %v3513_v9  ;;  %v3434_v25 = vpop.xlane.xlu1 %3433  ;;  %v3443_v14 = vpop.xlane.xlu0 %3442 }
 0x9d3   : > { %5857 = vpow2.f32 %v3626_v1  ;;  %v3502_v18 = vsub.f32 %v8129_v47, %v3434_v25  ;;  %v3503_v40 = vsub.f32 %v8131_v24, %v3434_v25  ;;  %v3508_v11 = vsub.f32 %v8141_v37, %v3443_v14 }
 0x9d4   : > { %5859 = vpow2.f32 %v3628_v54  ;;  %v3509_v49 = vsub.f32 %v8143_v33, %v3443_v14  ;;  %3643 = vadd.xlane.f32.xlu1 %v3642_v45 }
 0x9d5   : > { %5861 = vpow2.f32 %v3638_v39  ;;  %v3618_v60 = vmul.f32 1.442695, %v3502_v18  ;;  %v3620_v4 = vmul.f32 1.442695, %v3503_v40  ;;  %v3630_v56 = vmul.f32 1.442695, %v3508_v11 }
 0x9d6   : > { %5863 = vpow2.f32 %v3640_v58  ;;  %v3632_v46 = vmul.f32 1.442695, %v3509_v49  ;;  %v3437_v9 = vpop.xlane.xlu0 %3436 }
 0x9d7   : > { %5865 = vpow2.f32 %v3618_v60  ;;  %v3504_v47 = vsub.f32 %v8133_v48, %v3437_v9  ;;  %v3505_v24 = vsub.f32 %v8135_v16, %v3437_v9 }
 0x9d8   : > { %5867 = vpow2.f32 %v3620_v4 }
 0x9d9   : > { %5869 = vpow2.f32 %v3630_v56  ;;  %v3622_v37 = vmul.f32 1.442695, %v3504_v47  ;;  %v3624_v33 = vmul.f32 1.442695, %v3505_v24 }
 0x9da   : > { %5871 = vpow2.f32 %v3632_v46  ;;  %v3431_v14 = vpop.xlane.xlu0 %3430 }
 0x9db   : > { %5873 = vpow2.f32 %v3622_v37  ;;  %v3500_v34 = vsub.f32 %v8125_v6, %v3431_v14  ;;  %v3501_v1 = vsub.f32 %v8127_v50, %v3431_v14 }
 0x9dc   : > { %v8331_v54 = vpop.eup %5853  ;;  %5875 = vpow2.f32 %v3624_v33 }
 0x9dd   : > { %v8333_v39 = vpop.eup %5855  ;;  %v3614_v58 = vmul.f32 1.442695, %v3500_v34  ;;  %v3616_v48 = vmul.f32 1.442695, %v3501_v1 }
 0x9de   : > { %v3428_v25 = vpop.xlane.xlu0 %3427  ;;  %v3732_v16 = vadd.f32 %v8333_v39, %v8331_v54 }
 0x9df   : > { %5877 = vpow2.f32 %v3614_v58  ;;  %v3498_v18 = vsub.f32 %v8121_v52, %v3428_v25  ;;  %v3499_v40 = vsub.f32 %v8123_v42, %v3428_v25 }
 0x9e0   : > { %v8339_v11 = vpop.eup %5857  ;;  %5879 = vpow2.f32 %v3616_v48  ;;  %3733 = vadd.xlane.f32.xlu1 %v3732_v16 }
 0x9e1   : > { %v8341_v6 = vpop.eup %5859  ;;  %v3610_v50 = vmul.f32 1.442695, %v3498_v18  ;;  %v3612_v49 = vmul.f32 1.442695, %v3499_v40 }
 0x9e2   : > { %v8343_v45 = vpop.eup %5861  ;;  %v3425_v60 = vpop.xlane.xlu0 %3424  ;;  %v3726_v4 = vadd.f32 %v8341_v6, %v8339_v11 }
 0x9e3   : > { %v8347_v56 = vpop.eup %5863  ;;  %5881 = vpow2.f32 %v3610_v50  ;;  %v3496_v52 = vsub.f32 %v8117_v0, %v3425_v60  ;;  %v3497_v42 = vsub.f32 %v8119_v2, %v3425_v60 }
 0x9e4   : > { %v8351_v46 = vpop.eup %5865  ;;  %5883 = vpow2.f32 %v3612_v49  ;;  %3727 = vadd.xlane.f32.xlu1 %v3726_v4  ;;  %v3735_v9 = vadd.f32 %v8347_v56, %v8343_v45 }
 0x9e5   : > { %v8355_v47 = vpop.eup %5867  ;;  %v3606_v24 = vmul.f32 1.442695, %v3496_v52  ;;  %v3608_v37 = vmul.f32 1.442695, %v3497_v42 }
 0x9e6   : > { %v8357_v33 = vpop.eup %5869  ;;  %3736 = vadd.xlane.f32.xlu0 %v3735_v9  ;;  %v3422_v14 = vpop.xlane.xlu0 %3421  ;;  %v3720_v0 = vadd.f32 %v8355_v47, %v8351_v46 }
 0x9e7   : > { %v8361_v34 = vpop.eup %5871  ;;  %5885 = vpow2.f32 %v3606_v24  ;;  %v3494_v2 = vsub.f32 %v8111_v43, %v3422_v14  ;;  %v3495_v1 = vsub.f32 %v8113_v62, %v3422_v14  ;;  %v9563_v62 = vld [vmem:[#allocation10_spill] sm:$0xff]  ;;  %v9564_v14 = vld [vmem:[#allocation12_spill] sm:$0xff] }
 0x9e8   : > { %v8365_v58 = vpop.eup %5873  ;;  %5887 = vpow2.f32 %v3608_v37  ;;  %3721 = vadd.xlane.f32.xlu1 %v3720_v0  ;;  %v3729_v48 = vadd.f32 %v8361_v34, %v8357_v33 }
 0x9e9   : > { %v8369_v25 = vpop.eup %5875  ;;  %v3602_v16 = vmul.f32 1.442695, %v3494_v2  ;;  %v3604_v18 = vmul.f32 1.442695, %v3495_v1 }
 0x9ea   : > { %3730 = vadd.xlane.f32.xlu0 %v3729_v48  ;;  %v3419_v40 = vpop.xlane.xlu0 %3418  ;;  %v3723_v50 = vadd.f32 %v8369_v25, %v8365_v58 }
 0x9eb   : > { %5889 = vpow2.f32 %v3602_v16  ;;  %v3492_v43 = vsub.f32 %v8103_v36, %v3419_v40  ;;  %v3493_v49 = vsub.f32 %v9563_v62, %v3419_v40  ;;  %v9565_v40 = vld [vmem:[#allocation29_spill] sm:$0xff] }
 0x9ec   : > { %v8375_v60 = vpop.eup %5877  ;;  %5891 = vpow2.f32 %v3604_v18 }
 0x9ed   : > { %v8377_v4 = vpop.eup %5879  ;;  %v3598_v52 = vmul.f32 1.442695, %v3492_v43  ;;  %v3600_v42 = vmul.f32 1.442695, %v3493_v49  ;;  %v9566_v43 = vld [vmem:[#allocation33_spill] sm:$0xff] }
 0x9ee   : > { %3724 = vadd.xlane.f32.xlu0 %v3723_v50  ;;  %v3416_v9 = vpop.xlane.xlu0 %3415  ;;  %v3717_v24 = vadd.f32 %v8377_v4, %v8375_v60 }
 0x9ef   : > { %5893 = vpow2.f32 %v3598_v52  ;;  %v3490_v37 = vsub.f32 %v8095_v63, %v3416_v9  ;;  %v3491_v0 = vsub.f32 %v9564_v14, %v3416_v9 }
 0x9f0   : > { %v8383_v36 = vpop.eup %5881  ;;  %5895 = vpow2.f32 %v3600_v42 }
 0x9f1   : > { %v8385_v2 = vpop.eup %5883  ;;  %v3594_v1 = vmul.f32 1.442695, %v3490_v37  ;;  %v3596_v48 = vmul.f32 1.442695, %v3491_v0  ;;  %v9569_v37 = vld [vmem:[#allocation43_spill] sm:$0xff]  ;;  %v9570_v0 = vld [vmem:[#allocation48_spill] sm:$0xff] }
 0x9f2   : > { %3718 = vadd.xlane.f32.xlu0 %v3717_v24  ;;  %v3413_v16 = vpop.xlane.xlu0 %3412  ;;  %v3714_v18 = vadd.f32 %v8385_v2, %v8383_v36 }
 0x9f3   : > { %5897 = vpow2.f32 %v3594_v1  ;;  %v3488_v50 = vsub.f32 %v9565_v40, %v3413_v16  ;;  %v3489_v62 = vsub.f32 %v9566_v43, %v3413_v16 }
 0x9f4   : > { %v8391_v63 = vpop.eup %5885  ;;  %5899 = vpow2.f32 %v3596_v48  ;;  %3715 = vadd.xlane.f32.xlu1 %v3714_v18 }
 0x9f5   : > { %9567 = vst [vmem:[#allocation6_spill] sm:$0xff] %v8391_v63  ;;  %v8393_v49 = vpop.eup %5887  ;;  %v3590_v52 = vmul.f32 1.442695, %v3488_v50  ;;  %v3592_v42 = vmul.f32 1.442695, %v3489_v62  ;;  %v9573_v62 = vld [vmem:[#allocation42_spill] sm:$0xff] }
 0x9f6   : > { %9568 = vst [vmem:[#allocation9_spill] sm:$0xff] %v8393_v49  ;;  %v3410_v9 = vpop.xlane.xlu0 %3409  ;;  %v3711_v24 = vadd.f32 %v8393_v49, %v8391_v63 }
 0x9f7   : > { %5901 = vpow2.f32 %v3590_v52  ;;  %v3486_v14 = vsub.f32 %v9569_v37, %v3410_v9  ;;  %v3487_v1 = vsub.f32 %v9570_v0, %v3410_v9  ;;  %v9574_v52 = vld [vmem:[#allocation31_spill] sm:$0xff] }
 0x9f8   : > { %v8399_v40 = vpop.eup %5889  ;;  %5903 = vpow2.f32 %v3592_v42  ;;  %3712 = vadd.xlane.f32.xlu0 %v3711_v24 }
 0x9f9   : > { %9571 = vst [vmem:[#allocation7_spill] sm:$0xff] %v8399_v40  ;;  %v8401_v16 = vpop.eup %5891  ;;  %v3586_v48 = vmul.f32 1.442695, %v3486_v14  ;;  %v3588_v18 = vmul.f32 1.442695, %v3487_v1  ;;  %v9575_v1 = vld [vmem:[#allocation40_spill] sm:$0xff] }
 0x9fa   : > { %9572 = vst [vmem:[#allocation5_spill] sm:$0xff] %v8401_v16  ;;  %v3407_v43 = vpop.xlane.xlu0 %3406  ;;  %v3708_v50 = vadd.f32 %v8401_v16, %v8399_v40 }
 0x9fb   : > { %5905 = vpow2.f32 %v3586_v48  ;;  %v3484_v63 = vsub.f32 %v9573_v62, %v3407_v43  ;;  %v3485_v49 = vsub.f32 %v9574_v52, %v3407_v43  ;;  %v9576_v48 = vld [vmem:[#allocation32_spill] sm:$0xff] }
 0x9fc   : > { %v8407_v37 = vpop.eup %5893  ;;  %5907 = vpow2.f32 %v3588_v18  ;;  %3709 = vadd.xlane.f32.xlu1 %v3708_v50 }
 0x9fd   : > { %v8409_v9 = vpop.eup %5895  ;;  %v3582_v42 = vmul.f32 1.442695, %v3484_v63  ;;  %v3584_v24 = vmul.f32 1.442695, %v3485_v49 }
 0x9fe   : > { %v3404_v0 = vpop.xlane.xlu0 %3403  ;;  %v3705_v14 = vadd.f32 %v8409_v9, %v8407_v37 }
 0x9ff   : > { %5909 = vpow2.f32 %v3582_v42  ;;  %v3482_v40 = vsub.f32 %v9575_v1, %v3404_v0  ;;  %v3483_v16 = vsub.f32 %v9576_v48, %v3404_v0 }
 0xa00   : > { %v8415_v62 = vpop.eup %5897  ;;  %5911 = vpow2.f32 %v3584_v24  ;;  %3706 = vadd.xlane.f32.xlu0 %v3705_v14 }
 0xa01   : > { %v8417_v43 = vpop.eup %5899  ;;  %v3578_v18 = vmul.f32 1.442695, %v3482_v40  ;;  %v3580_v50 = vmul.f32 1.442695, %v3483_v16 }
 0xa02   : > { %v3702_v63 = vadd.f32 %v8417_v43, %v8415_v62 }
 0xa03   : > { %5913 = vpow2.f32 %v3578_v18 }
 0xa04   : > { %v8421_v49 = vpop.eup %5901  ;;  %5915 = vpow2.f32 %v3580_v50  ;;  %3703 = vadd.xlane.f32.xlu1 %v3702_v63  ;;  %v6173_v63 = vld [vmem:[%s9176_s2] sm:$0xf] }
 0xa05   : > { %9577 = vst [vmem:[#allocation57_spill] sm:$0xff] %v8421_v49  ;;  %v8423_v52 = vpop.eup %5903 }
 0xa06   : > { %v3699_v42 = vadd.f32 %v8423_v52, %v8421_v49 }
 0xa08   : > { %v8427_v0 = vpop.eup %5905  ;;  %3700 = vadd.xlane.f32.xlu0 %v3699_v42 }
 0xa09   : > { %9578 = vst [vmem:[#allocation66_spill] sm:$0xff] %v8427_v0  ;;  %v8429_v24 = vpop.eup %5907 }
 0xa0a   : > { %9579 = vst [vmem:[#allocation56_spill] sm:$0xff] %v8429_v24  ;;  %v3696_v40 = vadd.f32 %v8429_v24, %v8427_v0  ;;  %v9584_v24 = vld [vmem:[#allocation22_spill] sm:$0xff] }
 0xa0c   : > { %v8433_v16 = vpop.eup %5909  ;;  %3697 = vadd.xlane.f32.xlu1 %v3696_v40 }
 0xa0d   : > { %9580 = vst [vmem:[#allocation55_spill] sm:$0xff] %v8433_v16  ;;  %v8435_v14 = vpop.eup %5911 }
 0xa0e   : > { %9581 = vst [vmem:[#allocation54_spill] sm:$0xff] %v8435_v14  ;;  %v3693_v1 = vadd.f32 %v8435_v14, %v8433_v16 }
 0xa10   : > { %v8439_v48 = vpop.eup %5913  ;;  %3694 = vadd.xlane.f32.xlu0 %v3693_v1 }
 0xa11   : > { %9582 = vst [vmem:[#allocation53_spill] sm:$0xff] %v8439_v48  ;;  %v8441_v18 = vpop.eup %5915 }
 0xa12   : > { %9583 = vst [vmem:[#allocation52_spill] sm:$0xff] %v8441_v18  ;;  %v3690_v50 = vadd.f32 %v8441_v18, %v8439_v48 }
 0xa14   : > { %3691 = vadd.xlane.f32.xlu1 %v3690_v50 }
 0xa26   : > { %3923 = vrot.lane.b32.xlu0 %v6173_v63, %s6239_s5  ;;  %v4001_v63 = vmul.f32 0.17677669, %v9584_v24  ;;  %v9588_v24 = vld [vmem:[#allocation26_spill] sm:$0xff]  ;;  %s6179_s5 = sshll.u32 %s6242_s30, 4  ;;  %s6180_s5 = int_to_ptr.vmem [resolvable:$false] %s6179_s5 }
 0xa27   : > { %s6181_s19 = scalar_lea.vmem %s6180_s5, 256  ;;  %p6182_p0 = scmp.lt.s32.totalorder %s5100_s20, %s6180_s5 }
 0xa28   : > { %p6183_p1 = scmp.lt.s32.totalorder %s6181_s19, %s6175_s29 }
 0xa2a   : > { %p6184_p2 = por %p6183_p1, %p6182_p0 }
 0xa2c   : > { %p6185_p3 = pnand %p6184_p2, %p6178_p13 }
 0xa2d   : > { %v3689_v42 = vpop.xlane.xlu1 %3688 }
 0xa2e   : > { %5917 = vrcp.f32 %v3689_v42 }
 0xa31   : > { %v3686_v40 = vpop.xlane.xlu1 %3685 }
 0xa32   : > { %5919 = vrcp.f32 %v3686_v40 }
 0xa35   : > { %v3683_v16 = vpop.xlane.xlu1 %3682 }
 0xa36   : > { %5921 = vrcp.f32 %v3683_v16 }
 0xa39   : > { %v3680_v14 = vpop.xlane.xlu1 %3679 }
 0xa3a   : > { %5923 = vrcp.f32 %v3680_v14  ;;  %v9585_v14 = vld [vmem:[#allocation21_spill] sm:$0xff] }
 0xa3b   : > { %v5918_v1 = vpop.eup %5917 }
 0xa3c   : > { %v3801_v0 = vmul.f32 %v5918_v1, %v8204_v15  ;;  %v3800_v48 = vmul.f32 %v5918_v1, %v8201_v35  ;;  %v4000_v15 = vmul.f32 0.17677669, %v9585_v14  ;;  %v9586_v35 = vld [vmem:[#allocation24_spill] sm:$0xff] }
 0xa3d   : > { %v3677_v50 = vpop.xlane.xlu1 %3676  ;;  %v4003_v1 = vmul.f32 0.17677669, %v9586_v35  ;;  %v9590_v14 = vld [vmem:[#allocation28_spill] sm:$0xff] }
 0xa3e   : > { %5925 = vrcp.f32 %v3677_v50  ;;  %3834 = vmatprep.subr.mxu1 %v3801_v0 }
 0xa3f   : > { %v5920_v18 = vpop.eup %5919  ;;  %3835 = vmatpush1.xpose.msra.mxu1 %v3800_v48 }
 0xa40   : > { %v3799_v42 = vmul.f32 %v5920_v18, %v8213_v41  ;;  %v3798_v40 = vmul.f32 %v5920_v18, %v8208_v30  ;;  %v9587_v41 = vld [vmem:[#allocation23_spill] sm:$0xff]  ;;  %v4005_v18 = vmul.f32 0.17677669, %v9588_v24 }
 0xa41   : > { %v3674_v49 = vpop.xlane.xlu1 %3673 }
 0xa42   : > { %5927 = vrcp.f32 %v3674_v49  ;;  %3836 = vmatprep.subr.mxu1 %v3799_v42  ;;  %v4002_v49 = vmul.f32 0.17677669, %v9587_v41 }
 0xa43   : > { %v5922_v16 = vpop.eup %5921  ;;  %3837 = vmatpush1.xpose.msra.mxu1 %v3798_v40 }
 0xa44   : > { %4040 = vxpose.xlu0.b32.start [1/4] (short) %v4001_v63, 128  ;;  %v3797_v0 = vmul.f32 %v5922_v16, %v8223_v38  ;;  %v3796_v48 = vmul.f32 %v5922_v16, %v8217_v53  ;;  %v9589_v38 = vld [vmem:[#allocation25_spill] sm:$0xff] }
 0xa45   : > { %v3671_v50 = vpop.xlane.xlu1 %3670  ;;  %v4004_v16 = vmul.f32 0.17677669, %v9589_v38 }
 0xa46   : > { %5929 = vrcp.f32 %v3671_v50  ;;  %3838 = vmatprep.subr.mxu1 %v3797_v0 }
 0xa47   : > { %4008 = vxpose.xlu1.b32.start [1/4] (short) %v4000_v15, 128  ;;  %v5924_v30 = vpop.eup %5923  ;;  %3839 = vmatpush1.xpose.msra.mxu1 %v3796_v48  ;;  %v4007_v15 = vmul.f32 0.17677669, %v9590_v14  ;;  %v9591_v48 = vld [vmem:[#allocation27_spill] sm:$0xff] }
 0xa48   : > { %4041 = vxpose.xlu0.b32.cont [2/4] (short) %v4003_v1, 128  ;;  %v3795_v63 = vmul.f32 %v5924_v30, %v8233_v19  ;;  %v3794_v42 = vmul.f32 %v5924_v30, %v8227_v12  ;;  %v3659_v19 = vpop.xlane.xlu0 %3658  ;;  %v4006_v50 = vmul.f32 0.17677669, %v9591_v48 }
 0xa49   : > { %v3668_v40 = vpop.xlane.xlu1 %3667 }
 0xa4a   : > { %5931 = vrcp.f32 %v3668_v40  ;;  %3840 = vmatprep.subr.mxu1 %v3795_v63 }
 0xa4b   : > { %4009 = vxpose.xlu1.b32.cont [2/4] (short) %v4002_v49, 128  ;;  %v5926_v53 = vpop.eup %5925  ;;  %3841 = vmatpush1.xpose.msra.mxu1 %v3794_v42 }
 0xa4c   : > { %4042 = vxpose.xlu0.b32.cont [3/4] (short) %v4005_v18, 128  ;;  %v3793_v35 = vmul.f32 %v5926_v53, %v8241_v44  ;;  %v3792_v1 = vmul.f32 %v5926_v53, %v8236_v23  ;;  %v3653_v42 = vpop.xlane.xlu0 %3652 }
 0xa4d   : > { %v3665_v0 = vpop.xlane.xlu1 %3664 }
 0xa4e   : > { %5933 = vrcp.f32 %v3665_v0  ;;  %3842 = vmatprep.subr.mxu1 %v3793_v35 }
 0xa4f   : > { %4010 = vxpose.xlu1.b32.cont [3/4] (short) %v4004_v16, 128  ;;  %v5928_v12 = vpop.eup %5927  ;;  %3843 = vmatpush1.xpose.msra.mxu1 %v3792_v1  ;;  %5935 = vrcp.f32 %v3659_v19 }
 0xa50   : > { %4043 = vxpose.xlu0.b32.end [4/4] (short) %v4007_v15, 128  ;;  %v3791_v30 = vmul.f32 %v5928_v12, %v8255_v29  ;;  %v3790_v41 = vmul.f32 %v5928_v12, %v8249_v57  ;;  %v3647_v14 = vpop.xlane.xlu0 %3646 }
 0xa51   : > { %v3662_v49 = vpop.xlane.xlu1 %3661 }
 0xa52   : > { %5937 = vrcp.f32 %v3662_v49  ;;  %3844 = vmatprep.subr.mxu1 %v3791_v30  ;;  %v9592_v49 = vld [vmem:[#allocation11_spill] sm:$0xff] }
 0xa53   : > { %4011 = vxpose.xlu1.b32.end [4/4] (short) %v4006_v50, 128  ;;  %v5930_v23 = vpop.eup %5929  ;;  %3845 = vmatpush1.xpose.msra.mxu1 %v3790_v41 }
 0xa54   : > { %v3789_v44 = vmul.f32 %v5930_v23, %v8269_v20  ;;  %v3788_v24 = vmul.f32 %v5930_v23, %v8262_v22 }
 0xa55   : > { %v3656_v18 = vpop.xlane.xlu1 %3655 }
 0xa56   : > { %5939 = vrcp.f32 %v3656_v18  ;;  %3846 = vmatprep.subr.mxu1 %v3789_v44 }
 0xa57   : > { %v5932_v63 = vpop.eup %5931  ;;  %3847 = vmatpush1.xpose.msra.mxu1 %v3788_v24  ;;  %5941 = vrcp.f32 %v3653_v42 }
 0xa58   : > { %v3787_v29 = vmul.f32 %v5932_v63, %v8283_v32  ;;  %v3786_v57 = vmul.f32 %v5932_v63, %v8276_v21 }
 0xa59   : > { %v3650_v53 = vpop.xlane.xlu1 %3649 }
 0xa5a   : > { %3848 = vmatprep.subr.mxu1 %v3787_v29  ;;  %5943 = vrcp.f32 %v3650_v53 }
 0xa5b   : > { %v5934_v40 = vpop.eup %5933  ;;  %3849 = vmatpush1.xpose.msra.mxu1 %v3786_v57  ;;  %5945 = vrcp.f32 %v3647_v14 }
 0xa5c   : > { %v3785_v38 = vmul.f32 %v5934_v40, %v8289_v17  ;;  %v3784_v20 = vmul.f32 %v5934_v40, %v8285_v51  ;;  %v5936_v22 = vpop.eup %5935 }
 0xa5d   : > { %v3781_v21 = vmul.f32 %v5936_v22, %v8246_v59  ;;  %v3644_v1 = vpop.xlane.xlu1 %3643  ;;  %v3780_v51 = vmul.f32 %v5936_v22, %v8243_v10 }
 0xa5e   : > { %3850 = vmatprep.subr.mxu1 %v3785_v38  ;;  %5947 = vrcp.f32 %v3644_v1 }
 0xa5f   : > { %v5938_v16 = vpop.eup %5937  ;;  %3851 = vmatpush1.xpose.msra.mxu1 %v3784_v20 }
 0xa60   : > { %v3783_v15 = vmul.f32 %v5938_v16, %v8295_v31  ;;  %v3782_v32 = vmul.f32 %v5938_v16, %v8291_v55 }
 0xa62   : > { %3852 = vmatprep.subr.mxu1 %v3783_v15 }
 0xa63   : > { %v5940_v35 = vpop.eup %5939  ;;  %3853 = vmatpush1.xpose.msra.mxu1 %v3782_v32 }
 0xa64   : > { %3854 = vmatprep.subr.mxu1 %v3781_v21  ;;  %v3779_v17 = vmul.f32 %v5940_v35, %v8299_v3  ;;  %v5942_v0 = vpop.eup %5941  ;;  %v3778_v31 = vmul.f32 %v5940_v35, %v8297_v28 }
 0xa65   : > { %v3777_v55 = vmul.f32 %v5942_v0, %v8259_v26  ;;  %v3776_v48 = vmul.f32 %v5942_v0, %v8257_v8  ;;  %v9594_v0 = vld [vmem:[#allocation6_spill] sm:$0xff] }
 0xa67   : > { %3855 = vmatpush1.xpose.msra.mxu1 %v3780_v51  ;;  %v5944_v12 = vpop.eup %5943 }
 0xa68   : > { %3856 = vmatprep.subr.mxu1 %v3779_v17  ;;  %v3775_v10 = vmul.f32 %v5944_v12, %v8309_v5  ;;  %v5946_v50 = vpop.eup %5945  ;;  %v3774_v30 = vmul.f32 %v5944_v12, %v8305_v7  ;;  %v9596_v12 = vld [vmem:[#allocation7_spill] sm:$0xff] }
 0xa69   : > { %v3734_v19 = vpop.xlane.xlu1 %3733  ;;  %v3773_v28 = vmul.f32 %v5946_v50, %v8273_v13  ;;  %v3772_v23 = vmul.f32 %v5946_v50, %v9592_v49 }
 0xa6a   : > { %5949 = vrcp.f32 %v3734_v19 }
 0xa6b   : > { %3857 = vmatpush1.xpose.msra.mxu1 %v3778_v31  ;;  %v5948_v26 = vpop.eup %5947 }
 0xa6c   : > { %3858 = vmatprep.subr.mxu1 %v3777_v55  ;;  %v3771_v8 = vmul.f32 %v5948_v26, %v8319_v27  ;;  %v3770_v5 = vmul.f32 %v5948_v26, %v8314_v61 }
 0xa6d   : > { %v3728_v41 = vpop.xlane.xlu1 %3727 }
 0xa6f   : > { %v3737_v59 = vpop.xlane.xlu0 %3736  ;;  %3859 = vmatpush1.xpose.msra.mxu1 %v3776_v48 }
 0xa70   : > { %5951 = vrcp.f32 %v3737_v59  ;;  %3860 = vmatprep.subr.mxu1 %v3775_v10 }
 0xa71   : > { %v3722_v18 = vpop.xlane.xlu1 %3721 }
 0xa73   : > { %v3731_v3 = vpop.xlane.xlu0 %3730  ;;  %3861 = vmatpush1.xpose.msra.mxu1 %v3774_v30 }
 0xa74   : > { %5953 = vrcp.f32 %v3731_v3  ;;  %3862 = vmatprep.subr.mxu1 %v3773_v28 }
 0xa75   : > { %5955 = vrcp.f32 %v3728_v41 }
 0xa77   : > { %v3725_v44 = vpop.xlane.xlu0 %3724  ;;  %3863 = vmatpush1.xpose.msra.mxu1 %v3772_v23  ;;  %v5950_v24 = vpop.eup %5949  ;;  %v9598_v23 = vld [vmem:[#allocation56_spill] sm:$0xff] }
 0xa78   : > { %3864 = vmatprep.subr.mxu1 %v3771_v8  ;;  %5957 = vrcp.f32 %v3725_v44  ;;  %v3831_v42 = vmul.f32 %v5950_v24, %v8333_v39  ;;  %v3830_v57 = vmul.f32 %v5950_v24, %v8331_v54 }
 0xa79   : > { %5959 = vrcp.f32 %v3722_v18 }
 0xa7b   : > { %3865 = vmatpush1.xpose.msra.mxu1 %v3770_v5  ;;  %v3719_v27 = vpop.xlane.xlu0 %3718 }
 0xa7c   : > { %5961 = vrcp.f32 %v3719_v27  ;;  %v9605_v27 = vld [vmem:[#allocation45_spill] sm:$0xff] }
 0xa7d   : > { %v5952_v7 = vpop.eup %5951  ;;  %v3716_v53 = vpop.xlane.xlu1 %3715 }
 0xa7e   : > { %v3833_v13 = vmul.f32 %v5952_v7, %v8347_v56  ;;  %v3832_v63 = vmul.f32 %v5952_v7, %v8343_v45  ;;  %5963 = vrcp.f32 %v3716_v53  ;;  %v9609_v53 = vld [vmem:[#allocation39_spill] sm:$0xff] }
 0xa80   : > { %3866 = vmatprep.subr.mxu1 %v3833_v13 }
 0xa81   : > { %v5954_v29 = vpop.eup %5953  ;;  %3867 = vmatpush2.xpose.msra.mxu1 %v3832_v63  ;;  %v3713_v39 = vpop.xlane.xlu0 %3712  ;;  %v9603_v63 = vld [vmem:[#allocation53_spill] sm:$0xff] }
 0xa82   : > { %3868 = vmatprep.subr.mxu1 %v3831_v42  ;;  %v3829_v61 = vmul.f32 %v5954_v29, %v8361_v34  ;;  %v5956_v40 = vpop.eup %5955  ;;  %v3828_v56 = vmul.f32 %v5954_v29, %v8357_v33  ;;  %5965 = vrcp.f32 %v3713_v39  ;;  %v9604_v29 = vld [vmem:[#allocation49_spill] sm:$0xff] }
 0xa83   : > { %v3827_v45 = vmul.f32 %v5956_v40, %v8341_v6  ;;  %v3826_v20 = vmul.f32 %v5956_v40, %v8339_v11  ;;  %v9608_v40 = vld [vmem:[#allocation41_spill] sm:$0xff] }
 0xa85   : > { %3869 = vmatpush2.xpose.msra.mxu1 %v3830_v57  ;;  %v5958_v38 = vpop.eup %5957  ;;  %v3710_v34 = vpop.xlane.xlu1 %3709  ;;  %v9606_v57 = vld [vmem:[#allocation38_spill] sm:$0xff] }
 0xa86   : > { %3870 = vmatprep.subr.mxu1 %v3829_v61  ;;  %v3825_v54 = vmul.f32 %v5958_v38, %v8369_v25  ;;  %v5960_v22 = vpop.eup %5959  ;;  %v3824_v16 = vmul.f32 %v5958_v38, %v8365_v58  ;;  %5967 = vrcp.f32 %v3710_v34  ;;  %v9607_v61 = vld [vmem:[#allocation35_spill] sm:$0xff] }
 0xa87   : > { %v3823_v33 = vmul.f32 %v5960_v22, %v8355_v47  ;;  %v3822_v15 = vmul.f32 %v5960_v22, %v8351_v46  ;;  %v9593_v46 = vld [vmem:[#allocation9_spill] sm:$0xff] }
 0xa89   : > { %3871 = vmatpush2.xpose.msra.mxu1 %v3828_v56  ;;  %v5962_v14 = vpop.eup %5961  ;;  %v3707_v6 = vpop.xlane.xlu0 %3706  ;;  %v9610_v56 = vld [vmem:[#allocation44_spill] sm:$0xff] }
 0xa8a   : > { %3872 = vmatprep.subr.mxu1 %v3827_v45  ;;  %5969 = vrcp.f32 %v3707_v6  ;;  %v3821_v11 = vmul.f32 %v5962_v14, %v8377_v4  ;;  %v3820_v21 = vmul.f32 %v5962_v14, %v8375_v60  ;;  %v9595_v60 = vld [vmem:[#allocation5_spill] sm:$0xff]  ;;  %v9611_v45 = vmov 0.0  }
 0xa8b   : > { %v5964_v32 = vpop.eup %5963 }
 0xa8c   : > { %v3819_v58 = vmul.f32 %v5964_v32, %v8385_v2  ;;  %v3818_v1 = vmul.f32 %v5964_v32, %v8383_v36 }
 0xa8d   : > { %3873 = vmatpush2.xpose.msra.mxu1 %v3826_v20  ;;  %v3704_v25 = vpop.xlane.xlu1 %3703 }
 0xa8e   : > { %3874 = vmatprep.subr.mxu1 %v3825_v54  ;;  %5971 = vrcp.f32 %v3704_v25 }
 0xa8f   : > { %v5966_v35 = vpop.eup %5965 }
 0xa90   : > { %v3817_v51 = vmul.f32 %v5966_v35, %v9593_v46  ;;  %v3816_v31 = vmul.f32 %v5966_v35, %v9594_v0  ;;  %v9614_v35 = vld [vmem:[#allocation63_spill] sm:$0xff]  ;;  %v9617_v46 = vld [vmem:[#allocation60_spill] sm:$0xff] }
 0xa91   : > { %3875 = vmatpush2.xpose.msra.mxu1 %v3824_v16  ;;  %v3701_v47 = vpop.xlane.xlu0 %3700 }
 0xa92   : > { %3876 = vmatprep.subr.mxu1 %v3823_v33  ;;  %5973 = vrcp.f32 %v3701_v47  ;;  %v9615_v47 = vld [vmem:[#allocation62_spill] sm:$0xff] }
 0xa93   : > { %v5968_v17 = vpop.eup %5967 }
 0xa94   : > { %v3815_v19 = vmul.f32 %v5968_v17, %v9595_v60  ;;  %v3814_v59 = vmul.f32 %v5968_v17, %v9596_v12  ;;  %v9618_v17 = vld [vmem:[#allocation59_spill] sm:$0xff] }
 0xa95   : > { %3877 = vmatpush2.xpose.msra.mxu1 %v3822_v15  ;;  %v3698_v4 = vpop.xlane.xlu1 %3697 }
 0xa96   : > { %3878 = vmatprep.subr.mxu1 %v3821_v11  ;;  %5975 = vrcp.f32 %v3698_v4  ;;  %v9619_v4 = vld [vmem:[#allocation58_spill] sm:$0xff] }
 0xa97   : > { %v5970_v55 = vpop.eup %5969 }
 0xa98   : > { %v3813_v36 = vmul.f32 %v5970_v55, %v8409_v9  ;;  %v3812_v50 = vmul.f32 %v5970_v55, %v8407_v37  ;;  %v9597_v9 = vld [vmem:[#allocation57_spill] sm:$0xff]  ;;  %v9599_v37 = vld [vmem:[#allocation66_spill] sm:$0xff] }
 0xa99   : > { %3879 = vmatpush2.xpose.msra.mxu1 %v3820_v21  ;;  %v3695_v2 = vpop.xlane.xlu0 %3694  ;;  %v9612_v21 = vld [vmem:[#allocation65_spill] sm:$0xff] }
 0xa9a   : > { %3880 = vmatprep.subr.mxu1 %v3819_v58  ;;  %5977 = vrcp.f32 %v3695_v2  ;;  %v9613_v58 = vld [vmem:[#allocation64_spill] sm:$0xff] }
 0xa9b   : > { %v5972_v48 = vpop.eup %5971 }
 0xa9c   : > { %v3811_v3 = vmul.f32 %v5972_v48, %v8417_v43  ;;  %v3810_v28 = vmul.f32 %v5972_v48, %v8415_v62  ;;  %v9600_v43 = vld [vmem:[#allocation54_spill] sm:$0xff]  ;;  %v9601_v62 = vld [vmem:[#allocation55_spill] sm:$0xff] }
 0xa9d   : > { %3881 = vmatpush2.xpose.msra.mxu1 %v3818_v1  ;;  %v3692_v10 = vpop.xlane.xlu1 %3691  ;;  %v3924_v32 = vpop.permute.xlu0 %3923  ;;  %v9616_v1 = vld [vmem:[#allocation61_spill] sm:$0xff] }
 0xa9e   : > { %3882 = vmatprep.subr.mxu1 %v3817_v51  ;;  %5979 = vrcp.f32 %v3692_v10 }
 0xa9f   : > { %v5974_v30 = vpop.eup %5973 }
 0xaa0   : > { %v3809_v26 = vmul.f32 %v5974_v30, %v8423_v52  ;;  %v3808_v49 = vmul.f32 %v5974_v30, %v9597_v9  ;;  %v9602_v52 = vld [vmem:[#allocation52_spill] sm:$0xff] }
 0xaa1   : > { %3883 = vmatpush2.xpose.msra.mxu1 %v3816_v31 }
 0xaa2   : > { %3884 = vmatprep.subr.mxu1 %v3815_v19 }
 0xaa3   : > { %v5976_v41 = vpop.eup %5975 }
 0xaa4   : > { %v3807_v8 = vmul.f32 %v5976_v41, %v9598_v23  ;;  %v3806_v5 = vmul.f32 %v5976_v41, %v9599_v37 }
 0xaa5   : > { %3885 = vmatpush2.xpose.msra.mxu1 %v3814_v59 }
 0xaa6   : > { %3886 = vmatprep.subr.mxu1 %v3813_v36 }
 0xaa7   : > { %v5978_v44 = vpop.eup %5977 }
 0xaa8   : > { %v3805_v24 = vmul.f32 %v5978_v44, %v9600_v43  ;;  %v3804_v18 = vmul.f32 %v5978_v44, %v9601_v62  ;;  %v9620_v62 = vld [vmem:[#allocation19_spill] sm:$0xff] }
 0xaa9   : > { %3887 = vmatpush2.xpose.msra.mxu1 %v3812_v50 }
 0xaaa   : > { %3888 = vmatprep.subr.mxu1 %v3811_v3 }
 0xaab   : > { %v5980_v7 = vpop.eup %5979 }
 0xaac   : > { %v3803_v13 = vmul.f32 %v5980_v7, %v9602_v52  ;;  %v3802_v42 = vmul.f32 %v5980_v7, %v9603_v63 }
 0xaad   : > { %3889 = vmatpush2.xpose.msra.mxu1 %v3810_v28 }
 0xaae   : > { %3890 = vmatprep.subr.mxu1 %v3809_v26 }
 0xab1   : > { %3891 = vmatpush2.xpose.msra.mxu1 %v3808_v49 }
 0xab2   : > { %3892 = vmatprep.subr.mxu1 %v3807_v8 }
 0xab5   : > { %3893 = vmatpush2.xpose.msra.mxu1 %v3806_v5 }
 0xab6   : > { %3894 = vmatprep.subr.mxu1 %v3805_v24 }
 0xab9   : > { %3895 = vmatpush2.xpose.msra.mxu1 %v3804_v18 }
 0xaba   : > { %3896 = vmatprep.subr.mxu1 %v3803_v13  ;;  %v9622_v13 = vld [vmem:[#allocation46_spill] sm:$0xff] }
 0xabd   : > { %3897 = vmatpush2.xpose.msra.mxu1 %v3802_v42 }
 0xac0   : > { %3899 = vmatmul.mubr.f32.vlgmr.msra.gmra.mxu1 %v9604_v29  ;;  %v4056_v2 = vpop.trf.xlu0 }
 0xac1   : > { %3904 = vmatprep.mubr.f32.mxu1 %v9605_v27 }
 0xac3   : > { %v4024_v38 = vpop.trf.xlu1 }
 0xac4   : > { %3905 = vmatmul.mubr.f32.gmra.mxu1 %v9606_v57  ;;  %v4057_v59 = vpop.trf.xlu0 }
 0xac5   : > { %3910 = vmatprep.mubr.f32.mxu1 %v9607_v61 }
 0xac7   : > { %v4025_v22 = vpop.trf.xlu1 }
 0xac8   : > { %3911 = vmatmul.mubr.f32.gmra.mxu1 %v9608_v40  ;;  %v4058_v48 = vpop.trf.xlu0 }
 0xac9   : > { %3916 = vmatprep.mubr.f32.mxu1 %v9609_v53 }
 0xacb   : > { %v4026_v14 = vpop.trf.xlu1 }
 0xacc   : > { %3917 = vmatmul.mubr.f32.gmra.mxu1 %v9610_v56  ;;  %v4059_v50 = vpop.trf.xlu0 }
 0xacd   : > { %3991 = vmatprep.mubr.f32.mxu1 %v9611_v45 }
 0xacf   : > { %v4027_v11 = vpop.trf.xlu1 }
 0xad0   : > { %v4060_v30 = vpop.trf.xlu0 }
 0xad3   : > { %v4028_v25 = vpop.trf.xlu1 }
 0xad4   : > { %v4061_v26 = vpop.trf.xlu0 }
 0xad7   : > { %v4029_v51 = vpop.trf.xlu1 }
 0xad8   : > { %v4062_v41 = vpop.trf.xlu0 }
 0xadb   : > { %v4030_v0 = vpop.trf.xlu1 }
 0xadc   : > { %v4063_v9 = vpop.trf.xlu0 }
 0xadf   : > { %v4031_v31 = vpop.trf.xlu1 }
 0xae0   : > { %v4064_v49 = vpop.trf.xlu0 }
 0xae3   : > { %v4032_v60 = vpop.trf.xlu1 }
 0xae4   : > { %v4065_v23 = vpop.trf.xlu0 }
 0xae7   : > { %v4033_v19 = vpop.trf.xlu1 }
 0xae8   : > { %v4066_v8 = vpop.trf.xlu0 }
 0xaeb   : > { %v4034_v55 = vpop.trf.xlu1 }
 0xaec   : > { %v4067_v44 = vpop.trf.xlu0 }
 0xaef   : > { %v4035_v12 = vpop.trf.xlu1 }
 0xaf0   : > { %v4068_v37 = vpop.trf.xlu0 }
 0xaf3   : > { %v4036_v36 = vpop.trf.xlu1 }
 0xaf4   : > { %v4069_v5 = vpop.trf.xlu0 }
 0xaf7   : > { %v4037_v10 = vpop.trf.xlu1 }
 0xaf8   : > { %v4070_v43 = vpop.trf.xlu0 }
 0xafb   : > { %v4038_v3 = vpop.trf.xlu1 }
 0xafc   : > { %v4071_v24 = vpop.trf.xlu0 }
 0xaff   : > { %v4039_v28 = vpop.trf.xlu1 }
 0xb80   : > { %v3900_v39 = vpop.f32.mrf.mxu1 }
 0xb82   : > { %v3902_v20 = vpop.f32.mrf.mxu1 }
 0xb84   : > { %v3906_v54 = vpop.f32.mrf.mxu1 }
 0xb86   : > { %v3908_v34 = vpop.f32.mrf.mxu1 }
 0xb88   : > { %v3912_v16 = vpop.f32.mrf.mxu1 }
 0xb8a   : > { %v3914_v33 = vpop.f32.mrf.mxu1 }
 0xb8c   : > { %v3918_v6 = vpop.f32.mrf.mxu1 }
 0xb8e   : > { %v3920_v15 = vpop.f32.mrf.mxu1 }
 0xb8f   : > { %3951 = vmatprep.subr.mxu1 %v3920_v15 }
 0xb90   : > { %3952 = vmatpush1.msra.mxu1 %v3918_v6 }
 0xb91   : > { %3953 = vmatprep.subr.mxu1 %v3914_v33 }
 0xb92   : > { %3954 = vmatpush1.msra.mxu1 %v3912_v16 }
 0xb93   : > { %3955 = vmatprep.subr.mxu1 %v3908_v34 }
 0xb94   : > { %3956 = vmatpush1.msra.mxu1 %v3906_v54 }
 0xb95   : > { %3957 = vmatprep.subr.mxu1 %v3902_v20 }
 0xb96   : > { %3958 = vmatpush1.msra.mxu1 %v3900_v39 }
 0xb97   : > { %5313 = vmatmul.mubr.msk.f32.vlgmr.msra.gmra.mxu1 %vm863_vm6, %v3924_v32  ;;  %4192 = vmatprep.subr.mxu1 %v9612_v21 }
 0xb98   : > { %4193 = vmatpush1.msra.mxu1 %v9613_v58  ;;  %4232 = vmatprep.mubr.f32.mxu1 %v9611_v45 }
 0xb99   : > { %4194 = vmatprep.subr.mxu1 %v9614_v35 }
 0xb9a   : > { %4195 = vmatpush1.msra.mxu1 %v9615_v47 }
 0xb9b   : > { %4196 = vmatprep.subr.mxu1 %v9616_v1 }
 0xb9c   : > { %4197 = vmatpush1.msra.mxu1 %v9617_v46 }
 0xb9d   : > { %4198 = vmatprep.subr.mxu1 %v9618_v17 }
 0xb9e   : > { %4199 = vmatpush1.msra.mxu1 %v9619_v4 }
 0xb9f   : > { %5314 = vmatmul.mubr.msk.f32.vlgmr.msra.gmra.mxu1 %vm863_vm6, %v4024_v38 }
 0xba0   : > { %4238 = vmatprep.mubr.f32.mxu1 %v9611_v45 }
 0xba3   : > { %5315 = vmatmul.mubr.msk.f32.gmra.mxu1 %vm863_vm6, %v4025_v22 }
 0xba4   : > { %4244 = vmatprep.mubr.f32.mxu1 %v9611_v45 }
 0xba7   : > { %5316 = vmatmul.mubr.msk.f32.gmra.mxu1 %vm863_vm6, %v4026_v14 }
 0xba8   : > { %4250 = vmatprep.mubr.f32.mxu1 %v9611_v45 }
 0xbab   : > { %5317 = vmatmul.mubr.msk.f32.gmra.mxu1 %vm863_vm6, %v4027_v11 }
 0xbac   : > { %4256 = vmatprep.mubr.f32.mxu1 %v9611_v45 }
 0xbaf   : > { %5318 = vmatmul.mubr.msk.f32.gmra.mxu1 %vm863_vm6, %v4028_v25 }
 0xbb0   : > { %4262 = vmatprep.mubr.f32.mxu1 %v9611_v45 }
 0xbb3   : > { %5319 = vmatmul.mubr.msk.f32.gmra.mxu1 %vm863_vm6, %v4029_v51 }
 0xbb4   : > { %4268 = vmatprep.mubr.f32.mxu1 %v9611_v45 }
 0xbb7   : > { %5320 = vmatmul.mubr.msk.f32.gmra.mxu1 %vm863_vm6, %v4030_v0 }
 0xbb8   : > { %4274 = vmatprep.mubr.f32.mxu1 %v9611_v45 }
 0xbbb   : > { %5321 = vmatmul.mubr.msk.f32.gmra.mxu1 %vm863_vm6, %v4031_v31 }
 0xbbc   : > { %4280 = vmatprep.mubr.f32.mxu1 %v9611_v45 }
 0xbbf   : > { %5322 = vmatmul.mubr.msk.f32.gmra.mxu1 %vm863_vm6, %v4032_v60 }
 0xbc0   : > { %4286 = vmatprep.mubr.f32.mxu1 %v9611_v45 }
 0xbc3   : > { %5323 = vmatmul.mubr.msk.f32.gmra.mxu1 %vm863_vm6, %v4033_v19 }
 0xbc4   : > { %4292 = vmatprep.mubr.f32.mxu1 %v9611_v45 }
 0xbc7   : > { %5324 = vmatmul.mubr.msk.f32.gmra.mxu1 %vm863_vm6, %v4034_v55 }
 0xbc8   : > { %4298 = vmatprep.mubr.f32.mxu1 %v9611_v45 }
 0xbcb   : > { %5325 = vmatmul.mubr.msk.f32.gmra.mxu1 %vm863_vm6, %v4035_v12 }
 0xbcc   : > { %4304 = vmatprep.mubr.f32.mxu1 %v9611_v45 }
 0xbcf   : > { %5326 = vmatmul.mubr.msk.f32.gmra.mxu1 %vm863_vm6, %v4036_v36 }
 0xbd0   : > { %4310 = vmatprep.mubr.f32.mxu1 %v9611_v45 }
 0xbd3   : > { %5327 = vmatmul.mubr.msk.f32.gmra.mxu1 %vm863_vm6, %v4037_v10 }
 0xbd4   : > { %4316 = vmatprep.mubr.f32.mxu1 %v9611_v45 }
 0xbd7   : > { %5328 = vmatmul.mubr.msk.f32.gmra.mxu1 %vm863_vm6, %v4038_v3 }
 0xbd8   : > { %4322 = vmatprep.mubr.f32.mxu1 %v9611_v45 }
 0xbdb   : > { %5329 = vmatmul.mubr.msk.f32.gmra.mxu1 %vm863_vm6, %v4039_v28 }
 0xbdc   : > { %4328 = vmatprep.mubr.f32.mxu1 %v9611_v45 }
 0xbdf   : > { %5330 = vmatmul.mubr.msk.f32.gmra.mxu1 %vm863_vm6, %v4056_v2 }
 0xbe0   : > { %4334 = vmatprep.mubr.f32.mxu1 %v9611_v45 }
 0xbe3   : > { %5331 = vmatmul.mubr.msk.f32.gmra.mxu1 %vm863_vm6, %v4057_v59 }
 0xbe4   : > { %4340 = vmatprep.mubr.f32.mxu1 %v9611_v45 }
 0xbe7   : > { %5332 = vmatmul.mubr.msk.f32.gmra.mxu1 %vm863_vm6, %v4058_v48 }
 0xbe8   : > { %4346 = vmatprep.mubr.f32.mxu1 %v9611_v45 }
 0xbeb   : > { %5333 = vmatmul.mubr.msk.f32.gmra.mxu1 %vm863_vm6, %v4059_v50 }
 0xbec   : > { %4352 = vmatprep.mubr.f32.mxu1 %v9611_v45 }
 0xbef   : > { %5334 = vmatmul.mubr.msk.f32.gmra.mxu1 %vm863_vm6, %v4060_v30 }
 0xbf0   : > { %4358 = vmatprep.mubr.f32.mxu1 %v9611_v45 }
 0xbf3   : > { %5335 = vmatmul.mubr.msk.f32.gmra.mxu1 %vm863_vm6, %v4061_v26 }
 0xbf4   : > { %4364 = vmatprep.mubr.f32.mxu1 %v9611_v45 }
 0xbf7   : > { %5336 = vmatmul.mubr.msk.f32.gmra.mxu1 %vm863_vm6, %v4062_v41 }
 0xbf8   : > { %4370 = vmatprep.mubr.f32.mxu1 %v9611_v45 }
 0xbfb   : > { %5337 = vmatmul.mubr.msk.f32.gmra.mxu1 %vm863_vm6, %v4063_v9 }
 0xbfc   : > { %4376 = vmatprep.mubr.f32.mxu1 %v9611_v45 }
 0xbff   : > { %5338 = vmatmul.mubr.msk.f32.gmra.mxu1 %vm863_vm6, %v4064_v49 }
 0xc00   : > { %4382 = vmatprep.mubr.f32.mxu1 %v9611_v45 }
 0xc03   : > { %5339 = vmatmul.mubr.msk.f32.gmra.mxu1 %vm863_vm6, %v4065_v23 }
 0xc04   : > { %4388 = vmatprep.mubr.f32.mxu1 %v9611_v45 }
 0xc07   : > { %5340 = vmatmul.mubr.msk.f32.gmra.mxu1 %vm863_vm6, %v4066_v8 }
 0xc08   : > { %4394 = vmatprep.mubr.f32.mxu1 %v9611_v45 }
 0xc0b   : > { %5341 = vmatmul.mubr.msk.f32.gmra.mxu1 %vm863_vm6, %v4067_v44 }
 0xc0c   : > { %4400 = vmatprep.mubr.f32.mxu1 %v9611_v45 }
 0xc0f   : > { %5342 = vmatmul.mubr.msk.f32.gmra.mxu1 %vm863_vm6, %v4068_v37 }
 0xc10   : > { %4406 = vmatprep.mubr.f32.mxu1 %v9611_v45 }
 0xc13   : > { %5343 = vmatmul.mubr.msk.f32.gmra.mxu1 %vm863_vm6, %v4069_v5 }
 0xc14   : > { %4412 = vmatprep.mubr.f32.mxu1 %v9611_v45 }
 0xc17   : > { %5344 = vmatmul.mubr.msk.f32.gmra.mxu1 %vm863_vm6, %v4070_v43 }
 0xc18   : > { %4418 = vmatprep.mubr.f32.mxu1 %v9611_v45 }
 0xc1b   : > { %5345 = vmatmul.mubr.msk.f32.gmra.mxu1 %vm863_vm6, %v4071_v24 }
 0xc57   : > { %v3993_v7 = vpop.f32.mrf.mxu1 }
 0xc58   : > { %v8602_v18 = vadd.f32 %v3993_v7, %v9620_v62 }
 0xc59   : > { %v3995_v52 = vpop.f32.mrf.mxu1 }
 0xc5a   : > { %9621 = vst [vmem:[#allocation51_spill] sm:$0xff] %v8602_v18  ;;  %v8605_v63 = vadd.f32 %v3995_v52, %v9622_v13 }
 0xc5c   : > { %9623 = vst [vmem:[#allocation50_spill] sm:$0xff] %v8605_v63 }
 0xc5f   : > { %v8607_v42 = vpop.f32.mrf.mxu1 }
 0xc60   : > { %9624 = vst [vmem:[#allocation30_spill] sm:$0xff] %v8607_v42 }
 0xc61   : > { %v8609_v29 = vpop.f32.mrf.mxu1 }
 0xc62   : > { %9625 = vst [vmem:[#allocation37_spill] sm:$0xff] %v8609_v29 }
 0xc63   : > { %v8611_v27 = vpop.f32.mrf.mxu1 }
 0xc65   : > { %v8613_v57 = vpop.f32.mrf.mxu1 }
 0xc66   : > { %v4428_v7 = vmax.f32 %v8611_v27, %v8613_v57 }
 0xc67   : > { %v8615_v61 = vpop.f32.mrf.mxu1 }
 0xc68   : > { %9626 = vst [vmem:[#allocation36_spill] sm:$0xff] %v8615_v61 }
 0xc69   : > { %v8617_v40 = vpop.f32.mrf.mxu1 }
 0xc6a   : > { %9627 = vst [vmem:[#allocation47_spill] sm:$0xff] %v8617_v40  ;;  %v4431_v62 = vmax.f32 %v8615_v61, %v8617_v40 }
 0xc6b   : > { %v8619_v53 = vpop.f32.mrf.mxu1 }
 0xc6d   : > { %v8621_v56 = vpop.f32.mrf.mxu1 }
 0xc6e   : > { %v4434_v37 = vmax.f32 %v8619_v53, %v8621_v56 }
 0xc6f   : > { %v8623_v38 = vpop.f32.mrf.mxu1 }
 0xc71   : > { %v8625_v39 = vpop.f32.mrf.mxu1 }
 0xc72   : > { %9628 = vst [vmem:[#allocation34_spill] sm:$0xff] %v8625_v39  ;;  %v4437_v5 = vmax.f32 %v8623_v38, %v8625_v39 }
 0xc73   : > { %v8627_v20 = vpop.f32.mrf.mxu1 }
 0xc75   : > { %v8629_v54 = vpop.f32.mrf.mxu1 }
 0xc76   : > { %v4440_v49 = vmax.f32 %v8627_v20, %v8629_v54 }
 0xc77   : > { %v8631_v22 = vpop.f32.mrf.mxu1 }
 0xc79   : > { %v8633_v34 = vpop.f32.mrf.mxu1 }
 0xc7a   : > { %v4443_v23 = vmax.f32 %v8631_v22, %v8633_v34 }
 0xc7b   : > { %v8635_v16 = vpop.f32.mrf.mxu1 }
 0xc7d   : > { %v8637_v33 = vpop.f32.mrf.mxu1 }
 0xc7e   : > { %v4446_v28 = vmax.f32 %v8635_v16, %v8637_v33 }
 0xc7f   : > { %v8639_v14 = vpop.f32.mrf.mxu1 }
 0xc81   : > { %v8641_v6 = vpop.f32.mrf.mxu1 }
 0xc82   : > { %v4449_v26 = vmax.f32 %v8639_v14, %v8641_v6 }
 0xc83   : > { %v8643_v15 = vpop.f32.mrf.mxu1 }
 0xc85   : > { %v8645_v11 = vpop.f32.mrf.mxu1 }
 0xc86   : > { %v4452_v10 = vmax.f32 %v8643_v15, %v8645_v11 }
 0xc87   : > { %v8647_v32 = vpop.f32.mrf.mxu1 }
 0xc89   : > { %v8649_v25 = vpop.f32.mrf.mxu1 }
 0xc8a   : > { %v4455_v50 = vmax.f32 %v8647_v32, %v8649_v25 }
 0xc8b   : > { %v8651_v21 = vpop.f32.mrf.mxu1 }
 0xc8d   : > { %v8653_v58 = vpop.f32.mrf.mxu1 }
 0xc8e   : > { %v4458_v12 = vmax.f32 %v8651_v21, %v8653_v58 }
 0xc8f   : > { %v8655_v35 = vpop.f32.mrf.mxu1 }
 0xc91   : > { %v8657_v47 = vpop.f32.mrf.mxu1 }
 0xc92   : > { %v4461_v59 = vmax.f32 %v8655_v35, %v8657_v47 }
 0xc93   : > { %v8659_v1 = vpop.f32.mrf.mxu1 }
 0xc95   : > { %v8661_v46 = vpop.f32.mrf.mxu1 }
 0xc96   : > { %v4464_v60 = vmax.f32 %v8659_v1, %v8661_v46 }
 0xc97   : > { %v8663_v51 = vpop.f32.mrf.mxu1 }
 0xc99   : > { %v8665_v17 = vpop.f32.mrf.mxu1 }
 0xc9a   : > { %v4467_v4 = vmax.f32 %v8663_v51, %v8665_v17 }
 0xc9b   : > { %v8669_v0 = vpop.f32.mrf.mxu1 }
 0xc9c   : > { %4468 = vmax.xlane.f32.xlu1 %v4467_v4  ;;  %v4425_v4 = vmax.f32 %v8607_v42, %v8609_v29 }
 0xc9d   : > { %v8671_v31 = vpop.f32.mrf.mxu1 }
 0xc9e   : > { %v4470_v19 = vmax.f32 %v8669_v0, %v8671_v31 }
 0xc9f   : > { %v8677_v55 = vpop.f32.mrf.mxu1 }
 0xca0   : > { %9629 = vst [vmem:[#allocation8_spill] sm:$0xff] %v8677_v55  ;;  %4465 = vmax.xlane.f32.xlu1 %v4464_v60  ;;  %4471 = vmax.xlane.f32.xlu0 %v4470_v19 }
 0xca1   : > { %v8679_v2 = vpop.f32.mrf.mxu1 }
 0xca2   : > { %9630 = vst [vmem:[#allocation10_spill] sm:$0xff] %v8679_v2 }
 0xca3   : > { %v8685_v36 = vpop.f32.mrf.mxu1 }
 0xca4   : > { %9631 = vst [vmem:[#allocation12_spill] sm:$0xff] %v8685_v36  ;;  %4459 = vmax.xlane.f32.xlu1 %v4458_v12  ;;  %4462 = vmax.xlane.f32.xlu0 %v4461_v59 }
 0xca5   : > { %v8687_v48 = vpop.f32.mrf.mxu1 }
 0xca6   : > { %9632 = vst [vmem:[#allocation29_spill] sm:$0xff] %v8687_v48 }
 0xca7   : > { %v8693_v3 = vpop.f32.mrf.mxu1 }
 0xca8   : > { %9633 = vst [vmem:[#allocation33_spill] sm:$0xff] %v8693_v3  ;;  %4453 = vmax.xlane.f32.xlu1 %v4452_v10  ;;  %4456 = vmax.xlane.f32.xlu0 %v4455_v50 }
 0xca9   : > { %v8695_v30 = vpop.f32.mrf.mxu1 }
 0xcaa   : > { %9634 = vst [vmem:[#allocation43_spill] sm:$0xff] %v8695_v30 }
 0xcab   : > { %v8701_v41 = vpop.f32.mrf.mxu1 }
 0xcac   : > { %9635 = vst [vmem:[#allocation48_spill] sm:$0xff] %v8701_v41  ;;  %4447 = vmax.xlane.f32.xlu1 %v4446_v28  ;;  %4450 = vmax.xlane.f32.xlu0 %v4449_v26 }
 0xcad   : > { %v8703_v9 = vpop.f32.mrf.mxu1 }
 0xcae   : > { %9636 = vst [vmem:[#allocation42_spill] sm:$0xff] %v8703_v9 }
 0xcaf   : > { %v8709_v8 = vpop.f32.mrf.mxu1 }
 0xcb0   : > { %4441 = vmax.xlane.f32.xlu1 %v4440_v49  ;;  %4444 = vmax.xlane.f32.xlu0 %v4443_v23 }
 0xcb1   : > { %v8711_v44 = vpop.f32.mrf.mxu1 }
 0xcb2   : > { %9637 = vst [vmem:[#allocation31_spill] sm:$0xff] %v8711_v44 }
 0xcb3   : > { %v8717_v43 = vpop.f32.mrf.mxu1 }
 0xcb4   : > { %4435 = vmax.xlane.f32.xlu1 %v4434_v37  ;;  %4438 = vmax.xlane.f32.xlu0 %v4437_v5 }
 0xcb5   : > { %v8719_v24 = vpop.f32.mrf.mxu1 }
 0xcb6   : > { %9638 = vst [vmem:[#allocation40_spill] sm:$0xff] %v8719_v24 }
 0xcb7   : > { %v8725_v52 = vpop.f32.mrf.mxu1 }
 0xcb8   : > { %4429 = vmax.xlane.f32.xlu1 %v4428_v7  ;;  %4432 = vmax.xlane.f32.xlu0 %v4431_v62 }
 0xcb9   : > { %v8727_v13 = vpop.f32.mrf.mxu1 }
 0xcbb   : > { %v8731_v60 = vpop.f32.mrf.mxu1 }
 0xcbc   : > { %4426 = vmax.xlane.f32.xlu0 %v4425_v4 }
 0xcbd   : > { %v8733_v19 = vpop.f32.mrf.mxu1 }
 0xcbf   : > { %v8735_v12 = vpop.f32.mrf.mxu1 }
 0xcc1   : > { %v8737_v59 = vpop.f32.mrf.mxu1 }
 0xcc3   : > { %v8739_v10 = vpop.f32.mrf.mxu1 }
 0xcc5   : > { %v8741_v50 = vpop.f32.mrf.mxu1 }
 0xcc7   : > { %v8743_v28 = vpop.f32.mrf.mxu1 }
 0xcc9   : > { %v8745_v26 = vpop.f32.mrf.mxu1 }
 0xcca   : > { %v4503_v61 = vmax.f32 %v8743_v28, %v8745_v26 }
 0xccb   : > { %v8747_v49 = vpop.f32.mrf.mxu1 }
 0xccd   : > { %v8749_v23 = vpop.f32.mrf.mxu1 }
 0xccf   : > { %v8751_v37 = vpop.f32.mrf.mxu1 }
 0xcd1   : > { %v8753_v5 = vpop.f32.mrf.mxu1 }
 0xcd2   : > { %9639 = vst [vmem:[#allocation32_spill] sm:$0xff] %v8753_v5  ;;  %v4509_v42 = vmax.f32 %v8751_v37, %v8753_v5  ;;  %v4500_v5 = vmax.f32 %v8739_v10, %v8741_v50 }
 0xcd3   : > { %v8755_v7 = vpop.f32.mrf.mxu1 }
 0xcd5   : > { %v8757_v62 = vpop.f32.mrf.mxu1 }
 0xcd6   : > { %v4512_v39 = vmax.f32 %v8755_v7, %v8757_v62 }
 0xcd7   : > { %v8759_v4 = vpop.f32.mrf.mxu1 }
 0xcd9   : > { %v8761_v63 = vpop.f32.mrf.mxu1 }
 0xcda   : > { %v4515_v18 = vmax.f32 %v8759_v4, %v8761_v63 }
 0xcdb   : > { %v8765_v45 = vpop.f32.mrf.mxu1 }
 0xcdc   : > { %4516 = vmax.xlane.f32.xlu0 %v4515_v18  ;;  %v4506_v18 = vmax.f32 %v8747_v49, %v8749_v23 }
 0xcdd   : > { %v8767_v29 = vpop.f32.mrf.mxu1 }
 0xcde   : > { %v4518_v40 = vmax.f32 %v8765_v45, %v8767_v29 }
 0xce0   : > { %4510 = vmax.xlane.f32.xlu0 %v4509_v42  ;;  %4519 = vmax.xlane.f32.xlu1 %v4518_v40  ;;  %v4497_v42 = vmax.f32 %v8735_v12, %v8737_v59  ;;  %v4494_v40 = vmax.f32 %v8731_v60, %v8733_v19 }
 0xce4   : > { %4504 = vmax.xlane.f32.xlu0 %v4503_v61  ;;  %4513 = vmax.xlane.f32.xlu1 %v4512_v39  ;;  %v4491_v61 = vmax.f32 %v8725_v52, %v8727_v13  ;;  %v4488_v39 = vmax.f32 %v8717_v43, %v8719_v24 }
 0xce8   : > { %4507 = vmax.xlane.f32.xlu1 %v4506_v18  ;;  %v4485_v18 = vmax.f32 %v8709_v8, %v8711_v44 }
 0xcec   : > { %4501 = vmax.xlane.f32.xlu1 %v4500_v5  ;;  %v4482_v5 = vmax.f32 %v8701_v41, %v8703_v9 }
 0xcf0   : > { %4498 = vmax.xlane.f32.xlu1 %v4497_v42  ;;  %v4479_v42 = vmax.f32 %v8693_v3, %v8695_v30 }
 0xcf4   : > { %4495 = vmax.xlane.f32.xlu1 %v4494_v40  ;;  %v4476_v40 = vmax.f32 %v8685_v36, %v8687_v48 }
 0xcf8   : > { %4492 = vmax.xlane.f32.xlu1 %v4491_v61  ;;  %v4473_v61 = vmax.f32 %v8677_v55, %v8679_v2 }
 0xcfc   : > { %4489 = vmax.xlane.f32.xlu1 %v4488_v39 }
 0xd00   : > { %4486 = vmax.xlane.f32.xlu1 %v4485_v18 }
 0xd04   : > { %4483 = vmax.xlane.f32.xlu1 %v4482_v5 }
 0xd08   : > { %4480 = vmax.xlane.f32.xlu1 %v4479_v42 }
 0xd0c   : > { %4477 = vmax.xlane.f32.xlu1 %v4476_v40 }
 0xd10   : > { %4474 = vmax.xlane.f32.xlu1 %v4473_v61 }
 0xd25   : > { %v4469_v39 = vpop.xlane.xlu1 %4468 }
 0xd26   : > { %v4549_v18 = vsub.f32 %v8663_v51, %v4469_v39  ;;  %v4550_v5 = vsub.f32 %v8665_v17, %v4469_v39 }
 0xd28   : > { %v4641_v48 = vmul.f32 1.442695, %v4549_v18  ;;  %v4643_v36 = vmul.f32 1.442695, %v4550_v5 }
 0xd29   : > { %v4466_v24 = vpop.xlane.xlu1 %4465  ;;  %v4472_v44 = vpop.xlane.xlu0 %4471 }
 0xd2a   : > { %v4551_v9 = vsub.f32 %v8669_v0, %v4472_v44  ;;  %v4552_v30 = vsub.f32 %v8671_v31, %v4472_v44  ;;  %v4547_v40 = vsub.f32 %v8659_v1, %v4466_v24  ;;  %v4548_v61 = vsub.f32 %v8661_v46, %v4466_v24 }
 0xd2c   : > { %v4645_v42 = vmul.f32 1.442695, %v4551_v9  ;;  %v4647_v3 = vmul.f32 1.442695, %v4552_v30  ;;  %v4637_v0 = vmul.f32 1.442695, %v4547_v40 }
 0xd2d   : > { %v4460_v41 = vpop.xlane.xlu1 %4459  ;;  %v4463_v2 = vpop.xlane.xlu0 %4462  ;;  %v4639_v31 = vmul.f32 1.442695, %v4548_v61 }
 0xd2e   : > { %5981 = vpow2.f32 %v4645_v42  ;;  %v4543_v51 = vsub.f32 %v8651_v21, %v4460_v41  ;;  %v4545_v17 = vsub.f32 %v8655_v35, %v4463_v2  ;;  %v4546_v30 = vsub.f32 %v8657_v47, %v4463_v2 }
 0xd2f   : > { %5983 = vpow2.f32 %v4647_v3  ;;  %v4544_v9 = vsub.f32 %v8653_v58, %v4460_v41 }
 0xd30   : > { %5985 = vpow2.f32 %v4641_v48  ;;  %v4629_v1 = vmul.f32 1.442695, %v4543_v51  ;;  %v4633_v46 = vmul.f32 1.442695, %v4545_v17  ;;  %v4635_v3 = vmul.f32 1.442695, %v4546_v30 }
 0xd31   : > { %v4454_v55 = vpop.xlane.xlu1 %4453  ;;  %5987 = vpow2.f32 %v4643_v36  ;;  %v4457_v44 = vpop.xlane.xlu0 %4456  ;;  %v4631_v48 = vmul.f32 1.442695, %v4544_v9 }
 0xd32   : > { %5989 = vpow2.f32 %v4637_v0  ;;  %v4541_v21 = vsub.f32 %v8647_v32, %v4457_v44  ;;  %v4542_v35 = vsub.f32 %v8649_v25, %v4457_v44  ;;  %v4539_v41 = vsub.f32 %v8643_v15, %v4454_v55 }
 0xd33   : > { %5991 = vpow2.f32 %v4639_v31  ;;  %v4540_v32 = vsub.f32 %v8645_v11, %v4454_v55 }
 0xd34   : > { %5993 = vpow2.f32 %v4629_v1  ;;  %v4625_v24 = vmul.f32 1.442695, %v4541_v21  ;;  %v4627_v40 = vmul.f32 1.442695, %v4542_v35  ;;  %v4621_v17 = vmul.f32 1.442695, %v4539_v41 }
 0xd35   : > { %v8809_v39 = vpop.xlane.xlu1 %4447  ;;  %5995 = vpow2.f32 %v4633_v46  ;;  %v4451_v2 = vpop.xlane.xlu0 %4450  ;;  %v4623_v31 = vmul.f32 1.442695, %v4540_v32 }
 0xd36   : > { %5997 = vpow2.f32 %v4635_v3  ;;  %v4538_v46 = vsub.f32 %v8641_v6, %v4451_v2  ;;  %v4536_v6 = vsub.f32 %v8637_v33, %v8809_v39 }
 0xd37   : > { %5999 = vpow2.f32 %v4631_v48 }
 0xd38   : > { %v4615_v32 = vmul.f32 1.442695, %v4536_v6 }
 0xd39   : > { %v4442_v36 = vpop.xlane.xlu1 %4441  ;;  %v4445_v30 = vpop.xlane.xlu0 %4444 }
 0xd3a   : > { %v4531_v47 = vsub.f32 %v8627_v20, %v4442_v36  ;;  %v4532_v58 = vsub.f32 %v8629_v54, %v4442_v36  ;;  %v4534_v33 = vsub.f32 %v8633_v34, %v4445_v30 }
 0xd3b   : > { %v8816_v42 = vpop.eup %5981 }
 0xd3c   : > { %v4605_v18 = vmul.f32 1.442695, %v4531_v47  ;;  %v4607_v5 = vmul.f32 1.442695, %v4532_v58  ;;  %v8819_v61 = vpop.eup %5983  ;;  %v4619_v47 = vmul.f32 1.442695, %v4538_v46 }
 0xd3d   : > { %v4436_v25 = vpop.xlane.xlu1 %4435  ;;  %v8823_v51 = vpop.eup %5985  ;;  %v4758_v15 = vadd.f32 %v8819_v61, %v8816_v42  ;;  %v4611_v34 = vmul.f32 1.442695, %v4534_v33  ;;  %v9641_v46 = vld [vmem:[#allocation36_spill] sm:$0xff] }
 0xd3e   : > { %6001 = vpow2.f32 %v4605_v18  ;;  %v4527_v20 = vsub.f32 %v8619_v53, %v4436_v25  ;;  %v4528_v54 = vsub.f32 %v8621_v56, %v4436_v25  ;;  %v8827_v0 = vpop.eup %5987  ;;  %v4537_v53 = vsub.f32 %v8639_v14, %v4451_v2  ;;  %v4439_v58 = vpop.xlane.xlu0 %4438 }
 0xd3f   : > { %6003 = vpow2.f32 %v4607_v5  ;;  %4759 = vadd.xlane.f32.xlu0 %v4758_v15  ;;  %v8832_v44 = vpop.eup %5989  ;;  %v4755_v3 = vadd.f32 %v8827_v0, %v8823_v51 }
 0xd40   : > { %6005 = vpow2.f32 %v4625_v24  ;;  %v4597_v11 = vmul.f32 1.442695, %v4527_v20  ;;  %v4599_v55 = vmul.f32 1.442695, %v4528_v54  ;;  %v8837_v21 = vpop.eup %5991 }
 0xd41   : > { %6007 = vpow2.f32 %v4627_v40  ;;  %v4430_v9 = vpop.xlane.xlu1 %4429  ;;  %v8839_v14 = vpop.eup %5993  ;;  %v4752_v2 = vadd.f32 %v8837_v21, %v8832_v44 }
 0xd42   : > { %6009 = vpow2.f32 %v4597_v11  ;;  %v4523_v56 = vsub.f32 %v8611_v27, %v4430_v9  ;;  %v4524_v1 = vsub.f32 %v8613_v57, %v4430_v9  ;;  %v4535_v27 = vsub.f32 %v8635_v16, %v8809_v39  ;;  %v8843_v36 = vpop.eup %5995  ;;  %v4433_v20 = vpop.xlane.xlu0 %4432 }
 0xd43   : > { %6011 = vpow2.f32 %v4599_v55  ;;  %4756 = vadd.xlane.f32.xlu0 %v4755_v3  ;;  %v4617_v57 = vmul.f32 1.442695, %v4537_v53  ;;  %v8849_v41 = vpop.eup %5997  ;;  %v4533_v16 = vsub.f32 %v8631_v22, %v4445_v30  ;;  %v9640_v55 = vld [vmem:[#allocation34_spill] sm:$0xff]  ;;  %v4525_v3 = vsub.f32 %v9641_v46, %v4433_v20 }
 0xd44   : > { %6013 = vpow2.f32 %v4621_v17  ;;  %v4589_v48 = vmul.f32 1.442695, %v4523_v56  ;;  %v4591_v35 = vmul.f32 1.442695, %v4524_v1  ;;  %v8851_v24 = vpop.eup %5999  ;;  %v4613_v18 = vmul.f32 1.442695, %v4535_v27 }
 0xd45   : > { %6015 = vpow2.f32 %v4623_v31  ;;  %v4749_v39 = vadd.f32 %v8849_v41, %v8843_v36  ;;  %v4609_v22 = vmul.f32 1.442695, %v4533_v16  ;;  %v4529_v17 = vsub.f32 %v8623_v38, %v4439_v58  ;;  %v9643_v27 = vld [vmem:[#allocation47_spill] sm:$0xff]  ;;  %v9644_v16 = vld [vmem:[#allocation30_spill] sm:$0xff] }
 0xd46   : > { %6017 = vpow2.f32 %v4589_v48  ;;  %v4530_v31 = vsub.f32 %v9640_v55, %v4439_v58  ;;  %v4746_v30 = vadd.f32 %v8851_v24, %v8839_v14  ;;  %v4427_v6 = vpop.xlane.xlu0 %4426 }
 0xd47   : > { %6019 = vpow2.f32 %v4591_v35  ;;  %4753 = vadd.xlane.f32.xlu0 %v4752_v2  ;;  %v4601_v38 = vmul.f32 1.442695, %v4529_v17 }
 0xd48   : > { %6021 = vpow2.f32 %v4617_v57  ;;  %v4603_v35 = vmul.f32 1.442695, %v4530_v31  ;;  %v4526_v57 = vsub.f32 %v9643_v27, %v4433_v20  ;;  %v9645_v20 = vld [vmem:[#allocation37_spill] sm:$0xff] }
 0xd49   : > { %6023 = vpow2.f32 %v4619_v47 }
 0xd4a   : > { %6025 = vpow2.f32 %v4613_v18  ;;  %v4593_v18 = vmul.f32 1.442695, %v4525_v3 }
 0xd4b   : > { %v8854_v5 = vpop.eup %6001  ;;  %4750 = vadd.xlane.f32.xlu0 %v4749_v39  ;;  %6027 = vpow2.f32 %v4615_v32  ;;  %v4521_v32 = vsub.f32 %v9644_v16, %v4427_v6  ;;  %v4595_v39 = vmul.f32 1.442695, %v4526_v57 }
 0xd4c   : > { %v8859_v40 = vpop.eup %6003  ;;  %6029 = vpow2.f32 %v4609_v22 }
 0xd4d   : > { %v8861_v25 = vpop.eup %6005  ;;  %v4728_v54 = vadd.f32 %v8859_v40, %v8854_v5  ;;  %6031 = vpow2.f32 %v4611_v34  ;;  %v4585_v34 = vmul.f32 1.442695, %v4521_v32 }
 0xd4e   : > { %v8865_v15 = vpop.eup %6007  ;;  %6033 = vpow2.f32 %v4601_v38 }
 0xd4f   : > { %v8868_v11 = vpop.eup %6009  ;;  %4729 = vadd.xlane.f32.xlu1 %v4728_v54  ;;  %4747 = vadd.xlane.f32.xlu0 %v4746_v30  ;;  %v4743_v47 = vadd.f32 %v8865_v15, %v8861_v25  ;;  %6035 = vpow2.f32 %v4603_v35  ;;  %v4522_v54 = vsub.f32 %v9645_v20, %v4427_v6 }
 0xd50   : > { %v8873_v9 = vpop.eup %6011  ;;  %6037 = vpow2.f32 %v4593_v18 }
 0xd51   : > { %v8875_v53 = vpop.eup %6013  ;;  %v4722_v56 = vadd.f32 %v8873_v9, %v8868_v11  ;;  %6039 = vpow2.f32 %v4595_v39  ;;  %v4587_v31 = vmul.f32 1.442695, %v4522_v54 }
 0xd52   : > { %v8879_v1 = vpop.eup %6015  ;;  %6041 = vpow2.f32 %v4585_v34 }
 0xd53   : > { %v8882_v48 = vpop.eup %6017  ;;  %4723 = vadd.xlane.f32.xlu1 %v4722_v56  ;;  %4744 = vadd.xlane.f32.xlu0 %v4743_v47  ;;  %v4740_v22 = vadd.f32 %v8879_v1, %v8875_v53  ;;  %6043 = vpow2.f32 %v4587_v31 }
 0xd54   : > { %9642 = vst [vmem:[#allocation22_spill] sm:$0xff] %v8882_v48  ;;  %v8887_v58 = vpop.eup %6019 }
 0xd55   : > { %v4716_v2 = vadd.f32 %v8887_v58, %v8882_v48  ;;  %v8892_v33 = vpop.eup %6021 }
 0xd56   : > { %v8897_v17 = vpop.eup %6023 }
 0xd57   : > { %4717 = vadd.xlane.f32.xlu1 %v4716_v2  ;;  %4741 = vadd.xlane.f32.xlu0 %v4740_v22  ;;  %v8899_v55 = vpop.eup %6025  ;;  %v4737_v30 = vadd.f32 %v8897_v17, %v8892_v33 }
 0xd58   : > { %v8903_v56 = vpop.eup %6027 }
 0xd59   : > { %v8905_v38 = vpop.eup %6029  ;;  %v4734_v46 = vadd.f32 %v8903_v56, %v8899_v55 }
 0xd5a   : > { %v8909_v3 = vpop.eup %6031 }
 0xd5b   : > { %4738 = vadd.xlane.f32.xlu0 %v4737_v30  ;;  %v8911_v35 = vpop.eup %6033  ;;  %v4731_v27 = vadd.f32 %v8909_v3, %v8905_v38  ;;  %v9646_v30 = vld [vmem:[#allocation32_spill] sm:$0xff] }
 0xd5c   : > { %v8915_v57 = vpop.eup %6035 }
 0xd5d   : > { %v8919_v18 = vpop.eup %6037  ;;  %v4725_v16 = vadd.f32 %v8915_v57, %v8911_v35 }
 0xd5e   : > { %v8923_v32 = vpop.eup %6039 }
 0xd5f   : > { %4735 = vadd.xlane.f32.xlu0 %v4734_v46 }
 0xd63   : > { %4732 = vadd.xlane.f32.xlu0 %v4731_v27  ;;  %v4719_v27 = vadd.f32 %v8923_v32, %v8919_v18 }
 0xd65   : > { %v4517_v6 = vpop.xlane.xlu0 %4516 }
 0xd66   : > { %v4581_v47 = vsub.f32 %v8759_v4, %v4517_v6  ;;  %v4582_v2 = vsub.f32 %v8761_v63, %v4517_v6  ;;  %v8928_v63 = vpop.eup %6041 }
 0xd67   : > { %4726 = vadd.xlane.f32.xlu0 %v4725_v16  ;;  %v8933_v6 = vpop.eup %6043 }
 0xd68   : > { %v4705_v39 = vmul.f32 1.442695, %v4581_v47  ;;  %v4707_v20 = vmul.f32 1.442695, %v4582_v2 }
 0xd69   : > { %v4520_v54 = vpop.xlane.xlu1 %4519  ;;  %v4511_v22 = vpop.xlane.xlu0 %4510 }
 0xd6a   : > { %6045 = vpow2.f32 %v4705_v39  ;;  %v4583_v34 = vsub.f32 %v8765_v45, %v4520_v54  ;;  %v4584_v31 = vsub.f32 %v8767_v29, %v4520_v54  ;;  %v4577_v4 = vsub.f32 %v8751_v37, %v4511_v22 }
 0xd6b   : > { %6047 = vpow2.f32 %v4707_v20  ;;  %v4578_v46 = vsub.f32 %v9646_v30, %v4511_v22  ;;  %4720 = vadd.xlane.f32.xlu0 %v4719_v27  ;;  %v4713_v22 = vadd.f32 %v8933_v6, %v8928_v63 }
 0xd6c   : > { %v4709_v47 = vmul.f32 1.442695, %v4583_v34  ;;  %v4711_v2 = vmul.f32 1.442695, %v4584_v31  ;;  %v4697_v16 = vmul.f32 1.442695, %v4577_v4 }
 0xd6d   : > { %v4699_v39 = vmul.f32 1.442695, %v4578_v46  ;;  %v4514_v45 = vpop.xlane.xlu1 %4513  ;;  %v4505_v48 = vpop.xlane.xlu0 %4504 }
 0xd6e   : > { %6049 = vpow2.f32 %v4709_v47  ;;  %v4579_v29 = vsub.f32 %v8755_v7, %v4514_v45  ;;  %v4580_v37 = vsub.f32 %v8757_v62, %v4514_v45  ;;  %v4573_v20 = vsub.f32 %v8743_v28, %v4505_v48 }
 0xd6f   : > { %6051 = vpow2.f32 %v4711_v2  ;;  %v4574_v54 = vsub.f32 %v8745_v26, %v4505_v48  ;;  %4714 = vadd.xlane.f32.xlu0 %v4713_v22 }
 0xd70   : > { %6053 = vpow2.f32 %v4697_v16  ;;  %v4701_v34 = vmul.f32 1.442695, %v4579_v29  ;;  %v4703_v31 = vmul.f32 1.442695, %v4580_v37  ;;  %v4689_v4 = vmul.f32 1.442695, %v4573_v20 }
 0xd71   : > { %6055 = vpow2.f32 %v4699_v39  ;;  %v4691_v30 = vmul.f32 1.442695, %v4574_v54  ;;  %v4508_v46 = vpop.xlane.xlu1 %4507 }
 0xd72   : > { %6057 = vpow2.f32 %v4701_v34  ;;  %v4575_v7 = vsub.f32 %v8747_v49, %v4508_v46  ;;  %v4576_v62 = vsub.f32 %v8749_v23, %v4508_v46 }
 0xd73   : > { %6059 = vpow2.f32 %v4703_v31 }
 0xd74   : > { %6061 = vpow2.f32 %v4689_v4  ;;  %v4693_v28 = vmul.f32 1.442695, %v4575_v7  ;;  %v4695_v26 = vmul.f32 1.442695, %v4576_v62 }
 0xd75   : > { %6063 = vpow2.f32 %v4691_v30  ;;  %v4502_v48 = vpop.xlane.xlu1 %4501 }
 0xd76   : > { %6065 = vpow2.f32 %v4693_v28  ;;  %v4571_v27 = vsub.f32 %v8739_v10, %v4502_v48  ;;  %v4572_v47 = vsub.f32 %v8741_v50, %v4502_v48 }
 0xd77   : > { %v8945_v2 = vpop.eup %6045  ;;  %6067 = vpow2.f32 %v4695_v26 }
 0xd78   : > { %v8947_v16 = vpop.eup %6047  ;;  %v4685_v39 = vmul.f32 1.442695, %v4571_v27  ;;  %v4687_v49 = vmul.f32 1.442695, %v4572_v47 }
 0xd79   : > { %v4499_v45 = vpop.xlane.xlu1 %4498  ;;  %v4803_v23 = vadd.f32 %v8947_v16, %v8945_v2 }
 0xd7a   : > { %6069 = vpow2.f32 %v4685_v39  ;;  %v4569_v29 = vsub.f32 %v8735_v12, %v4499_v45  ;;  %v4570_v37 = vsub.f32 %v8737_v59, %v4499_v45 }
 0xd7b   : > { %v8953_v20 = vpop.eup %6049  ;;  %6071 = vpow2.f32 %v4687_v49  ;;  %4804 = vadd.xlane.f32.xlu0 %v4803_v23 }
 0xd7c   : > { %v8955_v10 = vpop.eup %6051  ;;  %v4681_v50 = vmul.f32 1.442695, %v4569_v29  ;;  %v4683_v54 = vmul.f32 1.442695, %v4570_v37 }
 0xd7d   : > { %v8957_v22 = vpop.eup %6053  ;;  %v4496_v34 = vpop.xlane.xlu1 %4495  ;;  %v4806_v31 = vadd.f32 %v8955_v10, %v8953_v20 }
 0xd7e   : > { %v8961_v4 = vpop.eup %6055  ;;  %6073 = vpow2.f32 %v4681_v50  ;;  %v4567_v12 = vsub.f32 %v8731_v60, %v4496_v34  ;;  %v4568_v59 = vsub.f32 %v8733_v19, %v4496_v34 }
 0xd7f   : > { %v8965_v30 = vpop.eup %6057  ;;  %6075 = vpow2.f32 %v4683_v54  ;;  %4807 = vadd.xlane.f32.xlu1 %v4806_v31  ;;  %v4797_v46 = vadd.f32 %v8961_v4, %v8957_v22 }
 0xd80   : > { %v8969_v7 = vpop.eup %6059  ;;  %v4677_v62 = vmul.f32 1.442695, %v4567_v12  ;;  %v4679_v28 = vmul.f32 1.442695, %v4568_v59 }
 0xd81   : > { %v8971_v26 = vpop.eup %6061  ;;  %4798 = vadd.xlane.f32.xlu0 %v4797_v46  ;;  %v4493_v48 = vpop.xlane.xlu1 %4492  ;;  %v4800_v60 = vadd.f32 %v8969_v7, %v8965_v30 }
 0xd82   : > { %v8975_v27 = vpop.eup %6063  ;;  %6077 = vpow2.f32 %v4677_v62  ;;  %v4565_v19 = vsub.f32 %v8725_v52, %v4493_v48  ;;  %v4566_v47 = vsub.f32 %v8727_v13, %v4493_v48  ;;  %v9647_v13 = vld [vmem:[#allocation40_spill] sm:$0xff]  ;;  %v9648_v48 = vld [vmem:[#allocation31_spill] sm:$0xff] }
 0xd83   : > { %v8979_v39 = vpop.eup %6065  ;;  %6079 = vpow2.f32 %v4679_v28  ;;  %4801 = vadd.xlane.f32.xlu1 %v4800_v60  ;;  %v4791_v49 = vadd.f32 %v8975_v27, %v8971_v26 }
 0xd84   : > { %v8983_v45 = vpop.eup %6067  ;;  %v4673_v23 = vmul.f32 1.442695, %v4565_v19  ;;  %v4675_v29 = vmul.f32 1.442695, %v4566_v47 }
 0xd85   : > { %4792 = vadd.xlane.f32.xlu0 %v4791_v49  ;;  %v4490_v37 = vpop.xlane.xlu1 %4489  ;;  %v4794_v50 = vadd.f32 %v8983_v45, %v8979_v39 }
 0xd86   : > { %6081 = vpow2.f32 %v4673_v23  ;;  %v4563_v52 = vsub.f32 %v8717_v43, %v4490_v37  ;;  %v4564_v54 = vsub.f32 %v9647_v13, %v4490_v37  ;;  %v9649_v37 = vld [vmem:[#allocation48_spill] sm:$0xff] }
 0xd87   : > { %v8989_v34 = vpop.eup %6069  ;;  %6083 = vpow2.f32 %v4675_v29  ;;  %4795 = vadd.xlane.f32.xlu1 %v4794_v50 }
 0xd88   : > { %v8991_v31 = vpop.eup %6071  ;;  %v4669_v12 = vmul.f32 1.442695, %v4563_v52  ;;  %v4671_v59 = vmul.f32 1.442695, %v4564_v54  ;;  %v9650_v52 = vld [vmem:[#allocation42_spill] sm:$0xff] }
 0xd89   : > { %v4487_v46 = vpop.xlane.xlu1 %4486  ;;  %v4788_v62 = vadd.f32 %v8991_v31, %v8989_v34 }
 0xd8a   : > { %6085 = vpow2.f32 %v4669_v12  ;;  %v4561_v28 = vsub.f32 %v8709_v8, %v4487_v46  ;;  %v4562_v60 = vsub.f32 %v9648_v48, %v4487_v46 }
 0xd8b   : > { %v8997_v43 = vpop.eup %6073  ;;  %6087 = vpow2.f32 %v4671_v59  ;;  %4789 = vadd.xlane.f32.xlu1 %v4788_v62 }
 0xd8c   : > { %v8999_v19 = vpop.eup %6075  ;;  %v4665_v47 = vmul.f32 1.442695, %v4561_v28  ;;  %v4667_v49 = vmul.f32 1.442695, %v4562_v60  ;;  %v9653_v28 = vld [vmem:[#allocation33_spill] sm:$0xff]  ;;  %v9654_v60 = vld [vmem:[#allocation43_spill] sm:$0xff] }
 0xd8d   : > { %v4484_v23 = vpop.xlane.xlu1 %4483  ;;  %v4785_v29 = vadd.f32 %v8999_v19, %v8997_v43 }
 0xd8e   : > { %6089 = vpow2.f32 %v4665_v47  ;;  %v4559_v50 = vsub.f32 %v9649_v37, %v4484_v23  ;;  %v4560_v13 = vsub.f32 %v9650_v52, %v4484_v23 }
 0xd8f   : > { %v9005_v8 = vpop.eup %6077  ;;  %6091 = vpow2.f32 %v4667_v49  ;;  %4786 = vadd.xlane.f32.xlu0 %v4785_v29 }
 0xd90   : > { %9651 = vst [vmem:[#allocation21_spill] sm:$0xff] %v9005_v8  ;;  %v9007_v54 = vpop.eup %6079  ;;  %v4661_v12 = vmul.f32 1.442695, %v4559_v50  ;;  %v4663_v59 = vmul.f32 1.442695, %v4560_v13  ;;  %v9657_v13 = vld [vmem:[#allocation12_spill] sm:$0xff] }
 0xd91   : > { %9652 = vst [vmem:[#allocation24_spill] sm:$0xff] %v9007_v54  ;;  %v4481_v46 = vpop.xlane.xlu1 %4480  ;;  %v4782_v62 = vadd.f32 %v9007_v54, %v9005_v8 }
 0xd92   : > { %6093 = vpow2.f32 %v4661_v12  ;;  %v4557_v48 = vsub.f32 %v9653_v28, %v4481_v46  ;;  %v4558_v47 = vsub.f32 %v9654_v60, %v4481_v46  ;;  %v9658_v12 = vld [vmem:[#allocation29_spill] sm:$0xff] }
 0xd93   : > { %v9013_v37 = vpop.eup %6081  ;;  %6095 = vpow2.f32 %v4663_v59  ;;  %4783 = vadd.xlane.f32.xlu1 %v4782_v62 }
 0xd94   : > { %9655 = vst [vmem:[#allocation23_spill] sm:$0xff] %v9013_v37  ;;  %v9015_v23 = vpop.eup %6083  ;;  %v4657_v49 = vmul.f32 1.442695, %v4557_v48  ;;  %v4659_v29 = vmul.f32 1.442695, %v4558_v47  ;;  %v9659_v47 = vld [vmem:[#allocation8_spill] sm:$0xff] }
 0xd95   : > { %9656 = vst [vmem:[#allocation26_spill] sm:$0xff] %v9015_v23  ;;  %v4478_v52 = vpop.xlane.xlu1 %4477  ;;  %v4779_v50 = vadd.f32 %v9015_v23, %v9013_v37 }
 0xd96   : > { %6097 = vpow2.f32 %v4657_v49  ;;  %v4555_v8 = vsub.f32 %v9657_v13, %v4478_v52  ;;  %v4556_v54 = vsub.f32 %v9658_v12, %v4478_v52  ;;  %v9660_v49 = vld [vmem:[#allocation10_spill] sm:$0xff] }
 0xd97   : > { %v9021_v28 = vpop.eup %6085  ;;  %6099 = vpow2.f32 %v4659_v29  ;;  %4780 = vadd.xlane.f32.xlu0 %v4779_v50 }
 0xd98   : > { %v9023_v46 = vpop.eup %6087  ;;  %v4653_v59 = vmul.f32 1.442695, %v4555_v8  ;;  %v4655_v62 = vmul.f32 1.442695, %v4556_v54 }
 0xd99   : > { %v4475_v60 = vpop.xlane.xlu1 %4474  ;;  %v4776_v48 = vadd.f32 %v9023_v46, %v9021_v28 }
 0xd9a   : > { %6101 = vpow2.f32 %v4653_v59  ;;  %v4553_v37 = vsub.f32 %v9659_v47, %v4475_v60  ;;  %v4554_v23 = vsub.f32 %v9660_v49, %v4475_v60 }
 0xd9b   : > { %v9029_v13 = vpop.eup %6089  ;;  %6103 = vpow2.f32 %v4655_v62  ;;  %4777 = vadd.xlane.f32.xlu1 %v4776_v48 }
 0xd9c   : > { %v9031_v52 = vpop.eup %6091  ;;  %v4649_v29 = vmul.f32 1.442695, %v4553_v37  ;;  %v4651_v50 = vmul.f32 1.442695, %v4554_v23 }
 0xd9d   : > { %v4773_v8 = vadd.f32 %v9031_v52, %v9029_v13 }
 0xd9e   : > { %6105 = vpow2.f32 %v4649_v29 }
 0xd9f   : > { %v9035_v54 = vpop.eup %6093  ;;  %6107 = vpow2.f32 %v4651_v50  ;;  %4774 = vadd.xlane.f32.xlu0 %v4773_v8 }
 0xda0   : > { %9661 = vst [vmem:[#allocation25_spill] sm:$0xff] %v9035_v54  ;;  %v9037_v12 = vpop.eup %6095 }
 0xda1   : > { %v4770_v59 = vadd.f32 %v9037_v12, %v9035_v54 }
 0xda3   : > { %v9041_v60 = vpop.eup %6097  ;;  %4771 = vadd.xlane.f32.xlu1 %v4770_v59 }
 0xda4   : > { %9662 = vst [vmem:[#allocation28_spill] sm:$0xff] %v9041_v60  ;;  %v9043_v62 = vpop.eup %6099 }
 0xda5   : > { %9663 = vst [vmem:[#allocation27_spill] sm:$0xff] %v9043_v62  ;;  %v4767_v37 = vadd.f32 %v9043_v62, %v9041_v60 }
 0xda7   : > { %v9047_v23 = vpop.eup %6101  ;;  %4768 = vadd.xlane.f32.xlu0 %v4767_v37 }
 0xda8   : > { %9664 = vst [vmem:[#allocation11_spill] sm:$0xff] %v9047_v23  ;;  %v9049_v48 = vpop.eup %6103 }
 0xda9   : > { %9665 = vst [vmem:[#allocation9_spill] sm:$0xff] %v9049_v48  ;;  %v4764_v47 = vadd.f32 %v9049_v48, %v9047_v23 }
 0xdab   : > { %v9053_v49 = vpop.eup %6105  ;;  %4765 = vadd.xlane.f32.xlu1 %v4764_v47 }
 0xdac   : > { %9666 = vst [vmem:[#allocation6_spill] sm:$0xff] %v9053_v49  ;;  %v9055_v29 = vpop.eup %6107 }
 0xdad   : > { %v4761_v50 = vadd.f32 %v9055_v29, %v9053_v49 }
 0xdaf   : > { %4762 = vadd.xlane.f32.xlu0 %v4761_v50 }
 0xdc8   : > { %v4760_v8 = vpop.xlane.xlu0 %4759 }
 0xdc9   : > { %6109 = vrcp.f32 %v4760_v8 }
 0xdcc   : > { %v4757_v59 = vpop.xlane.xlu0 %4756 }
 0xdcd   : > { %6111 = vrcp.f32 %v4757_v59 }
 0xdd0   : > { %v4754_v60 = vpop.xlane.xlu0 %4753 }
 0xdd1   : > { %6113 = vrcp.f32 %v4754_v60 }
 0xdd4   : > { %v4751_v37 = vpop.xlane.xlu0 %4750 }
 0xdd5   : > { %6115 = vrcp.f32 %v4751_v37 }
 0xdd6   : > { %v6110_v62 = vpop.eup %6109 }
 0xdd7   : > { %v4872_v23 = vmul.f32 %v6110_v62, %v8819_v61  ;;  %v4871_v48 = vmul.f32 %v6110_v62, %v8816_v42 }
 0xdd8   : > { %v4748_v47 = vpop.xlane.xlu0 %4747 }
 0xdd9   : > { %6117 = vrcp.f32 %v4748_v47  ;;  %4905 = vmatprep.subr.mxu0 %v4872_v23 }
 0xdda   : > { %v6112_v54 = vpop.eup %6111  ;;  %4906 = vmatpush1.xpose.msra.mxu0 %v4871_v48 }
 0xddb   : > { %v4870_v50 = vmul.f32 %v6112_v54, %v8827_v0  ;;  %v4869_v8 = vmul.f32 %v6112_v54, %v8823_v51 }
 0xddc   : > { %v4745_v49 = vpop.xlane.xlu0 %4744 }
 0xddd   : > { %6119 = vrcp.f32 %v4745_v49  ;;  %4907 = vmatprep.subr.mxu0 %v4870_v50  ;;  %v4730_v49 = vpop.xlane.xlu1 %4729 }
 0xdde   : > { %v6114_v60 = vpop.eup %6113  ;;  %4908 = vmatpush1.xpose.msra.mxu0 %v4869_v8 }
 0xddf   : > { %v4868_v59 = vmul.f32 %v6114_v60, %v8837_v21  ;;  %v4867_v61 = vmul.f32 %v6114_v60, %v8832_v44  ;;  %v6174_v21 = vld [vmem:[%s9176_s2] sm:$0xf] }
 0xde0   : > { %v4742_v37 = vpop.xlane.xlu0 %4741  ;;  %4994 = vrot.lane.b32.xlu1 %v6174_v21, %s6240_s8 }
 0xde1   : > { %6121 = vrcp.f32 %v4742_v37  ;;  %4909 = vmatprep.subr.mxu0 %v4868_v59 }
 0xde2   : > { %v6116_v42 = vpop.eup %6115  ;;  %4910 = vmatpush1.xpose.msra.mxu0 %v4867_v61  ;;  %v4724_v61 = vpop.xlane.xlu1 %4723 }
 0xde3   : > { %v4866_v62 = vmul.f32 %v6116_v42, %v8849_v41  ;;  %v4865_v0 = vmul.f32 %v6116_v42, %v8843_v36 }
 0xde4   : > { %v4739_v23 = vpop.xlane.xlu0 %4738 }
 0xde5   : > { %6123 = vrcp.f32 %v4739_v23  ;;  %4911 = vmatprep.subr.mxu0 %v4866_v62 }
 0xde6   : > { %v6118_v51 = vpop.eup %6117  ;;  %4912 = vmatpush1.xpose.msra.mxu0 %v4865_v0  ;;  %v4718_v23 = vpop.xlane.xlu1 %4717 }
 0xde7   : > { %v4864_v44 = vmul.f32 %v6118_v51, %v8851_v24  ;;  %v4863_v54 = vmul.f32 %v6118_v51, %v8839_v14 }
 0xde8   : > { %v4736_v48 = vpop.xlane.xlu0 %4735 }
 0xde9   : > { %6125 = vrcp.f32 %v4736_v48  ;;  %4913 = vmatprep.subr.mxu0 %v4864_v44 }
 0xdea   : > { %v6120_v36 = vpop.eup %6119  ;;  %4914 = vmatpush1.xpose.msra.mxu0 %v4863_v54  ;;  %6127 = vrcp.f32 %v4730_v49 }
 0xdeb   : > { %v4862_v41 = vmul.f32 %v6120_v36, %v8865_v15  ;;  %v4861_v47 = vmul.f32 %v6120_v36, %v8861_v25 }
 0xdec   : > { %v4733_v50 = vpop.xlane.xlu0 %4732 }
 0xded   : > { %6129 = vrcp.f32 %v4733_v50  ;;  %4915 = vmatprep.subr.mxu0 %v4862_v41 }
 0xdee   : > { %v6122_v8 = vpop.eup %6121  ;;  %4916 = vmatpush1.xpose.msra.mxu0 %v4861_v47 }
 0xdef   : > { %v4860_v24 = vmul.f32 %v6122_v8, %v8879_v1  ;;  %v4859_v14 = vmul.f32 %v6122_v8, %v8875_v53  ;;  %v9667_v8 = vld [vmem:[#allocation22_spill] sm:$0xff] }
 0xdf0   : > { %v4727_v60 = vpop.xlane.xlu0 %4726 }
 0xdf1   : > { %6131 = vrcp.f32 %v4727_v60  ;;  %4917 = vmatprep.subr.mxu0 %v4860_v24 }
 0xdf2   : > { %v6124_v59 = vpop.eup %6123  ;;  %4918 = vmatpush1.xpose.msra.mxu0 %v4859_v14  ;;  %6133 = vrcp.f32 %v4724_v61 }
 0xdf3   : > { %v4858_v15 = vmul.f32 %v6124_v59, %v8897_v17  ;;  %v4857_v25 = vmul.f32 %v6124_v59, %v8892_v33 }
 0xdf4   : > { %v4721_v42 = vpop.xlane.xlu0 %4720 }
 0xdf5   : > { %4919 = vmatprep.subr.mxu0 %v4858_v15  ;;  %6135 = vrcp.f32 %v4721_v42 }
 0xdf6   : > { %v6126_v37 = vpop.eup %6125  ;;  %4920 = vmatpush1.xpose.msra.mxu0 %v4857_v25  ;;  %6137 = vrcp.f32 %v4718_v23 }
 0xdf7   : > { %v4856_v62 = vmul.f32 %v6126_v37, %v8903_v56  ;;  %v4855_v1 = vmul.f32 %v6126_v37, %v8899_v55  ;;  %v6128_v53 = vpop.eup %6127 }
 0xdf8   : > { %v4852_v33 = vmul.f32 %v6128_v53, %v8859_v40  ;;  %v4715_v44 = vpop.xlane.xlu0 %4714  ;;  %v4851_v55 = vmul.f32 %v6128_v53, %v8854_v5 }
 0xdf9   : > { %4921 = vmatprep.subr.mxu0 %v4856_v62  ;;  %6139 = vrcp.f32 %v4715_v44 }
 0xdfa   : > { %v6130_v0 = vpop.eup %6129  ;;  %4922 = vmatpush1.xpose.msra.mxu0 %v4855_v1 }
 0xdfb   : > { %v4854_v51 = vmul.f32 %v6130_v0, %v8909_v3  ;;  %v4853_v17 = vmul.f32 %v6130_v0, %v8905_v38 }
 0xdfd   : > { %4923 = vmatprep.subr.mxu0 %v4854_v51 }
 0xdfe   : > { %v6132_v21 = vpop.eup %6131  ;;  %4924 = vmatpush1.xpose.msra.mxu0 %v4853_v17 }
 0xdff   : > { %4925 = vmatprep.subr.mxu0 %v4852_v33  ;;  %v4850_v56 = vmul.f32 %v6132_v21, %v8915_v57  ;;  %v6134_v54 = vpop.eup %6133  ;;  %v4849_v3 = vmul.f32 %v6132_v21, %v8911_v35 }
 0xe00   : > { %v4848_v38 = vmul.f32 %v6134_v54, %v8873_v9  ;;  %v4847_v36 = vmul.f32 %v6134_v54, %v8868_v11 }
 0xe02   : > { %4926 = vmatpush1.xpose.msra.mxu0 %v4851_v55  ;;  %v6136_v48 = vpop.eup %6135 }
 0xe03   : > { %4927 = vmatprep.subr.mxu0 %v4850_v56  ;;  %v4846_v5 = vmul.f32 %v6136_v48, %v8923_v32  ;;  %v6138_v41 = vpop.eup %6137  ;;  %v4845_v47 = vmul.f32 %v6136_v48, %v8919_v18 }
 0xe04   : > { %v4805_v49 = vpop.xlane.xlu0 %4804  ;;  %v4844_v9 = vmul.f32 %v6138_v41, %v8887_v58  ;;  %v4843_v24 = vmul.f32 %v6138_v41, %v9667_v8 }
 0xe06   : > { %4928 = vmatpush1.xpose.msra.mxu0 %v4849_v3  ;;  %v6140_v35 = vpop.eup %6139  ;;  %v9669_v3 = vld [vmem:[#allocation21_spill] sm:$0xff] }
 0xe07   : > { %4929 = vmatprep.subr.mxu0 %v4848_v38  ;;  %v4842_v11 = vmul.f32 %v6140_v35, %v8933_v6  ;;  %v4841_v60 = vmul.f32 %v6140_v35, %v8928_v63 }
 0xe08   : > { %v4808_v40 = vpop.xlane.xlu1 %4807 }
 0xe09   : > { %6141 = vrcp.f32 %v4808_v40  ;;  %v9671_v40 = vld [vmem:[#allocation23_spill] sm:$0xff] }
 0xe0a   : > { %6143 = vrcp.f32 %v4805_v49  ;;  %4930 = vmatpush1.xpose.msra.mxu0 %v4847_v36  ;;  %v4799_v50 = vpop.xlane.xlu0 %4798 }
 0xe0b   : > { %4931 = vmatprep.subr.mxu0 %v4846_v5 }
 0xe0c   : > { %v4802_v57 = vpop.xlane.xlu1 %4801 }
 0xe0d   : > { %6145 = vrcp.f32 %v4802_v57 }
 0xe0e   : > { %4932 = vmatpush1.xpose.msra.mxu0 %v4845_v47  ;;  %6147 = vrcp.f32 %v4799_v50  ;;  %v4793_v58 = vpop.xlane.xlu0 %4792 }
 0xe0f   : > { %4933 = vmatprep.subr.mxu0 %v4844_v9 }
 0xe10   : > { %v4796_v14 = vpop.xlane.xlu1 %4795 }
 0xe11   : > { %6149 = vrcp.f32 %v4796_v14 }
 0xe12   : > { %4934 = vmatpush1.xpose.msra.mxu0 %v4843_v24  ;;  %6151 = vrcp.f32 %v4793_v58 }
 0xe13   : > { %4935 = vmatprep.subr.mxu0 %v4842_v11  ;;  %v9673_v11 = vld [vmem:[#allocation27_spill] sm:$0xff] }
 0xe14   : > { %v4790_v6 = vpop.xlane.xlu1 %4789 }
 0xe15   : > { %6153 = vrcp.f32 %v4790_v6  ;;  %v9679_v6 = vld [vmem:[#allocation16_spill] sm:$0xff] }
 0xe16   : > { %v6142_v32 = vpop.eup %6141  ;;  %4936 = vmatpush1.xpose.msra.mxu0 %v4841_v60 }
 0xe17   : > { %v4904_v18 = vmul.f32 %v6142_v32, %v8955_v10  ;;  %v6144_v59 = vpop.eup %6143  ;;  %v4903_v61 = vmul.f32 %v6142_v32, %v8953_v20 }
 0xe18   : > { %v4902_v15 = vmul.f32 %v6144_v59, %v8947_v16  ;;  %v4901_v37 = vmul.f32 %v6144_v59, %v8945_v2  ;;  %v4787_v10 = vpop.xlane.xlu0 %4786 }
 0xe19   : > { %4937 = vmatprep.subr.mxu0 %v4904_v18  ;;  %6155 = vrcp.f32 %v4787_v10  ;;  %v9683_v10 = vld [vmem:[#allocation20_spill] sm:$0xff] }
 0xe1a   : > { %v6146_v25 = vpop.eup %6145  ;;  %4938 = vmatpush2.xpose.msra.mxu0 %v4903_v61  ;;  %v9677_v61 = vld [vmem:[#allocation6_spill] sm:$0xff] }
 0xe1b   : > { %4939 = vmatprep.subr.mxu0 %v4902_v15  ;;  %v4900_v63 = vmul.f32 %v6146_v25, %v8969_v7  ;;  %v6148_v42 = vpop.eup %6147  ;;  %v4899_v62 = vmul.f32 %v6146_v25, %v8965_v30  ;;  %v9678_v25 = vld [vmem:[#allocation14_spill] sm:$0xff] }
 0xe1c   : > { %v4898_v20 = vmul.f32 %v6148_v42, %v8961_v4  ;;  %v4784_v16 = vpop.xlane.xlu1 %4783  ;;  %v4897_v53 = vmul.f32 %v6148_v42, %v8957_v22  ;;  %v9682_v42 = vld [vmem:[#allocation15_spill] sm:$0xff] }
 0xe1d   : > { %6157 = vrcp.f32 %v4784_v16 }
 0xe1e   : > { %4940 = vmatpush2.xpose.msra.mxu0 %v4901_v37  ;;  %v6150_v1 = vpop.eup %6149  ;;  %v9680_v37 = vld [vmem:[#allocation13_spill] sm:$0xff] }
 0xe1f   : > { %4941 = vmatprep.subr.mxu0 %v4900_v63  ;;  %v4896_v2 = vmul.f32 %v6150_v1, %v8983_v45  ;;  %v6152_v0 = vpop.eup %6151  ;;  %v4895_v23 = vmul.f32 %v6150_v1, %v8979_v39  ;;  %v9681_v63 = vld [vmem:[#allocation18_spill] sm:$0xff]  ;;  %v6241_v1 = vmov 0  }
 0xe20   : > { %v4781_v7 = vpop.xlane.xlu0 %4780  ;;  %v4894_v30 = vmul.f32 %v6152_v0, %v8975_v27  ;;  %v4893_v17 = vmul.f32 %v6152_v0, %v8971_v26  ;;  %v9668_v26 = vld [vmem:[#allocation24_spill] sm:$0xff]  ;;  %5398 = vset.pattern.permute.xlu0 %v6241_v1 }
 0xe21   : > { %6159 = vrcp.f32 %v4781_v7 }
 0xe22   : > { %4942 = vmatpush2.xpose.msra.mxu0 %v4899_v62  ;;  %v6154_v51 = vpop.eup %6153  ;;  %v9684_v62 = vld [vmem:[#allocation17_spill] sm:$0xff] }
 0xe23   : > { %4943 = vmatprep.subr.mxu0 %v4898_v20  ;;  %v4892_v22 = vmul.f32 %v6154_v51, %v8991_v31  ;;  %v4891_v21 = vmul.f32 %v6154_v51, %v8989_v34  ;;  %v9670_v34 = vld [vmem:[#allocation26_spill] sm:$0xff]  ;;  %v5071_v20 = vld [vmem:[%s9177_s3] sm:$0xf] }
 0xe24   : > { %v4778_v4 = vpop.xlane.xlu1 %4777  ;;  %5074 = vperm.xlu0 %5398, %v5071_v20  }
 0xe25   : > { %6161 = vrcp.f32 %v4778_v4 }
 0xe26   : > { %4944 = vmatpush2.xpose.msra.mxu0 %v4897_v53  ;;  %v6156_v33 = vpop.eup %6155 }
 0xe27   : > { %4945 = vmatprep.subr.mxu0 %v4896_v2  ;;  %v4890_v39 = vmul.f32 %v6156_v33, %v8999_v19  ;;  %v4889_v55 = vmul.f32 %v6156_v33, %v8997_v43 }
 0xe28   : > { %v4775_v45 = vpop.xlane.xlu0 %4774 }
 0xe29   : > { %6163 = vrcp.f32 %v4775_v45 }
 0xe2a   : > { %4946 = vmatpush2.xpose.msra.mxu0 %v4895_v23  ;;  %v6158_v44 = vpop.eup %6157 }
 0xe2b   : > { %4947 = vmatprep.subr.mxu0 %v4894_v30  ;;  %v4888_v56 = vmul.f32 %v6158_v44, %v9668_v26  ;;  %v4887_v38 = vmul.f32 %v6158_v44, %v9669_v3 }
 0xe2c   : > { %v4772_v27 = vpop.xlane.xlu1 %4771 }
 0xe2d   : > { %6165 = vrcp.f32 %v4772_v27 }
 0xe2e   : > { %4948 = vmatpush2.xpose.msra.mxu0 %v4893_v17  ;;  %v6160_v54 = vpop.eup %6159 }
 0xe2f   : > { %4949 = vmatprep.subr.mxu0 %v4892_v22  ;;  %v4886_v48 = vmul.f32 %v6160_v54, %v9670_v34  ;;  %v4885_v36 = vmul.f32 %v6160_v54, %v9671_v40  ;;  %v9686_v22 = vld [vmem:[#allocation51_spill] sm:$0xff] }
 0xe30   : > { %v4769_v31 = vpop.xlane.xlu0 %4768 }
 0xe31   : > { %6167 = vrcp.f32 %v4769_v31 }
 0xe32   : > { %4950 = vmatpush2.xpose.msra.mxu0 %v4891_v21  ;;  %v6162_v49 = vpop.eup %6161 }
 0xe33   : > { %4951 = vmatprep.subr.mxu0 %v4890_v39  ;;  %v4884_v43 = vmul.f32 %v6162_v49, %v9023_v46  ;;  %v4883_v57 = vmul.f32 %v6162_v49, %v9021_v28  ;;  %v9672_v46 = vld [vmem:[#allocation25_spill] sm:$0xff]  ;;  %v9674_v28 = vld [vmem:[#allocation28_spill] sm:$0xff]  ;;  %v9687_v39 = vld [vmem:[#allocation50_spill] sm:$0xff] }
 0xe34   : > { %v4766_v19 = vpop.xlane.xlu1 %4765 }
 0xe35   : > { %6169 = vrcp.f32 %v4766_v19 }
 0xe36   : > { %4952 = vmatpush2.xpose.msra.mxu0 %v4889_v55  ;;  %v6164_v5 = vpop.eup %6163 }
 0xe37   : > { %4953 = vmatprep.subr.mxu0 %v4888_v56  ;;  %v4882_v47 = vmul.f32 %v6164_v5, %v9031_v52  ;;  %v4881_v35 = vmul.f32 %v6164_v5, %v9029_v13  ;;  %v9675_v52 = vld [vmem:[#allocation9_spill] sm:$0xff]  ;;  %v9676_v13 = vld [vmem:[#allocation11_spill] sm:$0xff] }
 0xe38   : > { %v4763_v41 = vpop.xlane.xlu0 %4762 }
 0xe39   : > { %6171 = vrcp.f32 %v4763_v41 }
 0xe3a   : > { %4954 = vmatpush2.xpose.msra.mxu0 %v4887_v38  ;;  %v6166_v9 = vpop.eup %6165 }
 0xe3b   : > { %4955 = vmatprep.subr.mxu0 %v4886_v48  ;;  %v4880_v50 = vmul.f32 %v6166_v9, %v9037_v12  ;;  %v4879_v24 = vmul.f32 %v6166_v9, %v9672_v46 }
 0xe3e   : > { %4956 = vmatpush2.xpose.msra.mxu0 %v4885_v36  ;;  %v6168_v8 = vpop.eup %6167 }
 0xe3f   : > { %4957 = vmatprep.subr.mxu0 %v4884_v43  ;;  %v4878_v14 = vmul.f32 %v6168_v8, %v9673_v11  ;;  %v4877_v60 = vmul.f32 %v6168_v8, %v9674_v28 }
 0xe42   : > { %4958 = vmatpush2.xpose.msra.mxu0 %v4883_v57  ;;  %v6170_v32 = vpop.eup %6169 }
 0xe43   : > { %4959 = vmatprep.subr.mxu0 %v4882_v47  ;;  %v4876_v18 = vmul.f32 %v6170_v32, %v9675_v52  ;;  %v4875_v58 = vmul.f32 %v6170_v32, %v9676_v13 }
 0xe46   : > { %4960 = vmatpush2.xpose.msra.mxu0 %v4881_v35  ;;  %v6172_v59 = vpop.eup %6171 }
 0xe47   : > { %4961 = vmatprep.subr.mxu0 %v4880_v50  ;;  %v4874_v12 = vmul.f32 %v6172_v59, %v9055_v29  ;;  %v4873_v15 = vmul.f32 %v6172_v59, %v9677_v61  ;;  %v9685_v29 = vmov 0.0  }
 0xe4a   : > { %4962 = vmatpush2.xpose.msra.mxu0 %v4879_v24 }
 0xe4b   : > { %4963 = vmatprep.subr.mxu0 %v4878_v14 }
 0xe4e   : > { %4964 = vmatpush2.xpose.msra.mxu0 %v4877_v60 }
 0xe4f   : > { %4965 = vmatprep.subr.mxu0 %v4876_v18 }
 0xe52   : > { %4966 = vmatpush2.xpose.msra.mxu0 %v4875_v58  ;;  %v4995_v4 = vpop.permute.xlu1 %4994 }
 0xe53   : > { %4967 = vmatprep.subr.mxu0 %v4874_v12 }
 0xe56   : > { %4968 = vmatpush2.xpose.msra.mxu0 %v4873_v15 }
 0xe59   : > { %4970 = vmatmul.mubr.f32.vlgmr.msra.gmra.mxu0 %v9678_v25 }
 0xe5a   : > { %4975 = vmatprep.mubr.f32.mxu0 %v9679_v6 }
 0xe5d   : > { %4976 = vmatmul.mubr.f32.gmra.mxu0 %v9680_v37 }
 0xe5e   : > { %4981 = vmatprep.mubr.f32.mxu0 %v9681_v63 }
 0xe61   : > { %4982 = vmatmul.mubr.f32.gmra.mxu0 %v9682_v42 }
 0xe62   : > { %4987 = vmatprep.mubr.f32.mxu0 %v9683_v10 }
 0xe65   : > { %4988 = vmatmul.mubr.f32.gmra.mxu0 %v9684_v62 }
 0xe66   : > { %5062 = vmatprep.mubr.f32.mxu0 %v9685_v29 }
 0xe9f   : > { %v5075_v21 = vpop.permute.xlu0 %5074 }
 0xf19   : > { %v4971_v16 = vpop.f32.mrf.mxu0 }
 0xf1b   : > { %v4973_v53 = vpop.f32.mrf.mxu0 }
 0xf1d   : > { %v4977_v2 = vpop.f32.mrf.mxu0 }
 0xf1f   : > { %v4979_v0 = vpop.f32.mrf.mxu0 }
 0xf21   : > { %v4983_v7 = vpop.f32.mrf.mxu0 }
 0xf23   : > { %v4985_v23 = vpop.f32.mrf.mxu0 }
 0xf25   : > { %v4989_v30 = vpop.f32.mrf.mxu0 }
 0xf27   : > { %v4991_v51 = vpop.f32.mrf.mxu0 }
 0xf28   : > { %5022 = vmatprep.subr.mxu0 %v4991_v51 }
 0xf29   : > { %5023 = vmatpush1.msra.mxu0 %v4989_v30 }
 0xf2a   : > { %5024 = vmatprep.subr.mxu0 %v4985_v23 }
 0xf2b   : > { %5025 = vmatpush1.msra.mxu0 %v4983_v7 }
 0xf2c   : > { %5026 = vmatprep.subr.mxu0 %v4979_v0 }
 0xf2d   : > { %5027 = vmatpush1.msra.mxu0 %v4977_v2 }
 0xf2e   : > { %5028 = vmatprep.subr.mxu0 %v4973_v53 }
 0xf2f   : > { %5029 = vmatpush1.msra.mxu0 %v4971_v16 }
 0xf30   : > { %5346 = vmatmul.mubr.msk.f32.vlgmr.msra.gmra.mxu0 %vm863_vm6, %v4995_v4 }
 0xff0   : > { %v5064_v17 = vpop.f32.mrf.mxu0 }
 0xff1   : > { %v5069_v33 = vadd.f32 %v5064_v17, %v9686_v22 }
 0xff2   : > { %v5066_v45 = vpop.f32.mrf.mxu0 }
 0xff3   : > { %v5070_v44 = vadd.f32 %v5066_v45, %v9687_v39  ;;  %v5077_v27 = vadd.f32 %v5075_v21, %v5069_v33 }
 0xff5   : > { %v5078_v55 = vadd.f32 %v5075_v21, %v5070_v44 }
 0xff7   : > { %v5081_v26 = vcombine.low %v5077_v27, %v5078_v55 }
 0xff9   : > { %5083 = vst [vmem:[%s190_s14] sm:$0xff] %v5081_v26 }
 0xffa   : > { %6188 = shalt.err (!%p6185_p3)
}
 0xffb   : > { %s6189_s6 = scalar_lea.hbm %s5097_s27, 128  ;;  %s6193_s9 = scalar_lea.hbm %s9178_s4, 256 }
 0xffc   : > { %p6190_p4 = scmp.ne.s32.totalorder %s5097_s27, %s6189_s6  ;;  %p6194_p9 = scmp.lt.s32.totalorder %s5097_s27, %s9178_s4 }
 0xffd   : > { %p6195_p10 = scmp.lt.s32.totalorder %s6193_s9, %s6189_s6 }
 0xffe   : > { %p6191_p7 = pnand %p6190_p4, %p6306_p5 }
 0xfff   : > { %p6196_p11 = por %p6195_p10, %p6194_p9 }
0x1000   : > { %p6192_p8 = pneg %p6191_p7 }
0x1002   : > { %p6197_p12 = pnand %p6196_p11, %p6192_p8 }
0x1004   : > { %6200 = shalt.err (!%p6197_p12)
}
0x1005   : > { %5354 = dma.vmem_to_hbm [thread:$0]  (%p6306_p5), %s5100_s20, 128, %s5097_s27, %s5085_s28  }
0x1006 PF: > { %p5360_p13 = scmp.ge.s32.totalorder %s6235_s18, 2  ;;  %s5111_s12 = sand.u32 1, %s6223_s15  }
0x1007   : > { %s5112_s13 = scalar_lea.sflag [#allocation3], %s5111_s12 }
0x1008   : > { %p5357_p0 = pnand %p5360_p13, %p6310_p6 }
0x100a   : > { %p5358_p1 = pneg %p5357_p0 }
0x100c   : > { %6218 = dma.done.wait (%p5358_p1), %s5112_s13, 128  }
0x100d   : > { %6220 = vsyncadd (%p5358_p1), %s5112_s13, 4294967168  ;;  %p14_p2 = scmp.ge.s32.totalorder %s6293_s21, 4   ;;  %s9688_s15 = smov %s6227_s16 }
0x100e   : > { %s9689_s16 = smov %s6231_s17  ;;  %s9690_s17 = smov %s6304_s24 }
0x100f   : > { %s9691_s18 = smov %s6293_s21  ;;  %16 = sbr.rel (!%p14_p2) target bundleno = 3 (0x3), region = 71 }
0x1014   :  { %5117 = vsyncpa [#allocation3], 1 }
0x1015   :  { %5119 = vsyncpa [#allocation3 + $0x1], 1 }

</bundles_post_ra>
